<compile_context>
chip_gen: v5e
topology: v5e:2x2
jax: 0.10.0
libtpu: 0.0.40
codegen_flags: <defaults>
</compile_context>

<pallas_src>
import functools
import math

import numpy as np
import jax
import jax.numpy as jnp
from jax.experimental import pallas as pl
from jax.experimental.pallas import tpu as pltpu

# ----------------------- model configuration (small demo sizes) ----------------------
VOCAB        = 50
B            = 2
L            = 8          # sequence length
DIM_EMBED    = 32         # BERT hidden size == dim_embedding
D_MODEL      = 32
N_HEAD       = 4
HEAD_DIM     = D_MODEL // N_HEAD
FF_DIM       = 64
N_LAYERS     = 2
N_TAGS       = 5          # len(tag_vocab)
GP_HEAD_SIZE = 16
LN_EPS       = 1e-5
NEG_BIG      = -1e30      # finite "-inf": keeps fully-masked rows NaN-free

_CONTRACT_LAST = (((1,), (1,)), ((), ()))   # a @ b.T (contract last dims)


# ------------------------------- in-kernel helpers ------------------------------------

def _dot(a, b):
    """MXU matmul a @ b, bf16 operands, f32 accumulation."""
    return jnp.dot(a.astype(jnp.bfloat16), b.astype(jnp.bfloat16),
                   preferred_element_type=jnp.float32)


def _dot_t(a, b):
    """MXU matmul a @ b.T (contract last dims), bf16 operands, f32 accumulation."""
    return jax.lax.dot_general(a.astype(jnp.bfloat16), b.astype(jnp.bfloat16),
                               _CONTRACT_LAST, preferred_element_type=jnp.float32)


def _layernorm(x, g, b, eps=LN_EPS):
    mu = jnp.mean(x, axis=-1, keepdims=True)
    var = jnp.mean((x - mu) ** 2, axis=-1, keepdims=True)
    return (x - mu) * jax.lax.rsqrt(var + eps) * g + b


# =============================== Pallas kernel 1 =======================================
# BERT-stand-in LayerNorm fused with in_fc (matmul + bias).

def _embed_in_fc_kernel(e_ref, g_ref, b_ref, w_ref, wb_ref, o_ref):
    y = _layernorm(e_ref[...], g_ref[...], b_ref[...])
    o_ref[...] = _dot(y, w_ref[...]) + wb_ref[...]


def embed_layernorm_in_fc(emb2, g, b, w, wb):
    return pl.pallas_call(
        _embed_in_fc_kernel,
        out_shape=jax.ShapeDtypeStruct((emb2.shape[0], w.shape[1]), jnp.float32),
    )(emb2, g.reshape(1, -1), b.reshape(1, -1), w, wb.reshape(1, -1))


# =============================== Pallas kernel 2 =======================================
# One full TENER adatrans TransformerLayer (post-norm, eval mode) in a single kernel.

def _layer_kernel(x_ref, kbias_ref, sinr_ref, cosr_ref, pabs_ref,
                  wqv_ref, rr_ref, rw_ref,
                  ln1g_ref, ln1b_ref, ffw1_ref, ffb1_ref, ffw2_ref, ffb2_ref,
                  ln2g_ref, ln2b_ref,
                  o_ref, qv_scr,
                  *, batch, seq, n_head, head_dim):
    d_model = n_head * head_dim
    half = head_dim // 2

    x = x_ref[...]                                   # (B*L, D)
    qv_scr[...] = _dot(x, wqv_ref[...])              # qv_linear (no bias) -> (B*L, 2D)

    sin_r = sinr_ref[...]                            # (L, Dh/2)  sin(r * f)
    cos_r = cosr_ref[...]                            # (L, Dh/2)  cos(r * f)
    pabs = pabs_ref[...]                             # (L, Dh)    [sin(j*f) | cos(j*f)]

    def rel_rotate(t):
        # Angle-addition rotation so that rel_rotate(t) @ pabs.T reproduces
        # t . pos[relative offset] exactly (TENER shift without any gather).
        t1, t2 = t[:, :half], t[:, half:]
        return jnp.concatenate([t1 * cos_r + t2 * sin_r,
                                t2 * cos_r - t1 * sin_r], axis=-1)

    batch_rows = []
    for b in range(batch):                           # static loops: whole problem in VMEM
        r0 = b * seq
        kb = kbias_ref[pl.ds(b, 1), :]               # (1, L) additive key-padding mask
        head_outs = []
        for h in range(n_head):
            c0 = h * head_dim
            q_h = qv_scr[pl.ds(r0, seq), pl.ds(c0, head_dim)]             # (L, Dh)
            v_h = qv_scr[pl.ds(r0, seq), pl.ds(d_model + c0, head_dim)]   # (L, Dh)
            k_h = x_ref[pl.ds(r0, seq), pl.ds(c0, head_dim)]              # keys = raw x
            rr_h = rr_ref[pl.ds(h, 1), :]            # (1, Dh)  r_r_bias
            rw_h = rw_ref[pl.ds(h, 1), :]            # (1, Dh)  r_w_bias

            ac = _dot_t(q_h + rr_h, k_h)                         # (q + r_r_bias) . k
            bd = _dot_t(rel_rotate(q_h + rw_h), pabs)            # == shift(B_ + D_)
            et = _dot_t(pabs, rel_rotate(k_h))                   # == transpose_shift(E_)

            s = ac + bd + et + kb                                # scale=False -> no 1/sqrt
            s = s - jnp.max(s, axis=-1, keepdims=True)
            p = jnp.exp(s)
            p = p * pl.reciprocal(jnp.sum(p, axis=-1, keepdims=True), approx=True)
            head_outs.append(_dot(p, v_h))                       # (L, Dh)
        batch_rows.append(jnp.concatenate(head_outs, axis=-1))   # head merge -> (L, D)
    attn = jnp.concatenate(batch_rows, axis=0)                   # (B*L, D), lane-dense

    # post-norm residual block 1 (attention)
    y1 = _layernorm(x + attn, ln1g_ref[...], ln1b_ref[...])
    # FFN + post-norm residual block 2
    ff = jnp.maximum(_dot(y1, ffw1_ref[...]) + ffb1_ref[...], 0.0)
    y2 = y1 + _dot(ff, ffw2_ref[...]) + ffb2_ref[...]
    o_ref[...] = _layernorm(y2, ln2g_ref[...], ln2b_ref[...])


def fused_transformer_layer(x2, kbias, rel_tabs, lp, batch, seq):
    sin_r, cos_r, pabs = rel_tabs
    kern = functools.partial(_layer_kernel, batch=batch, seq=seq,
                             n_head=N_HEAD, head_dim=HEAD_DIM)
    return pl.pallas_call(
        kern,
        out_shape=jax.ShapeDtypeStruct(x2.shape, jnp.float32),
        scratch_shapes=[pltpu.VMEM((batch * seq, 2 * D_MODEL), jnp.float32)],
    )(x2, kbias, sin_r, cos_r, pabs,
      lp["w_qv"], lp["r_r_bias"], lp["r_w_bias"],
      lp["ln1_g"].reshape(1, -1), lp["ln1_b"].reshape(1, -1),
      lp["ff_w1"], lp["ff_b1"].reshape(1, -1),
      lp["ff_w2"], lp["ff_b2"].reshape(1, -1),
      lp["ln2_g"].reshape(1, -1), lp["ln2_b"].reshape(1, -1))


# =============================== Pallas kernel 3 =======================================
# EfficientGlobalPointer: dense_1 + RoPE + dense_2 biases + qk logits + masking.
# dense_1 / dense_2 weights arrive de-interleaved (q/k x even/odd RoPE channels) so the
# kernel needs no strided lane access; the RoPE rotation is plain 2-D elementwise math.

def _gp_kernel(x_ref, mrow_ref, mcol_ref, sin_ref, cos_ref,
               w1qe_ref, w1qo_ref, w1ke_ref, w1ko_ref,
               b1qe_ref, b1qo_ref, b1ke_ref, b1ko_ref,
               w2qe_ref, w2qo_ref, w2ke_ref, w2ko_ref, b2_ref,
               o_ref, *, batch, seq, n_tags, head_size):
    x = x_ref[...]                                        # (B*L, D)
    qe = _dot(x, w1qe_ref[...]) + b1qe_ref[...]           # qw even channels (B*L, hs/2)
    qo = _dot(x, w1qo_ref[...]) + b1qo_ref[...]           # qw odd  channels
    ke = _dot(x, w1ke_ref[...]) + b1ke_ref[...]
    ko = _dot(x, w1ko_ref[...]) + b1ko_ref[...]

    # dense_2 on the pre-RoPE dense_1 output; transposed bias / 2 as in the reference.
    bias_all = (_dot(qe, w2qe_ref[...]) + _dot(qo, w2qo_ref[...]) +
                _dot(ke, w2ke_ref[...]) + _dot(ko, w2ko_ref[...]) +
                b2_ref[...]) * 0.5                        # (B*L, 2*n_tags)

    # RoPE; fold 1/sqrt(head_size) into the query side (no per-element divide later).
    sin = sin_ref[...]
    cos = cos_ref[...]
    scale = 1.0 / math.sqrt(head_size)
    qcat = jnp.concatenate([(qe * cos - qo * sin) * scale,
                            (qo * cos + qe * sin) * scale], axis=-1)   # (B*L, hs)
    kcat = jnp.concatenate([ke * cos - ko * sin,
                            ko * cos + ke * sin], axis=-1)             # (B*L, hs)

    row_i = jax.lax.broadcasted_iota(jnp.int32, (seq, seq), 0)
    col_i = jax.lax.broadcasted_iota(jnp.int32, (seq, seq), 1)
    tril = (row_i > col_i).astype(jnp.float32)            # strictly lower triangle
    ones_col = jnp.ones((seq, 1), jnp.float32)

    for b in range(batch):
        r0 = b * seq
        qk = _dot_t(qcat[r0:r0 + seq, :], kcat[r0:r0 + seq, :])        # (L, L)
        mr = mcol_ref[pl.ds(r0, seq), :]                  # (L, 1)
        mc = mrow_ref[pl.ds(b, 1), :]                     # (1, L)
        pad = mr * mc                                     # pad[i, j] = mask[i]*mask[j]
        for t in range(n_tags):
            cvec = bias_all[r0:r0 + seq, 2 * t:2 * t + 1]       # (L, 1) column bias
            rvec = bias_all[r0:r0 + seq, 2 * t + 1:2 * t + 2]   # (L, 1) row bias
            # broadcast the column bias across rows via an outer product with ones
            cmat = jax.lax.dot_general(ones_col, cvec, _CONTRACT_LAST,
                                       preferred_element_type=jnp.float32)
            lg = qk + cmat + rvec
            lg = lg * pad - (1.0 - pad) * 1e12            # padding mask
            o_ref[b, t] = lg - tril * 1e12                # mask lower triangle


def efficient_global_pointer(x2, maskf, p, batch, seq):
    hs = GP_HEAD_SIZE
    w1, b1 = p["gp_w1"], p["gp_b1"]
    w2, b2 = p["gp_w2"], p["gp_b2"]
    sin_h, cos_h = gp_rope_half_tables(seq, hs)           # numpy constants (L, hs/2)
    sin_t = jnp.asarray(np.tile(sin_h, (batch, 1)))       # (B*L, hs/2)
    cos_t = jnp.asarray(np.tile(cos_h, (batch, 1)))
    kern = functools.partial(_gp_kernel, batch=batch, seq=seq,
                             n_tags=N_TAGS, head_size=hs)
    return pl.pallas_call(
        kern,
        out_shape=jax.ShapeDtypeStruct((batch, N_TAGS, seq, seq), jnp.float32),
    )(x2, maskf, maskf.reshape(batch * seq, 1), sin_t, cos_t,
      # dense_1 output channel c: q/k = (c even/odd), RoPE pair parity = (c//2) % 2
      #   -> q_even = 0::4, k_even = 1::4, q_odd = 2::4, k_odd = 3::4
      w1[:, 0::4], w1[:, 2::4], w1[:, 1::4], w1[:, 3::4],
      b1[0::4].reshape(1, -1), b1[2::4].reshape(1, -1),
      b1[1::4].reshape(1, -1), b1[3::4].reshape(1, -1),
      w2[0::4], w2[2::4], w2[1::4], w2[3::4],
      b2.reshape(1, -1))


# =============================== position tables (numpy) ===============================

def rel_attention_tables(seq_len, head_dim):
    """Absolute sin/cos tables that reproduce TENER's RelativeSinusoidalPositionalEmbedding
    combined with _shift / _transpose_shift exactly (pos[L+j-r] expanded with the
    angle-addition identity so the shifted terms become plain matmuls)."""
    half = head_dim // 2
    emb_scale = math.log(10000.0) / (half - 1)
    freqs = np.exp(np.arange(half, dtype=np.float32) * -emb_scale)
    ang = np.arange(seq_len, dtype=np.float32)[:, None] * freqs[None, :]   # (L, half)
    sin_r = np.sin(ang).astype(np.float32)
    cos_r = np.cos(ang).astype(np.float32)
    pabs = np.concatenate([sin_r, cos_r], axis=1).astype(np.float32)       # (L, head_dim)
    return jnp.asarray(sin_r), jnp.asarray(cos_r), jnp.asarray(pabs)


def gp_rope_half_tables(seq_len, output_dim):
    """SinusoidalPositionEmbedding(head_size, 'zero') per-pair sin/cos (pre repeat)."""
    pos_ids = np.arange(seq_len, dtype=np.float32)
    idx = np.power(10000.0, -2.0 * np.arange(output_dim // 2, dtype=np.float32) / output_dim)
    ang = pos_ids[:, None] * idx[None, :]
    return np.sin(ang).astype(np.float32), np.cos(ang).astype(np.float32)


# ==================================== forward ==========================================

def bert_stand_in_embed(params, inputs_idx):
    # TODO(synk): load_bert(bert_cfg, True) loads a pretrained multi-layer BERT encoder from
    # an external checkpoint that cannot be reproduced here; stand-in is a deterministic
    # word+position embedding whose LayerNorm is fused with in_fc in a Pallas kernel.
    Bq, Lq = inputs_idx.shape
    emb = params["bert_word_emb"][inputs_idx] + params["bert_pos_emb"][None, :Lq]
    return emb.reshape(Bq * Lq, DIM_EMBED)


@jax.jit
def tener_forward(params, inputs_idx, segments=None, target=None):
    """target=None path of TENER._forward (predict): returns global-pointer logits.
    `segments` is accepted but unused, matching the reference forward."""
    del segments, target
    Bq, Lq = inputs_idx.shape
    maskf = (inputs_idx != 0).astype(jnp.float32)                  # mask_tensor
    # BERT stand-in + in_fc  (1 fused kernel)
    emb2 = bert_stand_in_embed(params, inputs_idx)
    x2 = embed_layernorm_in_fc(emb2, params["bert_ln_g"], params["bert_ln_b"],
                               params["in_fc_w"], params["in_fc_b"])     # (B*L, D)
    # adaptive-Transformer encoder  (1 fused kernel per layer)
    rel_tabs = rel_attention_tables(Lq, HEAD_DIM)
    kbias = (1.0 - maskf) * NEG_BIG                                # additive key mask
    for lp in params["layers"]:                                    # use_te=True
        x2 = fused_transformer_layer(x2, kbias, rel_tabs, lp, Bq, Lq)
    # fc_dropout: identity in eval mode.  EfficientGlobalPointer  (1 fused kernel)
    return efficient_global_pointer(x2, maskf, params, Bq, Lq)     # (B, n_tags, L, L)


# ==================================== parameters =======================================

def init_params(key):
    def nrm(k, shape, scale=0.02):
        return scale * jax.random.normal(k, shape, dtype=jnp.float32)

    keys = iter(jax.random.split(key, 64))
    p = {}
    # stand-in BERT embeddings
    p["bert_word_emb"] = nrm(next(keys), (VOCAB, DIM_EMBED))
    p["bert_pos_emb"] = nrm(next(keys), (L, DIM_EMBED))
    p["bert_ln_g"] = jnp.ones((DIM_EMBED,), jnp.float32)
    p["bert_ln_b"] = jnp.zeros((DIM_EMBED,), jnp.float32)
    # in_fc
    p["in_fc_w"] = nrm(next(keys), (DIM_EMBED, D_MODEL), 0.05)
    p["in_fc_b"] = jnp.zeros((D_MODEL,), jnp.float32)
    # adatrans transformer layers
    layers = []
    for _ in range(N_LAYERS):
        layers.append({
            "w_qv": nrm(next(keys), (D_MODEL, 2 * D_MODEL), 0.05),      # qv_linear (no bias)
            "r_r_bias": nrm(next(keys), (N_HEAD, HEAD_DIM), 0.1),
            "r_w_bias": nrm(next(keys), (N_HEAD, HEAD_DIM), 0.1),
            "ln1_g": jnp.ones((D_MODEL,), jnp.float32),
            "ln1_b": jnp.zeros((D_MODEL,), jnp.float32),
            "ff_w1": nrm(next(keys), (D_MODEL, FF_DIM), 0.05),
            "ff_b1": jnp.zeros((FF_DIM,), jnp.float32),
            "ff_w2": nrm(next(keys), (FF_DIM, D_MODEL), 0.05),
            "ff_b2": jnp.zeros((D_MODEL,), jnp.float32),
            "ln2_g": jnp.ones((D_MODEL,), jnp.float32),
            "ln2_b": jnp.zeros((D_MODEL,), jnp.float32),
        })
    p["layers"] = layers
    # EfficientGlobalPointer
    p["gp_w1"] = nrm(next(keys), (D_MODEL, 2 * GP_HEAD_SIZE), 0.05)
    p["gp_b1"] = jnp.zeros((2 * GP_HEAD_SIZE,), jnp.float32)
    p["gp_w2"] = nrm(next(keys), (2 * GP_HEAD_SIZE, 2 * N_TAGS), 0.05)
    p["gp_b2"] = jnp.zeros((2 * N_TAGS,), jnp.float32)
    # out_fc is defined in the PyTorch module but never used in its forward; omitted.
    return p


# ======================================== main =========================================

if __name__ == "__main__":
    key = jax.random.PRNGKey(0)
    pkey, dkey = jax.random.split(key)
    params = init_params(pkey)

    inputs_idx = jax.random.randint(dkey, (B, L), 1, VOCAB, dtype=jnp.int32)
    inputs_idx = inputs_idx.at[1, L - 2:].set(0)          # a little padding in sequence 1
    segments = jnp.zeros((B, L), jnp.int32)               # unused, as in the reference

    logits = tener_forward(params, inputs_idx, segments=segments, target=None)
    logits = jax.block_until_ready(logits)

    assert logits.shape == (B, N_TAGS, L, L)
    assert bool(jnp.all(jnp.isfinite(logits)))
    print("KERNEL_OK")
</pallas_src>

<mosaic_0001>
module attributes {stable_mosaic.version = 11 : i64} {
  func.func @_embed_in_fc_kernel(%arg0: memref<16x32xf32, #tpu.memory_space<vmem>>, %arg1: memref<1x32xf32, #tpu.memory_space<vmem>>, %arg2: memref<1x32xf32, #tpu.memory_space<vmem>>, %arg3: memref<32x32xf32, #tpu.memory_space<vmem>>, %arg4: memref<1x32xf32, #tpu.memory_space<vmem>>, %arg5: memref<16x32xf32, #tpu.memory_space<vmem>>) attributes {dimension_semantics = [], scalar_prefetch = 0 : i64, scratch_operands = 0 : i64, tpu.core_type = #tpu.core_type<tc>} {
    %c0 = arith.constant 0 : index
    %c0_0 = arith.constant 0 : index
    %0 = vector.load %arg0[%c0, %c0_0] : memref<16x32xf32, #tpu.memory_space<vmem>>, vector<16x32xf32>
    %c0_1 = arith.constant 0 : index
    %c0_2 = arith.constant 0 : index
    %1 = vector.load %arg1[%c0_1, %c0_2] : memref<1x32xf32, #tpu.memory_space<vmem>>, vector<1x32xf32>
    %c0_3 = arith.constant 0 : index
    %c0_4 = arith.constant 0 : index
    %2 = vector.load %arg2[%c0_3, %c0_4] : memref<1x32xf32, #tpu.memory_space<vmem>>, vector<1x32xf32>
    %cst = arith.constant dense<0.000000e+00> : vector<16xf32>
    %3 = vector.multi_reduction <add>, %0, %cst [1] : vector<16x32xf32> to vector<16xf32>
    %4 = vector.shape_cast %3 : vector<16xf32> to vector<16x1xf32>
    %cst_5 = arith.constant 3.200000e+01 : f32
    %5 = vector.broadcast %cst_5 : f32 to vector<16x1xf32>
    %6 = arith.divf %4, %5 : vector<16x1xf32>
    %7 = vector.broadcast %6 : vector<16x1xf32> to vector<16x32xf32>
    %8 = arith.subf %0, %7 : vector<16x32xf32>
    %9 = arith.mulf %8, %8 : vector<16x32xf32>
    %cst_6 = arith.constant dense<0.000000e+00> : vector<16xf32>
    %10 = vector.multi_reduction <add>, %9, %cst_6 [1] : vector<16x32xf32> to vector<16xf32>
    %11 = vector.shape_cast %10 : vector<16xf32> to vector<16x1xf32>
    %cst_7 = arith.constant 3.200000e+01 : f32
    %12 = vector.broadcast %cst_7 : f32 to vector<16x1xf32>
    %13 = arith.divf %11, %12 : vector<16x1xf32>
    %14 = vector.broadcast %6 : vector<16x1xf32> to vector<16x32xf32>
    %15 = arith.subf %0, %14 : vector<16x32xf32>
    %cst_8 = arith.constant 9.99999974E-6 : f32
    %16 = vector.broadcast %cst_8 : f32 to vector<16x1xf32>
    %17 = arith.addf %13, %16 : vector<16x1xf32>
    %18 = math.rsqrt %17 : vector<16x1xf32>
    %19 = vector.broadcast %18 : vector<16x1xf32> to vector<16x32xf32>
    %20 = arith.mulf %15, %19 : vector<16x32xf32>
    %21 = vector.broadcast %1 : vector<1x32xf32> to vector<16x32xf32>
    %22 = arith.mulf %20, %21 : vector<16x32xf32>
    %23 = vector.broadcast %2 : vector<1x32xf32> to vector<16x32xf32>
    %24 = arith.addf %22, %23 : vector<16x32xf32>
    %c0_9 = arith.constant 0 : index
    %c0_10 = arith.constant 0 : index
    %25 = vector.load %arg3[%c0_9, %c0_10] : memref<32x32xf32, #tpu.memory_space<vmem>>, vector<32x32xf32>
    %26 = arith.truncf %24 : vector<16x32xf32> to vector<16x32xbf16>
    %27 = arith.truncf %25 : vector<32x32xf32> to vector<32x32xbf16>
    %cst_11 = arith.constant dense<0.000000e+00> : vector<16x32xf32>
    %28 = tpu.matmul %26, %27, %cst_11 {dimension_numbers = #tpu.dot_dimension_numbers<[1], [0], [0], [1], [0, 0, 1, 1], [], []>} : vector<16x32xbf16>, vector<32x32xbf16>, vector<16x32xf32> -> vector<16x32xf32>
    %c0_12 = arith.constant 0 : index
    %c0_13 = arith.constant 0 : index
    %29 = vector.load %arg4[%c0_12, %c0_13] : memref<1x32xf32, #tpu.memory_space<vmem>>, vector<1x32xf32>
    %30 = vector.broadcast %29 : vector<1x32xf32> to vector<16x32xf32>
    %31 = arith.addf %28, %30 : vector<16x32xf32>
    %c0_14 = arith.constant 0 : index
    %c0_15 = arith.constant 0 : index
    %32 = vector.load %arg5[%c0_14, %c0_15] : memref<16x32xf32, #tpu.memory_space<vmem>>, vector<16x32xf32>
    tpu.vector_store %arg5[%c0_14, %c0_15], %31 {strides = array<i32>} : memref<16x32xf32, #tpu.memory_space<vmem>>, vector<16x32xf32>,
    return
  }
}

module attributes {stable_mosaic.version = 11 : i64} {
  func.func @_layer_kernel(%arg0: memref<16x32xf32, #tpu.memory_space<vmem>>, %arg1: memref<2x8xf32, #tpu.memory_space<vmem>>, %arg2: memref<8x4xf32, #tpu.memory_space<vmem>>, %arg3: memref<8x4xf32, #tpu.memory_space<vmem>>, %arg4: memref<8x8xf32, #tpu.memory_space<vmem>>, %arg5: memref<32x64xf32, #tpu.memory_space<vmem>>, %arg6: memref<4x8xf32, #tpu.memory_space<vmem>>, %arg7: memref<4x8xf32, #tpu.memory_space<vmem>>, %arg8: memref<1x32xf32, #tpu.memory_space<vmem>>, %arg9: memref<1x32xf32, #tpu.memory_space<vmem>>, %arg10: memref<32x64xf32, #tpu.memory_space<vmem>>, %arg11: memref<1x64xf32, #tpu.memory_space<vmem>>, %arg12: memref<64x32xf32, #tpu.memory_space<vmem>>, %arg13: memref<1x32xf32, #tpu.memory_space<vmem>>, %arg14: memref<1x32xf32, #tpu.memory_space<vmem>>, %arg15: memref<1x32xf32, #tpu.memory_space<vmem>>, %arg16: memref<16x32xf32, #tpu.memory_space<vmem>>, %arg17: memref<16x64xf32, #tpu.memory_space<vmem>>) attributes {dimension_semantics = [], scalar_prefetch = 0 : i64, scratch_operands = 1 : i64, tpu.core_type = #tpu.core_type<tc>} {
    %c0 = arith.constant 0 : index
    %c0_0 = arith.constant 0 : index
    %0 = vector.load %arg0[%c0, %c0_0] : memref<16x32xf32, #tpu.memory_space<vmem>>, vector<16x32xf32>
    %c0_1 = arith.constant 0 : index
    %c0_2 = arith.constant 0 : index
    %1 = vector.load %arg5[%c0_1, %c0_2] : memref<32x64xf32, #tpu.memory_space<vmem>>, vector<32x64xf32>
    %2 = arith.truncf %0 : vector<16x32xf32> to vector<16x32xbf16>
    %3 = arith.truncf %1 : vector<32x64xf32> to vector<32x64xbf16>
    %cst = arith.constant dense<0.000000e+00> : vector<16x64xf32>
    %4 = tpu.matmul %2, %3, %cst {dimension_numbers = #tpu.dot_dimension_numbers<[1], [0], [0], [1], [0, 0, 1, 1], [], []>} : vector<16x32xbf16>, vector<32x64xbf16>, vector<16x64xf32> -> vector<16x64xf32>
    %c0_3 = arith.constant 0 : index
    %c0_4 = arith.constant 0 : index
    %5 = vector.load %arg17[%c0_3, %c0_4] : memref<16x64xf32, #tpu.memory_space<vmem>>, vector<16x64xf32>
    tpu.vector_store %arg17[%c0_3, %c0_4], %4 {strides = array<i32>} : memref<16x64xf32, #tpu.memory_space<vmem>>, vector<16x64xf32>,
    %c0_5 = arith.constant 0 : index
    %c0_6 = arith.constant 0 : index
    %6 = vector.load %arg2[%c0_5, %c0_6] : memref<8x4xf32, #tpu.memory_space<vmem>>, vector<8x4xf32>
    %c0_7 = arith.constant 0 : index
    %c0_8 = arith.constant 0 : index
    %7 = vector.load %arg3[%c0_7, %c0_8] : memref<8x4xf32, #tpu.memory_space<vmem>>, vector<8x4xf32>
    %c0_9 = arith.constant 0 : index
    %c0_10 = arith.constant 0 : index
    %8 = vector.load %arg4[%c0_9, %c0_10] : memref<8x8xf32, #tpu.memory_space<vmem>>, vector<8x8xf32>
    %c0_11 = arith.constant 0 : index
    %c0_12 = arith.constant 0 : index
    %9 = vector.load %arg1[%c0_11, %c0_12] : memref<2x8xf32, #tpu.memory_space<vmem>>, vector<1x8xf32>
    %c0_13 = arith.constant 0 : index
    %c0_14 = arith.constant 0 : index
    %10 = vector.load %arg17[%c0_13, %c0_14] : memref<16x64xf32, #tpu.memory_space<vmem>>, vector<8x8xf32>
    %c0_15 = arith.constant 0 : index
    %c32 = arith.constant 32 : index
    %11 = vector.load %arg17[%c0_15, %c32] : memref<16x64xf32, #tpu.memory_space<vmem>>, vector<8x8xf32>
    %c0_16 = arith.constant 0 : index
    %c0_17 = arith.constant 0 : index
    %12 = vector.load %arg0[%c0_16, %c0_17] : memref<16x32xf32, #tpu.memory_space<vmem>>, vector<8x8xf32>
    %c0_18 = arith.constant 0 : index
    %c0_19 = arith.constant 0 : index
    %13 = vector.load %arg6[%c0_18, %c0_19] : memref<4x8xf32, #tpu.memory_space<vmem>>, vector<1x8xf32>
    %c0_20 = arith.constant 0 : index
    %c0_21 = arith.constant 0 : index
    %14 = vector.load %arg7[%c0_20, %c0_21] : memref<4x8xf32, #tpu.memory_space<vmem>>, vector<1x8xf32>
    %15 = vector.broadcast %13 : vector<1x8xf32> to vector<8x8xf32>
    %16 = arith.addf %10, %15 : vector<8x8xf32>
    %17 = arith.truncf %16 : vector<8x8xf32> to vector<8x8xbf16>
    %18 = arith.truncf %12 : vector<8x8xf32> to vector<8x8xbf16>
    %cst_22 = arith.constant dense<0.000000e+00> : vector<8x8xf32>
    %19 = tpu.matmul %17, %18, %cst_22 {dimension_numbers = #tpu.dot_dimension_numbers<[1], [1], [0], [0], [0, 0, 1, 0], [], []>} : vector<8x8xbf16>, vector<8x8xbf16>, vector<8x8xf32> -> vector<8x8xf32>
    %20 = vector.broadcast %14 : vector<1x8xf32> to vector<8x8xf32>
    %21 = arith.addf %10, %20 : vector<8x8xf32>
    %22 = vector.extract_strided_slice %21 {offsets = [0, 0], sizes = [8, 4], strides = [1, 1]} : vector<8x8xf32> to vector<8x4xf32>
    %23 = vector.extract_strided_slice %21 {offsets = [0, 4], sizes = [8, 4], strides = [1, 1]} : vector<8x8xf32> to vector<8x4xf32>
    %24 = arith.mulf %22, %7 : vector<8x4xf32>
    %25 = arith.mulf %23, %6 : vector<8x4xf32>
    %26 = arith.addf %24, %25 : vector<8x4xf32>
    %27 = arith.mulf %23, %7 : vector<8x4xf32>
    %28 = arith.mulf %22, %6 : vector<8x4xf32>
    %29 = arith.subf %27, %28 : vector<8x4xf32>
    %30 = tpu.concatenate %26, %29 in 1 : vector<8x4xf32>, vector<8x4xf32> -> vector<8x8xf32>
    %31 = arith.truncf %30 : vector<8x8xf32> to vector<8x8xbf16>
    %32 = arith.truncf %8 : vector<8x8xf32> to vector<8x8xbf16>
    %cst_23 = arith.constant dense<0.000000e+00> : vector<8x8xf32>
    %33 = tpu.matmul %31, %32, %cst_23 {dimension_numbers = #tpu.dot_dimension_numbers<[1], [1], [0], [0], [0, 0, 1, 0], [], []>} : vector<8x8xbf16>, vector<8x8xbf16>, vector<8x8xf32> -> vector<8x8xf32>
    %34 = vector.extract_strided_slice %12 {offsets = [0, 0], sizes = [8, 4], strides = [1, 1]} : vector<8x8xf32> to vector<8x4xf32>
    %35 = vector.extract_strided_slice %12 {offsets = [0, 4], sizes = [8, 4], strides = [1, 1]} : vector<8x8xf32> to vector<8x4xf32>
    %36 = arith.mulf %34, %7 : vector<8x4xf32>
    %37 = arith.mulf %35, %6 : vector<8x4xf32>
    %38 = arith.addf %36, %37 : vector<8x4xf32>
    %39 = arith.mulf %35, %7 : vector<8x4xf32>
    %40 = arith.mulf %34, %6 : vector<8x4xf32>
    %41 = arith.subf %39, %40 : vector<8x4xf32>
    %42 = tpu.concatenate %38, %41 in 1 : vector<8x4xf32>, vector<8x4xf32> -> vector<8x8xf32>
    %43 = arith.truncf %8 : vector<8x8xf32> to vector<8x8xbf16>
    %44 = arith.truncf %42 : vector<8x8xf32> to vector<8x8xbf16>
    %cst_24 = arith.constant dense<0.000000e+00> : vector<8x8xf32>
    %45 = tpu.matmul %43, %44, %cst_24 {dimension_numbers = #tpu.dot_dimension_numbers<[1], [1], [0], [0], [0, 0, 1, 0], [], []>} : vector<8x8xbf16>, vector<8x8xbf16>, vector<8x8xf32> -> vector<8x8xf32>
    %46 = arith.addf %19, %33 : vector<8x8xf32>
    %47 = arith.addf %46, %45 : vector<8x8xf32>
    %48 = vector.broadcast %9 : vector<1x8xf32> to vector<8x8xf32>
    %49 = arith.addf %47, %48 : vector<8x8xf32>
    %cst_25 = arith.constant dense<0xFF800000> : vector<8xf32>
    %50 = vector.multi_reduction <maximumf>, %49, %cst_25 [1] : vector<8x8xf32> to vector<8xf32>
    %51 = vector.shape_cast %50 : vector<8xf32> to vector<8x1xf32>
    %52 = vector.broadcast %51 : vector<8x1xf32> to vector<8x8xf32>
    %53 = arith.subf %49, %52 : vector<8x8xf32>
    %54 = math.exp %53 : vector<8x8xf32>
    %cst_26 = arith.constant dense<0.000000e+00> : vector<8xf32>
    %55 = vector.multi_reduction <add>, %54, %cst_26 [1] : vector<8x8xf32> to vector<8xf32>
    %56 = vector.shape_cast %55 : vector<8xf32> to vector<8x1xf32>
    %57 = tpu.reciprocal %56 {approx = true} : vector<8x1xf32> -> vector<8x1xf32>
    %58 = vector.broadcast %57 : vector<8x1xf32> to vector<8x8xf32>
    %59 = arith.mulf %54, %58 : vector<8x8xf32>
    %60 = arith.truncf %59 : vector<8x8xf32> to vector<8x8xbf16>
    %61 = arith.truncf %11 : vector<8x8xf32> to vector<8x8xbf16>
    %cst_27 = arith.constant dense<0.000000e+00> : vector<8x8xf32>
    %62 = tpu.matmul %60, %61, %cst_27 {dimension_numbers = #tpu.dot_dimension_numbers<[1], [0], [0], [1], [0, 0, 1, 1], [], []>} : vector<8x8xbf16>, vector<8x8xbf16>, vector<8x8xf32> -> vector<8x8xf32>
    %c0_28 = arith.constant 0 : index
    %c8 = arith.constant 8 : index
    %63 = vector.load %arg17[%c0_28, %c8] : memref<16x64xf32, #tpu.memory_space<vmem>>, vector<8x8xf32>
    %c0_29 = arith.constant 0 : index
    %c40 = arith.constant 40 : index
    %64 = vector.load %arg17[%c0_29, %c40] : memref<16x64xf32, #tpu.memory_space<vmem>>, vector<8x8xf32>
    %c0_30 = arith.constant 0 : index
    %c8_31 = arith.constant 8 : index
    %65 = vector.load %arg0[%c0_30, %c8_31] : memref<16x32xf32, #tpu.memory_space<vmem>>, vector<8x8xf32>
    %c1 = arith.constant 1 : index
    %c0_32 = arith.constant 0 : index
    %66 = vector.load %arg6[%c1, %c0_32] : memref<4x8xf32, #tpu.memory_space<vmem>>, vector<1x8xf32>
    %c1_33 = arith.constant 1 : index
    %c0_34 = arith.constant 0 : index
    %67 = vector.load %arg7[%c1_33, %c0_34] : memref<4x8xf32, #tpu.memory_space<vmem>>, vector<1x8xf32>
    %68 = vector.broadcast %66 : vector<1x8xf32> to vector<8x8xf32>
    %69 = arith.addf %63, %68 : vector<8x8xf32>
    %70 = arith.truncf %69 : vector<8x8xf32> to vector<8x8xbf16>
    %71 = arith.truncf %65 : vector<8x8xf32> to vector<8x8xbf16>
    %cst_35 = arith.constant dense<0.000000e+00> : vector<8x8xf32>
    %72 = tpu.matmul %70, %71, %cst_35 {dimension_numbers = #tpu.dot_dimension_numbers<[1], [1], [0], [0], [0, 0, 1, 0], [], []>} : vector<8x8xbf16>, vector<8x8xbf16>, vector<8x8xf32> -> vector<8x8xf32>
    %73 = vector.broadcast %67 : vector<1x8xf32> to vector<8x8xf32>
    %74 = arith.addf %63, %73 : vector<8x8xf32>
    %75 = vector.extract_strided_slice %74 {offsets = [0, 0], sizes = [8, 4], strides = [1, 1]} : vector<8x8xf32> to vector<8x4xf32>
    %76 = vector.extract_strided_slice %74 {offsets = [0, 4], sizes = [8, 4], strides = [1, 1]} : vector<8x8xf32> to vector<8x4xf32>
    %77 = arith.mulf %75, %7 : vector<8x4xf32>
    %78 = arith.mulf %76, %6 : vector<8x4xf32>
    %79 = arith.addf %77, %78 : vector<8x4xf32>
    %80 = arith.mulf %76, %7 : vector<8x4xf32>
    %81 = arith.mulf %75, %6 : vector<8x4xf32>
    %82 = arith.subf %80, %81 : vector<8x4xf32>
    %83 = tpu.concatenate %79, %82 in 1 : vector<8x4xf32>, vector<8x4xf32> -> vector<8x8xf32>
    %84 = arith.truncf %83 : vector<8x8xf32> to vector<8x8xbf16>
    %85 = arith.truncf %8 : vector<8x8xf32> to vector<8x8xbf16>
    %cst_36 = arith.constant dense<0.000000e+00> : vector<8x8xf32>
    %86 = tpu.matmul %84, %85, %cst_36 {dimension_numbers = #tpu.dot_dimension_numbers<[1], [1], [0], [0], [0, 0, 1, 0], [], []>} : vector<8x8xbf16>, vector<8x8xbf16>, vector<8x8xf32> -> vector<8x8xf32>
    %87 = vector.extract_strided_slice %65 {offsets = [0, 0], sizes = [8, 4], strides = [1, 1]} : vector<8x8xf32> to vector<8x4xf32>
    %88 = vector.extract_strided_slice %65 {offsets = [0, 4], sizes = [8, 4], strides = [1, 1]} : vector<8x8xf32> to vector<8x4xf32>
    %89 = arith.mulf %87, %7 : vector<8x4xf32>
    %90 = arith.mulf %88, %6 : vector<8x4xf32>
    %91 = arith.addf %89, %90 : vector<8x4xf32>
    %92 = arith.mulf %88, %7 : vector<8x4xf32>
    %93 = arith.mulf %87, %6 : vector<8x4xf32>
    %94 = arith.subf %92, %93 : vector<8x4xf32>
    %95 = tpu.concatenate %91, %94 in 1 : vector<8x4xf32>, vector<8x4xf32> -> vector<8x8xf32>
    %96 = arith.truncf %8 : vector<8x8xf32> to vector<8x8xbf16>
    %97 = arith.truncf %95 : vector<8x8xf32> to vector<8x8xbf16>
    %cst_37 = arith.constant dense<0.000000e+00> : vector<8x8xf32>
    %98 = tpu.matmul %96, %97, %cst_37 {dimension_numbers = #tpu.dot_dimension_numbers<[1], [1], [0], [0], [0, 0, 1, 0], [], []>} : vector<8x8xbf16>, vector<8x8xbf16>, vector<8x8xf32> -> vector<8x8xf32>
    %99 = arith.addf %72, %86 : vector<8x8xf32>
    %100 = arith.addf %99, %98 : vector<8x8xf32>
    %101 = vector.broadcast %9 : vector<1x8xf32> to vector<8x8xf32>
    %102 = arith.addf %100, %101 : vector<8x8xf32>
    %cst_38 = arith.constant dense<0xFF800000> : vector<8xf32>
    %103 = vector.multi_reduction <maximumf>, %102, %cst_38 [1] : vector<8x8xf32> to vector<8xf32>
    %104 = vector.shape_cast %103 : vector<8xf32> to vector<8x1xf32>
    %105 = vector.broadcast %104 : vector<8x1xf32> to vector<8x8xf32>
    %106 = arith.subf %102, %105 : vector<8x8xf32>
    %107 = math.exp %106 : vector<8x8xf32>
    %cst_39 = arith.constant dense<0.000000e+00> : vector<8xf32>
    %108 = vector.multi_reduction <add>, %107, %cst_39 [1] : vector<8x8xf32> to vector<8xf32>
    %109 = vector.shape_cast %108 : vector<8xf32> to vector<8x1xf32>
    %110 = tpu.reciprocal %109 {approx = true} : vector<8x1xf32> -> vector<8x1xf32>
    %111 = vector.broadcast %110 : vector<8x1xf32> to vector<8x8xf32>
    %112 = arith.mulf %107, %111 : vector<8x8xf32>
    %113 = arith.truncf %112 : vector<8x8xf32> to vector<8x8xbf16>
    %114 = arith.truncf %64 : vector<8x8xf32> to vector<8x8xbf16>
    %cst_40 = arith.constant dense<0.000000e+00> : vector<8x8xf32>
    %115 = tpu.matmul %113, %114, %cst_40 {dimension_numbers = #tpu.dot_dimension_numbers<[1], [0], [0], [1], [0, 0, 1, 1], [], []>} : vector<8x8xbf16>, vector<8x8xbf16>, vector<8x8xf32> -> vector<8x8xf32>
    %c0_41 = arith.constant 0 : index
    %c16 = arith.constant 16 : index
    %116 = vector.load %arg17[%c0_41, %c16] : memref<16x64xf32, #tpu.memory_space<vmem>>, vector<8x8xf32>
    %c0_42 = arith.constant 0 : index
    %c48 = arith.constant 48 : index
    %117 = vector.load %arg17[%c0_42, %c48] : memref<16x64xf32, #tpu.memory_space<vmem>>, vector<8x8xf32>
    %c0_43 = arith.constant 0 : index
    %c16_44 = arith.constant 16 : index
    %118 = vector.load %arg0[%c0_43, %c16_44] : memref<16x32xf32, #tpu.memory_space<vmem>>, vector<8x8xf32>
    %c2 = arith.constant 2 : index
    %c0_45 = arith.constant 0 : index
    %119 = vector.load %arg6[%c2, %c0_45] : memref<4x8xf32, #tpu.memory_space<vmem>>, vector<1x8xf32>
    %c2_46 = arith.constant 2 : index
    %c0_47 = arith.constant 0 : index
    %120 = vector.load %arg7[%c2_46, %c0_47] : memref<4x8xf32, #tpu.memory_space<vmem>>, vector<1x8xf32>
    %121 = vector.broadcast %119 : vector<1x8xf32> to vector<8x8xf32>
    %122 = arith.addf %116, %121 : vector<8x8xf32>
    %123 = arith.truncf %122 : vector<8x8xf32> to vector<8x8xbf16>
    %124 = arith.truncf %118 : vector<8x8xf32> to vector<8x8xbf16>
    %cst_48 = arith.constant dense<0.000000e+00> : vector<8x8xf32>
    %125 = tpu.matmul %123, %124, %cst_48 {dimension_numbers = #tpu.dot_dimension_numbers<[1], [1], [0], [0], [0, 0, 1, 0], [], []>} : vector<8x8xbf16>, vector<8x8xbf16>, vector<8x8xf32> -> vector<8x8xf32>
    %126 = vector.broadcast %120 : vector<1x8xf32> to vector<8x8xf32>
    %127 = arith.addf %116, %126 : vector<8x8xf32>
    %128 = vector.extract_strided_slice %127 {offsets = [0, 0], sizes = [8, 4], strides = [1, 1]} : vector<8x8xf32> to vector<8x4xf32>
    %129 = vector.extract_strided_slice %127 {offsets = [0, 4], sizes = [8, 4], strides = [1, 1]} : vector<8x8xf32> to vector<8x4xf32>
    %130 = arith.mulf %128, %7 : vector<8x4xf32>
    %131 = arith.mulf %129, %6 : vector<8x4xf32>
    %132 = arith.addf %130, %131 : vector<8x4xf32>
    %133 = arith.mulf %129, %7 : vector<8x4xf32>
    %134 = arith.mulf %128, %6 : vector<8x4xf32>
    %135 = arith.subf %133, %134 : vector<8x4xf32>
    %136 = tpu.concatenate %132, %135 in 1 : vector<8x4xf32>, vector<8x4xf32> -> vector<8x8xf32>
    %137 = arith.truncf %136 : vector<8x8xf32> to vector<8x8xbf16>
    %138 = arith.truncf %8 : vector<8x8xf32> to vector<8x8xbf16>
    %cst_49 = arith.constant dense<0.000000e+00> : vector<8x8xf32>
    %139 = tpu.matmul %137, %138, %cst_49 {dimension_numbers = #tpu.dot_dimension_numbers<[1], [1], [0], [0], [0, 0, 1, 0], [], []>} : vector<8x8xbf16>, vector<8x8xbf16>, vector<8x8xf32> -> vector<8x8xf32>
    %140 = vector.extract_strided_slice %118 {offsets = [0, 0], sizes = [8, 4], strides = [1, 1]} : vector<8x8xf32> to vector<8x4xf32>
    %141 = vector.extract_strided_slice %118 {offsets = [0, 4], sizes = [8, 4], strides = [1, 1]} : vector<8x8xf32> to vector<8x4xf32>
    %142 = arith.mulf %140, %7 : vector<8x4xf32>
    %143 = arith.mulf %141, %6 : vector<8x4xf32>
    %144 = arith.addf %142, %143 : vector<8x4xf32>
    %145 = arith.mulf %141, %7 : vector<8x4xf32>
    %146 = arith.mulf %140, %6 : vector<8x4xf32>
    %147 = arith.subf %145, %146 : vector<8x4xf32>
    %148 = tpu.concatenate %144, %147 in 1 : vector<8x4xf32>, vector<8x4xf32> -> vector<8x8xf32>
    %149 = arith.truncf %8 : vector<8x8xf32> to vector<8x8xbf16>
    %150 = arith.truncf %148 : vector<8x8xf32> to vector<8x8xbf16>
    %cst_50 = arith.constant dense<0.000000e+00> : vector<8x8xf32>
    %151 = tpu.matmul %149, %150, %cst_50 {dimension_numbers = #tpu.dot_dimension_numbers<[1], [1], [0], [0], [0, 0, 1, 0], [], []>} : vector<8x8xbf16>, vector<8x8xbf16>, vector<8x8xf32> -> vector<8x8xf32>
    %152 = arith.addf %125, %139 : vector<8x8xf32>
    %153 = arith.addf %152, %151 : vector<8x8xf32>
    %154 = vector.broadcast %9 : vector<1x8xf32> to vector<8x8xf32>
    %155 = arith.addf %153, %154 : vector<8x8xf32>
    %cst_51 = arith.constant dense<0xFF800000> : vector<8xf32>
    %156 = vector.multi_reduction <maximumf>, %155, %cst_51 [1] : vector<8x8xf32> to vector<8xf32>
    %157 = vector.shape_cast %156 : vector<8xf32> to vector<8x1xf32>
    %158 = vector.broadcast %157 : vector<8x1xf32> to vector<8x8xf32>
    %159 = arith.subf %155, %158 : vector<8x8xf32>
    %160 = math.exp %159 : vector<8x8xf32>
    %cst_52 = arith.constant dense<0.000000e+00> : vector<8xf32>
    %161 = vector.multi_reduction <add>, %160, %cst_52 [1] : vector<8x8xf32> to vector<8xf32>
    %162 = vector.shape_cast %161 : vector<8xf32> to vector<8x1xf32>
    %163 = tpu.reciprocal %162 {approx = true} : vector<8x1xf32> -> vector<8x1xf32>
    %164 = vector.broadcast %163 : vector<8x1xf32> to vector<8x8xf32>
    %165 = arith.mulf %160, %164 : vector<8x8xf32>
    %166 = arith.truncf %165 : vector<8x8xf32> to vector<8x8xbf16>
    %167 = arith.truncf %117 : vector<8x8xf32> to vector<8x8xbf16>
    %cst_53 = arith.constant dense<0.000000e+00> : vector<8x8xf32>
    %168 = tpu.matmul %166, %167, %cst_53 {dimension_numbers = #tpu.dot_dimension_numbers<[1], [0], [0], [1], [0, 0, 1, 1], [], []>} : vector<8x8xbf16>, vector<8x8xbf16>, vector<8x8xf32> -> vector<8x8xf32>
    %c0_54 = arith.constant 0 : index
    %c24 = arith.constant 24 : index
    %169 = vector.load %arg17[%c0_54, %c24] : memref<16x64xf32, #tpu.memory_space<vmem>>, vector<8x8xf32>
    %c0_55 = arith.constant 0 : index
    %c56 = arith.constant 56 : index
    %170 = vector.load %arg17[%c0_55, %c56] : memref<16x64xf32, #tpu.memory_space<vmem>>, vector<8x8xf32>
    %c0_56 = arith.constant 0 : index
    %c24_57 = arith.constant 24 : index
    %171 = vector.load %arg0[%c0_56, %c24_57] : memref<16x32xf32, #tpu.memory_space<vmem>>, vector<8x8xf32>
    %c3 = arith.constant 3 : index
    %c0_58 = arith.constant 0 : index
    %172 = vector.load %arg6[%c3, %c0_58] : memref<4x8xf32, #tpu.memory_space<vmem>>, vector<1x8xf32>
    %c3_59 = arith.constant 3 : index
    %c0_60 = arith.constant 0 : index
    %173 = vector.load %arg7[%c3_59, %c0_60] : memref<4x8xf32, #tpu.memory_space<vmem>>, vector<1x8xf32>
    %174 = vector.broadcast %172 : vector<1x8xf32> to vector<8x8xf32>
    %175 = arith.addf %169, %174 : vector<8x8xf32>
    %176 = arith.truncf %175 : vector<8x8xf32> to vector<8x8xbf16>
    %177 = arith.truncf %171 : vector<8x8xf32> to vector<8x8xbf16>
    %cst_61 = arith.constant dense<0.000000e+00> : vector<8x8xf32>
    %178 = tpu.matmul %176, %177, %cst_61 {dimension_numbers = #tpu.dot_dimension_numbers<[1], [1], [0], [0], [0, 0, 1, 0], [], []>} : vector<8x8xbf16>, vector<8x8xbf16>, vector<8x8xf32> -> vector<8x8xf32>
    %179 = vector.broadcast %173 : vector<1x8xf32> to vector<8x8xf32>
    %180 = arith.addf %169, %179 : vector<8x8xf32>
    %181 = vector.extract_strided_slice %180 {offsets = [0, 0], sizes = [8, 4], strides = [1, 1]} : vector<8x8xf32> to vector<8x4xf32>
    %182 = vector.extract_strided_slice %180 {offsets = [0, 4], sizes = [8, 4], strides = [1, 1]} : vector<8x8xf32> to vector<8x4xf32>
    %183 = arith.mulf %181, %7 : vector<8x4xf32>
    %184 = arith.mulf %182, %6 : vector<8x4xf32>
    %185 = arith.addf %183, %184 : vector<8x4xf32>
    %186 = arith.mulf %182, %7 : vector<8x4xf32>
    %187 = arith.mulf %181, %6 : vector<8x4xf32>
    %188 = arith.subf %186, %187 : vector<8x4xf32>
    %189 = tpu.concatenate %185, %188 in 1 : vector<8x4xf32>, vector<8x4xf32> -> vector<8x8xf32>
    %190 = arith.truncf %189 : vector<8x8xf32> to vector<8x8xbf16>
    %191 = arith.truncf %8 : vector<8x8xf32> to vector<8x8xbf16>
    %cst_62 = arith.constant dense<0.000000e+00> : vector<8x8xf32>
    %192 = tpu.matmul %190, %191, %cst_62 {dimension_numbers = #tpu.dot_dimension_numbers<[1], [1], [0], [0], [0, 0, 1, 0], [], []>} : vector<8x8xbf16>, vector<8x8xbf16>, vector<8x8xf32> -> vector<8x8xf32>
    %193 = vector.extract_strided_slice %171 {offsets = [0, 0], sizes = [8, 4], strides = [1, 1]} : vector<8x8xf32> to vector<8x4xf32>
    %194 = vector.extract_strided_slice %171 {offsets = [0, 4], sizes = [8, 4], strides = [1, 1]} : vector<8x8xf32> to vector<8x4xf32>
    %195 = arith.mulf %193, %7 : vector<8x4xf32>
    %196 = arith.mulf %194, %6 : vector<8x4xf32>
    %197 = arith.addf %195, %196 : vector<8x4xf32>
    %198 = arith.mulf %194, %7 : vector<8x4xf32>
    %199 = arith.mulf %193, %6 : vector<8x4xf32>
    %200 = arith.subf %198, %199 : vector<8x4xf32>
    %201 = tpu.concatenate %197, %200 in 1 : vector<8x4xf32>, vector<8x4xf32> -> vector<8x8xf32>
    %202 = arith.truncf %8 : vector<8x8xf32> to vector<8x8xbf16>
    %203 = arith.truncf %201 : vector<8x8xf32> to vector<8x8xbf16>
    %cst_63 = arith.constant dense<0.000000e+00> : vector<8x8xf32>
    %204 = tpu.matmul %202, %203, %cst_63 {dimension_numbers = #tpu.dot_dimension_numbers<[1], [1], [0], [0], [0, 0, 1, 0], [], []>} : vector<8x8xbf16>, vector<8x8xbf16>, vector<8x8xf32> -> vector<8x8xf32>
    %205 = arith.addf %178, %192 : vector<8x8xf32>
    %206 = arith.addf %205, %204 : vector<8x8xf32>
    %207 = vector.broadcast %9 : vector<1x8xf32> to vector<8x8xf32>
    %208 = arith.addf %206, %207 : vector<8x8xf32>
    %cst_64 = arith.constant dense<0xFF800000> : vector<8xf32>
    %209 = vector.multi_reduction <maximumf>, %208, %cst_64 [1] : vector<8x8xf32> to vector<8xf32>
    %210 = vector.shape_cast %209 : vector<8xf32> to vector<8x1xf32>
    %211 = vector.broadcast %210 : vector<8x1xf32> to vector<8x8xf32>
    %212 = arith.subf %208, %211 : vector<8x8xf32>
    %213 = math.exp %212 : vector<8x8xf32>
    %cst_65 = arith.constant dense<0.000000e+00> : vector<8xf32>
    %214 = vector.multi_reduction <add>, %213, %cst_65 [1] : vector<8x8xf32> to vector<8xf32>
    %215 = vector.shape_cast %214 : vector<8xf32> to vector<8x1xf32>
    %216 = tpu.reciprocal %215 {approx = true} : vector<8x1xf32> -> vector<8x1xf32>
    %217 = vector.broadcast %216 : vector<8x1xf32> to vector<8x8xf32>
    %218 = arith.mulf %213, %217 : vector<8x8xf32>
    %219 = arith.truncf %218 : vector<8x8xf32> to vector<8x8xbf16>
    %220 = arith.truncf %170 : vector<8x8xf32> to vector<8x8xbf16>
    %cst_66 = arith.constant dense<0.000000e+00> : vector<8x8xf32>
    %221 = tpu.matmul %219, %220, %cst_66 {dimension_numbers = #tpu.dot_dimension_numbers<[1], [0], [0], [1], [0, 0, 1, 1], [], []>} : vector<8x8xbf16>, vector<8x8xbf16>, vector<8x8xf32> -> vector<8x8xf32>
    %222 = tpu.concatenate %62, %115, %168, %221 in 1 : vector<8x8xf32>, vector<8x8xf32>, vector<8x8xf32>, vector<8x8xf32> -> vector<8x32xf32>
    %c1_67 = arith.constant 1 : index
    %c0_68 = arith.constant 0 : index
    %223 = vector.load %arg1[%c1_67, %c0_68] : memref<2x8xf32, #tpu.memory_space<vmem>>, vector<1x8xf32>
    %c8_69 = arith.constant 8 : index
    %c0_70 = arith.constant 0 : index
    %224 = vector.load %arg17[%c8_69, %c0_70] : memref<16x64xf32, #tpu.memory_space<vmem>>, vector<8x8xf32>
    %c8_71 = arith.constant 8 : index
    %c32_72 = arith.constant 32 : index
    %225 = vector.load %arg17[%c8_71, %c32_72] : memref<16x64xf32, #tpu.memory_space<vmem>>, vector<8x8xf32>
    %c8_73 = arith.constant 8 : index
    %c0_74 = arith.constant 0 : index
    %226 = vector.load %arg0[%c8_73, %c0_74] : memref<16x32xf32, #tpu.memory_space<vmem>>, vector<8x8xf32>
    %c0_75 = arith.constant 0 : index
    %c0_76 = arith.constant 0 : index
    %227 = vector.load %arg6[%c0_75, %c0_76] : memref<4x8xf32, #tpu.memory_space<vmem>>, vector<1x8xf32>
    %c0_77 = arith.constant 0 : index
    %c0_78 = arith.constant 0 : index
    %228 = vector.load %arg7[%c0_77, %c0_78] : memref<4x8xf32, #tpu.memory_space<vmem>>, vector<1x8xf32>
    %229 = vector.broadcast %227 : vector<1x8xf32> to vector<8x8xf32>
    %230 = arith.addf %224, %229 : vector<8x8xf32>
    %231 = arith.truncf %230 : vector<8x8xf32> to vector<8x8xbf16>
    %232 = arith.truncf %226 : vector<8x8xf32> to vector<8x8xbf16>
    %cst_79 = arith.constant dense<0.000000e+00> : vector<8x8xf32>
    %233 = tpu.matmul %231, %232, %cst_79 {dimension_numbers = #tpu.dot_dimension_numbers<[1], [1], [0], [0], [0, 0, 1, 0], [], []>} : vector<8x8xbf16>, vector<8x8xbf16>, vector<8x8xf32> -> vector<8x8xf32>
    %234 = vector.broadcast %228 : vector<1x8xf32> to vector<8x8xf32>
    %235 = arith.addf %224, %234 : vector<8x8xf32>
    %236 = vector.extract_strided_slice %235 {offsets = [0, 0], sizes = [8, 4], strides = [1, 1]} : vector<8x8xf32> to vector<8x4xf32>
    %237 = vector.extract_strided_slice %235 {offsets = [0, 4], sizes = [8, 4], strides = [1, 1]} : vector<8x8xf32> to vector<8x4xf32>
    %238 = arith.mulf %236, %7 : vector<8x4xf32>
    %239 = arith.mulf %237, %6 : vector<8x4xf32>
    %240 = arith.addf %238, %239 : vector<8x4xf32>
    %241 = arith.mulf %237, %7 : vector<8x4xf32>
    %242 = arith.mulf %236, %6 : vector<8x4xf32>
    %243 = arith.subf %241, %242 : vector<8x4xf32>
    %244 = tpu.concatenate %240, %243 in 1 : vector<8x4xf32>, vector<8x4xf32> -> vector<8x8xf32>
    %245 = arith.truncf %244 : vector<8x8xf32> to vector<8x8xbf16>
    %246 = arith.truncf %8 : vector<8x8xf32> to vector<8x8xbf16>
    %cst_80 = arith.constant dense<0.000000e+00> : vector<8x8xf32>
    %247 = tpu.matmul %245, %246, %cst_80 {dimension_numbers = #tpu.dot_dimension_numbers<[1], [1], [0], [0], [0, 0, 1, 0], [], []>} : vector<8x8xbf16>, vector<8x8xbf16>, vector<8x8xf32> -> vector<8x8xf32>
    %248 = vector.extract_strided_slice %226 {offsets = [0, 0], sizes = [8, 4], strides = [1, 1]} : vector<8x8xf32> to vector<8x4xf32>
    %249 = vector.extract_strided_slice %226 {offsets = [0, 4], sizes = [8, 4], strides = [1, 1]} : vector<8x8xf32> to vector<8x4xf32>
    %250 = arith.mulf %248, %7 : vector<8x4xf32>
    %251 = arith.mulf %249, %6 : vector<8x4xf32>
    %252 = arith.addf %250, %251 : vector<8x4xf32>
    %253 = arith.mulf %249, %7 : vector<8x4xf32>
    %254 = arith.mulf %248, %6 : vector<8x4xf32>
    %255 = arith.subf %253, %254 : vector<8x4xf32>
    %256 = tpu.concatenate %252, %255 in 1 : vector<8x4xf32>, vector<8x4xf32> -> vector<8x8xf32>
    %257 = arith.truncf %8 : vector<8x8xf32> to vector<8x8xbf16>
    %258 = arith.truncf %256 : vector<8x8xf32> to vector<8x8xbf16>
    %cst_81 = arith.constant dense<0.000000e+00> : vector<8x8xf32>
    %259 = tpu.matmul %257, %258, %cst_81 {dimension_numbers = #tpu.dot_dimension_numbers<[1], [1], [0], [0], [0, 0, 1, 0], [], []>} : vector<8x8xbf16>, vector<8x8xbf16>, vector<8x8xf32> -> vector<8x8xf32>
    %260 = arith.addf %233, %247 : vector<8x8xf32>
    %261 = arith.addf %260, %259 : vector<8x8xf32>
    %262 = vector.broadcast %223 : vector<1x8xf32> to vector<8x8xf32>
    %263 = arith.addf %261, %262 : vector<8x8xf32>
    %cst_82 = arith.constant dense<0xFF800000> : vector<8xf32>
    %264 = vector.multi_reduction <maximumf>, %263, %cst_82 [1] : vector<8x8xf32> to vector<8xf32>
    %265 = vector.shape_cast %264 : vector<8xf32> to vector<8x1xf32>
    %266 = vector.broadcast %265 : vector<8x1xf32> to vector<8x8xf32>
    %267 = arith.subf %263, %266 : vector<8x8xf32>
    %268 = math.exp %267 : vector<8x8xf32>
    %cst_83 = arith.constant dense<0.000000e+00> : vector<8xf32>
    %269 = vector.multi_reduction <add>, %268, %cst_83 [1] : vector<8x8xf32> to vector<8xf32>
    %270 = vector.shape_cast %269 : vector<8xf32> to vector<8x1xf32>
    %271 = tpu.reciprocal %270 {approx = true} : vector<8x1xf32> -> vector<8x1xf32>
    %272 = vector.broadcast %271 : vector<8x1xf32> to vector<8x8xf32>
    %273 = arith.mulf %268, %272 : vector<8x8xf32>
    %274 = arith.truncf %273 : vector<8x8xf32> to vector<8x8xbf16>
    %275 = arith.truncf %225 : vector<8x8xf32> to vector<8x8xbf16>
    %cst_84 = arith.constant dense<0.000000e+00> : vector<8x8xf32>
    %276 = tpu.matmul %274, %275, %cst_84 {dimension_numbers = #tpu.dot_dimension_numbers<[1], [0], [0], [1], [0, 0, 1, 1], [], []>} : vector<8x8xbf16>, vector<8x8xbf16>, vector<8x8xf32> -> vector<8x8xf32>
    %c8_85 = arith.constant 8 : index
    %c8_86 = arith.constant 8 : index
    %277 = vector.load %arg17[%c8_85, %c8_86] : memref<16x64xf32, #tpu.memory_space<vmem>>, vector<8x8xf32>
    %c8_87 = arith.constant 8 : index
    %c40_88 = arith.constant 40 : index
    %278 = vector.load %arg17[%c8_87, %c40_88] : memref<16x64xf32, #tpu.memory_space<vmem>>, vector<8x8xf32>
    %c8_89 = arith.constant 8 : index
    %c8_90 = arith.constant 8 : index
    %279 = vector.load %arg0[%c8_89, %c8_90] : memref<16x32xf32, #tpu.memory_space<vmem>>, vector<8x8xf32>
    %c1_91 = arith.constant 1 : index
    %c0_92 = arith.constant 0 : index
    %280 = vector.load %arg6[%c1_91, %c0_92] : memref<4x8xf32, #tpu.memory_space<vmem>>, vector<1x8xf32>
    %c1_93 = arith.constant 1 : index
    %c0_94 = arith.constant 0 : index
    %281 = vector.load %arg7[%c1_93, %c0_94] : memref<4x8xf32, #tpu.memory_space<vmem>>, vector<1x8xf32>
    %282 = vector.broadcast %280 : vector<1x8xf32> to vector<8x8xf32>
    %283 = arith.addf %277, %282 : vector<8x8xf32>
    %284 = arith.truncf %283 : vector<8x8xf32> to vector<8x8xbf16>
    %285 = arith.truncf %279 : vector<8x8xf32> to vector<8x8xbf16>
    %cst_95 = arith.constant dense<0.000000e+00> : vector<8x8xf32>
    %286 = tpu.matmul %284, %285, %cst_95 {dimension_numbers = #tpu.dot_dimension_numbers<[1], [1], [0], [0], [0, 0, 1, 0], [], []>} : vector<8x8xbf16>, vector<8x8xbf16>, vector<8x8xf32> -> vector<8x8xf32>
    %287 = vector.broadcast %281 : vector<1x8xf32> to vector<8x8xf32>
    %288 = arith.addf %277, %287 : vector<8x8xf32>
    %289 = vector.extract_strided_slice %288 {offsets = [0, 0], sizes = [8, 4], strides = [1, 1]} : vector<8x8xf32> to vector<8x4xf32>
    %290 = vector.extract_strided_slice %288 {offsets = [0, 4], sizes = [8, 4], strides = [1, 1]} : vector<8x8xf32> to vector<8x4xf32>
    %291 = arith.mulf %289, %7 : vector<8x4xf32>
    %292 = arith.mulf %290, %6 : vector<8x4xf32>
    %293 = arith.addf %291, %292 : vector<8x4xf32>
    %294 = arith.mulf %290, %7 : vector<8x4xf32>
    %295 = arith.mulf %289, %6 : vector<8x4xf32>
    %296 = arith.subf %294, %295 : vector<8x4xf32>
    %297 = tpu.concatenate %293, %296 in 1 : vector<8x4xf32>, vector<8x4xf32> -> vector<8x8xf32>
    %298 = arith.truncf %297 : vector<8x8xf32> to vector<8x8xbf16>
    %299 = arith.truncf %8 : vector<8x8xf32> to vector<8x8xbf16>
    %cst_96 = arith.constant dense<0.000000e+00> : vector<8x8xf32>
    %300 = tpu.matmul %298, %299, %cst_96 {dimension_numbers = #tpu.dot_dimension_numbers<[1], [1], [0], [0], [0, 0, 1, 0], [], []>} : vector<8x8xbf16>, vector<8x8xbf16>, vector<8x8xf32> -> vector<8x8xf32>
    %301 = vector.extract_strided_slice %279 {offsets = [0, 0], sizes = [8, 4], strides = [1, 1]} : vector<8x8xf32> to vector<8x4xf32>
    %302 = vector.extract_strided_slice %279 {offsets = [0, 4], sizes = [8, 4], strides = [1, 1]} : vector<8x8xf32> to vector<8x4xf32>
    %303 = arith.mulf %301, %7 : vector<8x4xf32>
    %304 = arith.mulf %302, %6 : vector<8x4xf32>
    %305 = arith.addf %303, %304 : vector<8x4xf32>
    %306 = arith.mulf %302, %7 : vector<8x4xf32>
    %307 = arith.mulf %301, %6 : vector<8x4xf32>
    %308 = arith.subf %306, %307 : vector<8x4xf32>
    %309 = tpu.concatenate %305, %308 in 1 : vector<8x4xf32>, vector<8x4xf32> -> vector<8x8xf32>
    %310 = arith.truncf %8 : vector<8x8xf32> to vector<8x8xbf16>
    %311 = arith.truncf %309 : vector<8x8xf32> to vector<8x8xbf16>
    %cst_97 = arith.constant dense<0.000000e+00> : vector<8x8xf32>
    %312 = tpu.matmul %310, %311, %cst_97 {dimension_numbers = #tpu.dot_dimension_numbers<[1], [1], [0], [0], [0, 0, 1, 0], [], []>} : vector<8x8xbf16>, vector<8x8xbf16>, vector<8x8xf32> -> vector<8x8xf32>
    %313 = arith.addf %286, %300 : vector<8x8xf32>
    %314 = arith.addf %313, %312 : vector<8x8xf32>
    %315 = vector.broadcast %223 : vector<1x8xf32> to vector<8x8xf32>
    %316 = arith.addf %314, %315 : vector<8x8xf32>
    %cst_98 = arith.constant dense<0xFF800000> : vector<8xf32>
    %317 = vector.multi_reduction <maximumf>, %316, %cst_98 [1] : vector<8x8xf32> to vector<8xf32>
    %318 = vector.shape_cast %317 : vector<8xf32> to vector<8x1xf32>
    %319 = vector.broadcast %318 : vector<8x1xf32> to vector<8x8xf32>
    %320 = arith.subf %316, %319 : vector<8x8xf32>
    %321 = math.exp %320 : vector<8x8xf32>
    %cst_99 = arith.constant dense<0.000000e+00> : vector<8xf32>
    %322 = vector.multi_reduction <add>, %321, %cst_99 [1] : vector<8x8xf32> to vector<8xf32>
    %323 = vector.shape_cast %322 : vector<8xf32> to vector<8x1xf32>
    %324 = tpu.reciprocal %323 {approx = true} : vector<8x1xf32> -> vector<8x1xf32>
    %325 = vector.broadcast %324 : vector<8x1xf32> to vector<8x8xf32>
    %326 = arith.mulf %321, %325 : vector<8x8xf32>
    %327 = arith.truncf %326 : vector<8x8xf32> to vector<8x8xbf16>
    %328 = arith.truncf %278 : vector<8x8xf32> to vector<8x8xbf16>
    %cst_100 = arith.constant dense<0.000000e+00> : vector<8x8xf32>
    %329 = tpu.matmul %327, %328, %cst_100 {dimension_numbers = #tpu.dot_dimension_numbers<[1], [0], [0], [1], [0, 0, 1, 1], [], []>} : vector<8x8xbf16>, vector<8x8xbf16>, vector<8x8xf32> -> vector<8x8xf32>
    %c8_101 = arith.constant 8 : index
    %c16_102 = arith.constant 16 : index
    %330 = vector.load %arg17[%c8_101, %c16_102] : memref<16x64xf32, #tpu.memory_space<vmem>>, vector<8x8xf32>
    %c8_103 = arith.constant 8 : index
    %c48_104 = arith.constant 48 : index
    %331 = vector.load %arg17[%c8_103, %c48_104] : memref<16x64xf32, #tpu.memory_space<vmem>>, vector<8x8xf32>
    %c8_105 = arith.constant 8 : index
    %c16_106 = arith.constant 16 : index
    %332 = vector.load %arg0[%c8_105, %c16_106] : memref<16x32xf32, #tpu.memory_space<vmem>>, vector<8x8xf32>
    %c2_107 = arith.constant 2 : index
    %c0_108 = arith.constant 0 : index
    %333 = vector.load %arg6[%c2_107, %c0_108] : memref<4x8xf32, #tpu.memory_space<vmem>>, vector<1x8xf32>
    %c2_109 = arith.constant 2 : index
    %c0_110 = arith.constant 0 : index
    %334 = vector.load %arg7[%c2_109, %c0_110] : memref<4x8xf32, #tpu.memory_space<vmem>>, vector<1x8xf32>
    %335 = vector.broadcast %333 : vector<1x8xf32> to vector<8x8xf32>
    %336 = arith.addf %330, %335 : vector<8x8xf32>
    %337 = arith.truncf %336 : vector<8x8xf32> to vector<8x8xbf16>
    %338 = arith.truncf %332 : vector<8x8xf32> to vector<8x8xbf16>
    %cst_111 = arith.constant dense<0.000000e+00> : vector<8x8xf32>
    %339 = tpu.matmul %337, %338, %cst_111 {dimension_numbers = #tpu.dot_dimension_numbers<[1], [1], [0], [0], [0, 0, 1, 0], [], []>} : vector<8x8xbf16>, vector<8x8xbf16>, vector<8x8xf32> -> vector<8x8xf32>
    %340 = vector.broadcast %334 : vector<1x8xf32> to vector<8x8xf32>
    %341 = arith.addf %330, %340 : vector<8x8xf32>
    %342 = vector.extract_strided_slice %341 {offsets = [0, 0], sizes = [8, 4], strides = [1, 1]} : vector<8x8xf32> to vector<8x4xf32>
    %343 = vector.extract_strided_slice %341 {offsets = [0, 4], sizes = [8, 4], strides = [1, 1]} : vector<8x8xf32> to vector<8x4xf32>
    %344 = arith.mulf %342, %7 : vector<8x4xf32>
    %345 = arith.mulf %343, %6 : vector<8x4xf32>
    %346 = arith.addf %344, %345 : vector<8x4xf32>
    %347 = arith.mulf %343, %7 : vector<8x4xf32>
    %348 = arith.mulf %342, %6 : vector<8x4xf32>
    %349 = arith.subf %347, %348 : vector<8x4xf32>
    %350 = tpu.concatenate %346, %349 in 1 : vector<8x4xf32>, vector<8x4xf32> -> vector<8x8xf32>
    %351 = arith.truncf %350 : vector<8x8xf32> to vector<8x8xbf16>
    %352 = arith.truncf %8 : vector<8x8xf32> to vector<8x8xbf16>
    %cst_112 = arith.constant dense<0.000000e+00> : vector<8x8xf32>
    %353 = tpu.matmul %351, %352, %cst_112 {dimension_numbers = #tpu.dot_dimension_numbers<[1], [1], [0], [0], [0, 0, 1, 0], [], []>} : vector<8x8xbf16>, vector<8x8xbf16>, vector<8x8xf32> -> vector<8x8xf32>
    %354 = vector.extract_strided_slice %332 {offsets = [0, 0], sizes = [8, 4], strides = [1, 1]} : vector<8x8xf32> to vector<8x4xf32>
    %355 = vector.extract_strided_slice %332 {offsets = [0, 4], sizes = [8, 4], strides = [1, 1]} : vector<8x8xf32> to vector<8x4xf32>
    %356 = arith.mulf %354, %7 : vector<8x4xf32>
    %357 = arith.mulf %355, %6 : vector<8x4xf32>
    %358 = arith.addf %356, %357 : vector<8x4xf32>
    %359 = arith.mulf %355, %7 : vector<8x4xf32>
    %360 = arith.mulf %354, %6 : vector<8x4xf32>
    %361 = arith.subf %359, %360 : vector<8x4xf32>
    %362 = tpu.concatenate %358, %361 in 1 : vector<8x4xf32>, vector<8x4xf32> -> vector<8x8xf32>
    %363 = arith.truncf %8 : vector<8x8xf32> to vector<8x8xbf16>
    %364 = arith.truncf %362 : vector<8x8xf32> to vector<8x8xbf16>
    %cst_113 = arith.constant dense<0.000000e+00> : vector<8x8xf32>
    %365 = tpu.matmul %363, %364, %cst_113 {dimension_numbers = #tpu.dot_dimension_numbers<[1], [1], [0], [0], [0, 0, 1, 0], [], []>} : vector<8x8xbf16>, vector<8x8xbf16>, vector<8x8xf32> -> vector<8x8xf32>
    %366 = arith.addf %339, %353 : vector<8x8xf32>
    %367 = arith.addf %366, %365 : vector<8x8xf32>
    %368 = vector.broadcast %223 : vector<1x8xf32> to vector<8x8xf32>
    %369 = arith.addf %367, %368 : vector<8x8xf32>
    %cst_114 = arith.constant dense<0xFF800000> : vector<8xf32>
    %370 = vector.multi_reduction <maximumf>, %369, %cst_114 [1] : vector<8x8xf32> to vector<8xf32>
    %371 = vector.shape_cast %370 : vector<8xf32> to vector<8x1xf32>
    %372 = vector.broadcast %371 : vector<8x1xf32> to vector<8x8xf32>
    %373 = arith.subf %369, %372 : vector<8x8xf32>
    %374 = math.exp %373 : vector<8x8xf32>
    %cst_115 = arith.constant dense<0.000000e+00> : vector<8xf32>
    %375 = vector.multi_reduction <add>, %374, %cst_115 [1] : vector<8x8xf32> to vector<8xf32>
    %376 = vector.shape_cast %375 : vector<8xf32> to vector<8x1xf32>
    %377 = tpu.reciprocal %376 {approx = true} : vector<8x1xf32> -> vector<8x1xf32>
    %378 = vector.broadcast %377 : vector<8x1xf32> to vector<8x8xf32>
    %379 = arith.mulf %374, %378 : vector<8x8xf32>
    %380 = arith.truncf %379 : vector<8x8xf32> to vector<8x8xbf16>
    %381 = arith.truncf %331 : vector<8x8xf32> to vector<8x8xbf16>
    %cst_116 = arith.constant dense<0.000000e+00> : vector<8x8xf32>
    %382 = tpu.matmul %380, %381, %cst_116 {dimension_numbers = #tpu.dot_dimension_numbers<[1], [0], [0], [1], [0, 0, 1, 1], [], []>} : vector<8x8xbf16>, vector<8x8xbf16>, vector<8x8xf32> -> vector<8x8xf32>
    %c8_117 = arith.constant 8 : index
    %c24_118 = arith.constant 24 : index
    %383 = vector.load %arg17[%c8_117, %c24_118] : memref<16x64xf32, #tpu.memory_space<vmem>>, vector<8x8xf32>
    %c8_119 = arith.constant 8 : index
    %c56_120 = arith.constant 56 : index
    %384 = vector.load %arg17[%c8_119, %c56_120] : memref<16x64xf32, #tpu.memory_space<vmem>>, vector<8x8xf32>
    %c8_121 = arith.constant 8 : index
    %c24_122 = arith.constant 24 : index
    %385 = vector.load %arg0[%c8_121, %c24_122] : memref<16x32xf32, #tpu.memory_space<vmem>>, vector<8x8xf32>
    %c3_123 = arith.constant 3 : index
    %c0_124 = arith.constant 0 : index
    %386 = vector.load %arg6[%c3_123, %c0_124] : memref<4x8xf32, #tpu.memory_space<vmem>>, vector<1x8xf32>
    %c3_125 = arith.constant 3 : index
    %c0_126 = arith.constant 0 : index
    %387 = vector.load %arg7[%c3_125, %c0_126] : memref<4x8xf32, #tpu.memory_space<vmem>>, vector<1x8xf32>
    %388 = vector.broadcast %386 : vector<1x8xf32> to vector<8x8xf32>
    %389 = arith.addf %383, %388 : vector<8x8xf32>
    %390 = arith.truncf %389 : vector<8x8xf32> to vector<8x8xbf16>
    %391 = arith.truncf %385 : vector<8x8xf32> to vector<8x8xbf16>
    %cst_127 = arith.constant dense<0.000000e+00> : vector<8x8xf32>
    %392 = tpu.matmul %390, %391, %cst_127 {dimension_numbers = #tpu.dot_dimension_numbers<[1], [1], [0], [0], [0, 0, 1, 0], [], []>} : vector<8x8xbf16>, vector<8x8xbf16>, vector<8x8xf32> -> vector<8x8xf32>
    %393 = vector.broadcast %387 : vector<1x8xf32> to vector<8x8xf32>
    %394 = arith.addf %383, %393 : vector<8x8xf32>
    %395 = vector.extract_strided_slice %394 {offsets = [0, 0], sizes = [8, 4], strides = [1, 1]} : vector<8x8xf32> to vector<8x4xf32>
    %396 = vector.extract_strided_slice %394 {offsets = [0, 4], sizes = [8, 4], strides = [1, 1]} : vector<8x8xf32> to vector<8x4xf32>
    %397 = arith.mulf %395, %7 : vector<8x4xf32>
    %398 = arith.mulf %396, %6 : vector<8x4xf32>
    %399 = arith.addf %397, %398 : vector<8x4xf32>
    %400 = arith.mulf %396, %7 : vector<8x4xf32>
    %401 = arith.mulf %395, %6 : vector<8x4xf32>
    %402 = arith.subf %400, %401 : vector<8x4xf32>
    %403 = tpu.concatenate %399, %402 in 1 : vector<8x4xf32>, vector<8x4xf32> -> vector<8x8xf32>
    %404 = arith.truncf %403 : vector<8x8xf32> to vector<8x8xbf16>
    %405 = arith.truncf %8 : vector<8x8xf32> to vector<8x8xbf16>
    %cst_128 = arith.constant dense<0.000000e+00> : vector<8x8xf32>
    %406 = tpu.matmul %404, %405, %cst_128 {dimension_numbers = #tpu.dot_dimension_numbers<[1], [1], [0], [0], [0, 0, 1, 0], [], []>} : vector<8x8xbf16>, vector<8x8xbf16>, vector<8x8xf32> -> vector<8x8xf32>
    %407 = vector.extract_strided_slice %385 {offsets = [0, 0], sizes = [8, 4], strides = [1, 1]} : vector<8x8xf32> to vector<8x4xf32>
    %408 = vector.extract_strided_slice %385 {offsets = [0, 4], sizes = [8, 4], strides = [1, 1]} : vector<8x8xf32> to vector<8x4xf32>
    %409 = arith.mulf %407, %7 : vector<8x4xf32>
    %410 = arith.mulf %408, %6 : vector<8x4xf32>
    %411 = arith.addf %409, %410 : vector<8x4xf32>
    %412 = arith.mulf %408, %7 : vector<8x4xf32>
    %413 = arith.mulf %407, %6 : vector<8x4xf32>
    %414 = arith.subf %412, %413 : vector<8x4xf32>
    %415 = tpu.concatenate %411, %414 in 1 : vector<8x4xf32>, vector<8x4xf32> -> vector<8x8xf32>
    %416 = arith.truncf %8 : vector<8x8xf32> to vector<8x8xbf16>
    %417 = arith.truncf %415 : vector<8x8xf32> to vector<8x8xbf16>
    %cst_129 = arith.constant dense<0.000000e+00> : vector<8x8xf32>
    %418 = tpu.matmul %416, %417, %cst_129 {dimension_numbers = #tpu.dot_dimension_numbers<[1], [1], [0], [0], [0, 0, 1, 0], [], []>} : vector<8x8xbf16>, vector<8x8xbf16>, vector<8x8xf32> -> vector<8x8xf32>
    %419 = arith.addf %392, %406 : vector<8x8xf32>
    %420 = arith.addf %419, %418 : vector<8x8xf32>
    %421 = vector.broadcast %223 : vector<1x8xf32> to vector<8x8xf32>
    %422 = arith.addf %420, %421 : vector<8x8xf32>
    %cst_130 = arith.constant dense<0xFF800000> : vector<8xf32>
    %423 = vector.multi_reduction <maximumf>, %422, %cst_130 [1] : vector<8x8xf32> to vector<8xf32>
    %424 = vector.shape_cast %423 : vector<8xf32> to vector<8x1xf32>
    %425 = vector.broadcast %424 : vector<8x1xf32> to vector<8x8xf32>
    %426 = arith.subf %422, %425 : vector<8x8xf32>
    %427 = math.exp %426 : vector<8x8xf32>
    %cst_131 = arith.constant dense<0.000000e+00> : vector<8xf32>
    %428 = vector.multi_reduction <add>, %427, %cst_131 [1] : vector<8x8xf32> to vector<8xf32>
    %429 = vector.shape_cast %428 : vector<8xf32> to vector<8x1xf32>
    %430 = tpu.reciprocal %429 {approx = true} : vector<8x1xf32> -> vector<8x1xf32>
    %431 = vector.broadcast %430 : vector<8x1xf32> to vector<8x8xf32>
    %432 = arith.mulf %427, %431 : vector<8x8xf32>
    %433 = arith.truncf %432 : vector<8x8xf32> to vector<8x8xbf16>
    %434 = arith.truncf %384 : vector<8x8xf32> to vector<8x8xbf16>
    %cst_132 = arith.constant dense<0.000000e+00> : vector<8x8xf32>
    %435 = tpu.matmul %433, %434, %cst_132 {dimension_numbers = #tpu.dot_dimension_numbers<[1], [0], [0], [1], [0, 0, 1, 1], [], []>} : vector<8x8xbf16>, vector<8x8xbf16>, vector<8x8xf32> -> vector<8x8xf32>
    %436 = tpu.concatenate %276, %329, %382, %435 in 1 : vector<8x8xf32>, vector<8x8xf32>, vector<8x8xf32>, vector<8x8xf32> -> vector<8x32xf32>
    %437 = tpu.concatenate %222, %436 in 0 : vector<8x32xf32>, vector<8x32xf32> -> vector<16x32xf32>
    %438 = arith.addf %0, %437 : vector<16x32xf32>
    %c0_133 = arith.constant 0 : index
    %c0_134 = arith.constant 0 : index
    %439 = vector.load %arg8[%c0_133, %c0_134] : memref<1x32xf32, #tpu.memory_space<vmem>>, vector<1x32xf32>
    %c0_135 = arith.constant 0 : index
    %c0_136 = arith.constant 0 : index
    %440 = vector.load %arg9[%c0_135, %c0_136] : memref<1x32xf32, #tpu.memory_space<vmem>>, vector<1x32xf32>
    %cst_137 = arith.constant dense<0.000000e+00> : vector<16xf32>
    %441 = vector.multi_reduction <add>, %438, %cst_137 [1] : vector<16x32xf32> to vector<16xf32>
    %442 = vector.shape_cast %441 : vector<16xf32> to vector<16x1xf32>
    %cst_138 = arith.constant 3.200000e+01 : f32
    %443 = vector.broadcast %cst_138 : f32 to vector<16x1xf32>
    %444 = arith.divf %442, %443 : vector<16x1xf32>
    %445 = vector.broadcast %444 : vector<16x1xf32> to vector<16x32xf32>
    %446 = arith.subf %438, %445 : vector<16x32xf32>
    %447 = arith.mulf %446, %446 : vector<16x32xf32>
    %cst_139 = arith.constant dense<0.000000e+00> : vector<16xf32>
    %448 = vector.multi_reduction <add>, %447, %cst_139 [1] : vector<16x32xf32> to vector<16xf32>
    %449 = vector.shape_cast %448 : vector<16xf32> to vector<16x1xf32>
    %cst_140 = arith.constant 3.200000e+01 : f32
    %450 = vector.broadcast %cst_140 : f32 to vector<16x1xf32>
    %451 = arith.divf %449, %450 : vector<16x1xf32>
    %452 = vector.broadcast %444 : vector<16x1xf32> to vector<16x32xf32>
    %453 = arith.subf %438, %452 : vector<16x32xf32>
    %cst_141 = arith.constant 9.99999974E-6 : f32
    %454 = vector.broadcast %cst_141 : f32 to vector<16x1xf32>
    %455 = arith.addf %451, %454 : vector<16x1xf32>
    %456 = math.rsqrt %455 : vector<16x1xf32>
    %457 = vector.broadcast %456 : vector<16x1xf32> to vector<16x32xf32>
    %458 = arith.mulf %453, %457 : vector<16x32xf32>
    %459 = vector.broadcast %439 : vector<1x32xf32> to vector<16x32xf32>
    %460 = arith.mulf %458, %459 : vector<16x32xf32>
    %461 = vector.broadcast %440 : vector<1x32xf32> to vector<16x32xf32>
    %462 = arith.addf %460, %461 : vector<16x32xf32>
    %c0_142 = arith.constant 0 : index
    %c0_143 = arith.constant 0 : index
    %463 = vector.load %arg10[%c0_142, %c0_143] : memref<32x64xf32, #tpu.memory_space<vmem>>, vector<32x64xf32>
    %464 = arith.truncf %462 : vector<16x32xf32> to vector<16x32xbf16>
    %465 = arith.truncf %463 : vector<32x64xf32> to vector<32x64xbf16>
    %cst_144 = arith.constant dense<0.000000e+00> : vector<16x64xf32>
    %466 = tpu.matmul %464, %465, %cst_144 {dimension_numbers = #tpu.dot_dimension_numbers<[1], [0], [0], [1], [0, 0, 1, 1], [], []>} : vector<16x32xbf16>, vector<32x64xbf16>, vector<16x64xf32> -> vector<16x64xf32>
    %c0_145 = arith.constant 0 : index
    %c0_146 = arith.constant 0 : index
    %467 = vector.load %arg11[%c0_145, %c0_146] : memref<1x64xf32, #tpu.memory_space<vmem>>, vector<1x64xf32>
    %468 = vector.broadcast %467 : vector<1x64xf32> to vector<16x64xf32>
    %469 = arith.addf %466, %468 : vector<16x64xf32>
    %cst_147 = arith.constant 0.000000e+00 : f32
    %470 = vector.broadcast %cst_147 : f32 to vector<16x64xf32>
    %471 = arith.maximumf %469, %470 : vector<16x64xf32>
    %c0_148 = arith.constant 0 : index
    %c0_149 = arith.constant 0 : index
    %472 = vector.load %arg12[%c0_148, %c0_149] : memref<64x32xf32, #tpu.memory_space<vmem>>, vector<64x32xf32>
    %473 = arith.truncf %471 : vector<16x64xf32> to vector<16x64xbf16>
    %474 = arith.truncf %472 : vector<64x32xf32> to vector<64x32xbf16>
    %cst_150 = arith.constant dense<0.000000e+00> : vector<16x32xf32>
    %475 = tpu.matmul %473, %474, %cst_150 {dimension_numbers = #tpu.dot_dimension_numbers<[1], [0], [0], [1], [0, 0, 1, 1], [], []>} : vector<16x64xbf16>, vector<64x32xbf16>, vector<16x32xf32> -> vector<16x32xf32>
    %476 = arith.addf %462, %475 : vector<16x32xf32>
    %c0_151 = arith.constant 0 : index
    %c0_152 = arith.constant 0 : index
    %477 = vector.load %arg13[%c0_151, %c0_152] : memref<1x32xf32, #tpu.memory_space<vmem>>, vector<1x32xf32>
    %478 = vector.broadcast %477 : vector<1x32xf32> to vector<16x32xf32>
    %479 = arith.addf %476, %478 : vector<16x32xf32>
    %c0_153 = arith.constant 0 : index
    %c0_154 = arith.constant 0 : index
    %480 = vector.load %arg14[%c0_153, %c0_154] : memref<1x32xf32, #tpu.memory_space<vmem>>, vector<1x32xf32>
    %c0_155 = arith.constant 0 : index
    %c0_156 = arith.constant 0 : index
    %481 = vector.load %arg15[%c0_155, %c0_156] : memref<1x32xf32, #tpu.memory_space<vmem>>, vector<1x32xf32>
    %cst_157 = arith.constant dense<0.000000e+00> : vector<16xf32>
    %482 = vector.multi_reduction <add>, %479, %cst_157 [1] : vector<16x32xf32> to vector<16xf32>
    %483 = vector.shape_cast %482 : vector<16xf32> to vector<16x1xf32>
    %cst_158 = arith.constant 3.200000e+01 : f32
    %484 = vector.broadcast %cst_158 : f32 to vector<16x1xf32>
    %485 = arith.divf %483, %484 : vector<16x1xf32>
    %486 = vector.broadcast %485 : vector<16x1xf32> to vector<16x32xf32>
    %487 = arith.subf %479, %486 : vector<16x32xf32>
    %488 = arith.mulf %487, %487 : vector<16x32xf32>
    %cst_159 = arith.constant dense<0.000000e+00> : vector<16xf32>
    %489 = vector.multi_reduction <add>, %488, %cst_159 [1] : vector<16x32xf32> to vector<16xf32>
    %490 = vector.shape_cast %489 : vector<16xf32> to vector<16x1xf32>
    %cst_160 = arith.constant 3.200000e+01 : f32
    %491 = vector.broadcast %cst_160 : f32 to vector<16x1xf32>
    %492 = arith.divf %490, %491 : vector<16x1xf32>
    %493 = vector.broadcast %485 : vector<16x1xf32> to vector<16x32xf32>
    %494 = arith.subf %479, %493 : vector<16x32xf32>
    %cst_161 = arith.constant 9.99999974E-6 : f32
    %495 = vector.broadcast %cst_161 : f32 to vector<16x1xf32>
    %496 = arith.addf %492, %495 : vector<16x1xf32>
    %497 = math.rsqrt %496 : vector<16x1xf32>
    %498 = vector.broadcast %497 : vector<16x1xf32> to vector<16x32xf32>
    %499 = arith.mulf %494, %498 : vector<16x32xf32>
    %500 = vector.broadcast %480 : vector<1x32xf32> to vector<16x32xf32>
    %501 = arith.mulf %499, %500 : vector<16x32xf32>
    %502 = vector.broadcast %481 : vector<1x32xf32> to vector<16x32xf32>
    %503 = arith.addf %501, %502 : vector<16x32xf32>
    %c0_162 = arith.constant 0 : index
    %c0_163 = arith.constant 0 : index
    %504 = vector.load %arg16[%c0_162, %c0_163] : memref<16x32xf32, #tpu.memory_space<vmem>>, vector<16x32xf32>
    tpu.vector_store %arg16[%c0_162, %c0_163], %503 {strides = array<i32>} : memref<16x32xf32, #tpu.memory_space<vmem>>, vector<16x32xf32>,
    return
  }
}

module attributes {stable_mosaic.version = 11 : i64} {
  func.func @_gp_kernel(%arg0: memref<16x32xf32, #tpu.memory_space<vmem>>, %arg1: memref<2x8xf32, #tpu.memory_space<vmem>>, %arg2: memref<16x1xf32, #tpu.memory_space<vmem>>, %arg3: memref<16x8xf32, #tpu.memory_space<vmem>>, %arg4: memref<16x8xf32, #tpu.memory_space<vmem>>, %arg5: memref<32x8xf32, #tpu.memory_space<vmem>>, %arg6: memref<32x8xf32, #tpu.memory_space<vmem>>, %arg7: memref<32x8xf32, #tpu.memory_space<vmem>>, %arg8: memref<32x8xf32, #tpu.memory_space<vmem>>, %arg9: memref<1x8xf32, #tpu.memory_space<vmem>>, %arg10: memref<1x8xf32, #tpu.memory_space<vmem>>, %arg11: memref<1x8xf32, #tpu.memory_space<vmem>>, %arg12: memref<1x8xf32, #tpu.memory_space<vmem>>, %arg13: memref<8x10xf32, #tpu.memory_space<vmem>>, %arg14: memref<8x10xf32, #tpu.memory_space<vmem>>, %arg15: memref<8x10xf32, #tpu.memory_space<vmem>>, %arg16: memref<8x10xf32, #tpu.memory_space<vmem>>, %arg17: memref<1x10xf32, #tpu.memory_space<vmem>>, %arg18: memref<2x5x8x8xf32, #tpu.memory_space<vmem>>) attributes {dimension_semantics = [], scalar_prefetch = 0 : i64, scratch_operands = 0 : i64, tpu.core_type = #tpu.core_type<tc>} {
    %c0 = arith.constant 0 : index
    %c0_0 = arith.constant 0 : index
    %0 = vector.load %arg0[%c0, %c0_0] : memref<16x32xf32, #tpu.memory_space<vmem>>, vector<16x32xf32>
    %c0_1 = arith.constant 0 : index
    %c0_2 = arith.constant 0 : index
    %1 = vector.load %arg5[%c0_1, %c0_2] : memref<32x8xf32, #tpu.memory_space<vmem>>, vector<32x8xf32>
    %2 = arith.truncf %0 : vector<16x32xf32> to vector<16x32xbf16>
    %3 = arith.truncf %1 : vector<32x8xf32> to vector<32x8xbf16>
    %cst = arith.constant dense<0.000000e+00> : vector<16x8xf32>
    %4 = tpu.matmul %2, %3, %cst {dimension_numbers = #tpu.dot_dimension_numbers<[1], [0], [0], [1], [0, 0, 1, 1], [], []>} : vector<16x32xbf16>, vector<32x8xbf16>, vector<16x8xf32> -> vector<16x8xf32>
    %c0_3 = arith.constant 0 : index
    %c0_4 = arith.constant 0 : index
    %5 = vector.load %arg9[%c0_3, %c0_4] : memref<1x8xf32, #tpu.memory_space<vmem>>, vector<1x8xf32>
    %6 = vector.broadcast %5 : vector<1x8xf32> to vector<16x8xf32>
    %7 = arith.addf %4, %6 : vector<16x8xf32>
    %c0_5 = arith.constant 0 : index
    %c0_6 = arith.constant 0 : index
    %8 = vector.load %arg6[%c0_5, %c0_6] : memref<32x8xf32, #tpu.memory_space<vmem>>, vector<32x8xf32>
    %9 = arith.truncf %0 : vector<16x32xf32> to vector<16x32xbf16>
    %10 = arith.truncf %8 : vector<32x8xf32> to vector<32x8xbf16>
    %cst_7 = arith.constant dense<0.000000e+00> : vector<16x8xf32>
    %11 = tpu.matmul %9, %10, %cst_7 {dimension_numbers = #tpu.dot_dimension_numbers<[1], [0], [0], [1], [0, 0, 1, 1], [], []>} : vector<16x32xbf16>, vector<32x8xbf16>, vector<16x8xf32> -> vector<16x8xf32>
    %c0_8 = arith.constant 0 : index
    %c0_9 = arith.constant 0 : index
    %12 = vector.load %arg10[%c0_8, %c0_9] : memref<1x8xf32, #tpu.memory_space<vmem>>, vector<1x8xf32>
    %13 = vector.broadcast %12 : vector<1x8xf32> to vector<16x8xf32>
    %14 = arith.addf %11, %13 : vector<16x8xf32>
    %c0_10 = arith.constant 0 : index
    %c0_11 = arith.constant 0 : index
    %15 = vector.load %arg7[%c0_10, %c0_11] : memref<32x8xf32, #tpu.memory_space<vmem>>, vector<32x8xf32>
    %16 = arith.truncf %0 : vector<16x32xf32> to vector<16x32xbf16>
    %17 = arith.truncf %15 : vector<32x8xf32> to vector<32x8xbf16>
    %cst_12 = arith.constant dense<0.000000e+00> : vector<16x8xf32>
    %18 = tpu.matmul %16, %17, %cst_12 {dimension_numbers = #tpu.dot_dimension_numbers<[1], [0], [0], [1], [0, 0, 1, 1], [], []>} : vector<16x32xbf16>, vector<32x8xbf16>, vector<16x8xf32> -> vector<16x8xf32>
    %c0_13 = arith.constant 0 : index
    %c0_14 = arith.constant 0 : index
    %19 = vector.load %arg11[%c0_13, %c0_14] : memref<1x8xf32, #tpu.memory_space<vmem>>, vector<1x8xf32>
    %20 = vector.broadcast %19 : vector<1x8xf32> to vector<16x8xf32>
    %21 = arith.addf %18, %20 : vector<16x8xf32>
    %c0_15 = arith.constant 0 : index
    %c0_16 = arith.constant 0 : index
    %22 = vector.load %arg8[%c0_15, %c0_16] : memref<32x8xf32, #tpu.memory_space<vmem>>, vector<32x8xf32>
    %23 = arith.truncf %0 : vector<16x32xf32> to vector<16x32xbf16>
    %24 = arith.truncf %22 : vector<32x8xf32> to vector<32x8xbf16>
    %cst_17 = arith.constant dense<0.000000e+00> : vector<16x8xf32>
    %25 = tpu.matmul %23, %24, %cst_17 {dimension_numbers = #tpu.dot_dimension_numbers<[1], [0], [0], [1], [0, 0, 1, 1], [], []>} : vector<16x32xbf16>, vector<32x8xbf16>, vector<16x8xf32> -> vector<16x8xf32>
    %c0_18 = arith.constant 0 : index
    %c0_19 = arith.constant 0 : index
    %26 = vector.load %arg12[%c0_18, %c0_19] : memref<1x8xf32, #tpu.memory_space<vmem>>, vector<1x8xf32>
    %27 = vector.broadcast %26 : vector<1x8xf32> to vector<16x8xf32>
    %28 = arith.addf %25, %27 : vector<16x8xf32>
    %c0_20 = arith.constant 0 : index
    %c0_21 = arith.constant 0 : index
    %29 = vector.load %arg13[%c0_20, %c0_21] : memref<8x10xf32, #tpu.memory_space<vmem>>, vector<8x10xf32>
    %30 = arith.truncf %7 : vector<16x8xf32> to vector<16x8xbf16>
    %31 = arith.truncf %29 : vector<8x10xf32> to vector<8x10xbf16>
    %cst_22 = arith.constant dense<0.000000e+00> : vector<16x10xf32>
    %32 = tpu.matmul %30, %31, %cst_22 {dimension_numbers = #tpu.dot_dimension_numbers<[1], [0], [0], [1], [0, 0, 1, 1], [], []>} : vector<16x8xbf16>, vector<8x10xbf16>, vector<16x10xf32> -> vector<16x10xf32>
    %c0_23 = arith.constant 0 : index
    %c0_24 = arith.constant 0 : index
    %33 = vector.load %arg14[%c0_23, %c0_24] : memref<8x10xf32, #tpu.memory_space<vmem>>, vector<8x10xf32>
    %34 = arith.truncf %14 : vector<16x8xf32> to vector<16x8xbf16>
    %35 = arith.truncf %33 : vector<8x10xf32> to vector<8x10xbf16>
    %cst_25 = arith.constant dense<0.000000e+00> : vector<16x10xf32>
    %36 = tpu.matmul %34, %35, %cst_25 {dimension_numbers = #tpu.dot_dimension_numbers<[1], [0], [0], [1], [0, 0, 1, 1], [], []>} : vector<16x8xbf16>, vector<8x10xbf16>, vector<16x10xf32> -> vector<16x10xf32>
    %37 = arith.addf %32, %36 : vector<16x10xf32>
    %c0_26 = arith.constant 0 : index
    %c0_27 = arith.constant 0 : index
    %38 = vector.load %arg15[%c0_26, %c0_27] : memref<8x10xf32, #tpu.memory_space<vmem>>, vector<8x10xf32>
    %39 = arith.truncf %21 : vector<16x8xf32> to vector<16x8xbf16>
    %40 = arith.truncf %38 : vector<8x10xf32> to vector<8x10xbf16>
    %cst_28 = arith.constant dense<0.000000e+00> : vector<16x10xf32>
    %41 = tpu.matmul %39, %40, %cst_28 {dimension_numbers = #tpu.dot_dimension_numbers<[1], [0], [0], [1], [0, 0, 1, 1], [], []>} : vector<16x8xbf16>, vector<8x10xbf16>, vector<16x10xf32> -> vector<16x10xf32>
    %42 = arith.addf %37, %41 : vector<16x10xf32>
    %c0_29 = arith.constant 0 : index
    %c0_30 = arith.constant 0 : index
    %43 = vector.load %arg16[%c0_29, %c0_30] : memref<8x10xf32, #tpu.memory_space<vmem>>, vector<8x10xf32>
    %44 = arith.truncf %28 : vector<16x8xf32> to vector<16x8xbf16>
    %45 = arith.truncf %43 : vector<8x10xf32> to vector<8x10xbf16>
    %cst_31 = arith.constant dense<0.000000e+00> : vector<16x10xf32>
    %46 = tpu.matmul %44, %45, %cst_31 {dimension_numbers = #tpu.dot_dimension_numbers<[1], [0], [0], [1], [0, 0, 1, 1], [], []>} : vector<16x8xbf16>, vector<8x10xbf16>, vector<16x10xf32> -> vector<16x10xf32>
    %47 = arith.addf %42, %46 : vector<16x10xf32>
    %c0_32 = arith.constant 0 : index
    %c0_33 = arith.constant 0 : index
    %48 = vector.load %arg17[%c0_32, %c0_33] : memref<1x10xf32, #tpu.memory_space<vmem>>, vector<1x10xf32>
    %49 = vector.broadcast %48 : vector<1x10xf32> to vector<16x10xf32>
    %50 = arith.addf %47, %49 : vector<16x10xf32>
    %cst_34 = arith.constant 5.000000e-01 : f32
    %51 = vector.broadcast %cst_34 : f32 to vector<16x10xf32>
    %52 = arith.mulf %50, %51 : vector<16x10xf32>
    %c0_35 = arith.constant 0 : index
    %c0_36 = arith.constant 0 : index
    %53 = vector.load %arg3[%c0_35, %c0_36] : memref<16x8xf32, #tpu.memory_space<vmem>>, vector<16x8xf32>
    %c0_37 = arith.constant 0 : index
    %c0_38 = arith.constant 0 : index
    %54 = vector.load %arg4[%c0_37, %c0_38] : memref<16x8xf32, #tpu.memory_space<vmem>>, vector<16x8xf32>
    %55 = arith.mulf %7, %54 : vector<16x8xf32>
    %56 = arith.mulf %14, %53 : vector<16x8xf32>
    %57 = arith.subf %55, %56 : vector<16x8xf32>
    %cst_39 = arith.constant 2.500000e-01 : f32
    %58 = vector.broadcast %cst_39 : f32 to vector<16x8xf32>
    %59 = arith.mulf %57, %58 : vector<16x8xf32>
    %60 = arith.mulf %14, %54 : vector<16x8xf32>
    %61 = arith.mulf %7, %53 : vector<16x8xf32>
    %62 = arith.addf %60, %61 : vector<16x8xf32>
    %cst_40 = arith.constant 2.500000e-01 : f32
    %63 = vector.broadcast %cst_40 : f32 to vector<16x8xf32>
    %64 = arith.mulf %62, %63 : vector<16x8xf32>
    %65 = tpu.concatenate %59, %64 in 1 : vector<16x8xf32>, vector<16x8xf32> -> vector<16x16xf32>
    %66 = arith.mulf %21, %54 : vector<16x8xf32>
    %67 = arith.mulf %28, %53 : vector<16x8xf32>
    %68 = arith.subf %66, %67 : vector<16x8xf32>
    %69 = arith.mulf %28, %54 : vector<16x8xf32>
    %70 = arith.mulf %21, %53 : vector<16x8xf32>
    %71 = arith.addf %69, %70 : vector<16x8xf32>
    %72 = tpu.concatenate %68, %71 in 1 : vector<16x8xf32>, vector<16x8xf32> -> vector<16x16xf32>
    %73 = tpu.iota {dimensions = array<i32: 0>} : vector<8x8xi32>
    %74 = tpu.iota {dimensions = array<i32: 1>} : vector<8x8xi32>
    %75 = arith.cmpi sgt, %73, %74 : vector<8x8xi32>
    %76 = arith.extui %75 : vector<8x8xi1> to vector<8x8xi32>
    %77 = arith.sitofp %76 : vector<8x8xi32> to vector<8x8xf32>
    %cst_41 = arith.constant 1.000000e+00 : f32
    %78 = vector.broadcast %cst_41 : f32 to vector<8x1xf32>
    %79 = vector.extract_strided_slice %65 {offsets = [0, 0], sizes = [8, 16], strides = [1, 1]} : vector<16x16xf32> to vector<8x16xf32>
    %80 = vector.extract_strided_slice %72 {offsets = [0, 0], sizes = [8, 16], strides = [1, 1]} : vector<16x16xf32> to vector<8x16xf32>
    %81 = arith.truncf %79 : vector<8x16xf32> to vector<8x16xbf16>
    %82 = arith.truncf %80 : vector<8x16xf32> to vector<8x16xbf16>
    %cst_42 = arith.constant dense<0.000000e+00> : vector<8x8xf32>
    %83 = tpu.matmul %81, %82, %cst_42 {dimension_numbers = #tpu.dot_dimension_numbers<[1], [1], [0], [0], [0, 0, 1, 0], [], []>} : vector<8x16xbf16>, vector<8x16xbf16>, vector<8x8xf32> -> vector<8x8xf32>
    %c0_43 = arith.constant 0 : index
    %c0_44 = arith.constant 0 : index
    %84 = vector.load %arg2[%c0_43, %c0_44] : memref<16x1xf32, #tpu.memory_space<vmem>>, vector<8x1xf32>
    %c0_45 = arith.constant 0 : index
    %c0_46 = arith.constant 0 : index
    %85 = vector.load %arg1[%c0_45, %c0_46] : memref<2x8xf32, #tpu.memory_space<vmem>>, vector<1x8xf32>
    %86 = vector.broadcast %84 : vector<8x1xf32> to vector<8x8xf32>
    %87 = vector.broadcast %85 : vector<1x8xf32> to vector<8x8xf32>
    %88 = arith.mulf %86, %87 : vector<8x8xf32>
    %89 = vector.extract_strided_slice %52 {offsets = [0, 0], sizes = [8, 1], strides = [1, 1]} : vector<16x10xf32> to vector<8x1xf32>
    %90 = vector.extract_strided_slice %52 {offsets = [0, 1], sizes = [8, 1], strides = [1, 1]} : vector<16x10xf32> to vector<8x1xf32>
    %cst_47 = arith.constant dense<0.000000e+00> : vector<8x8xf32>
    %91 = tpu.matmul %78, %89, %cst_47 {dimension_numbers = #tpu.dot_dimension_numbers<[1], [1], [0], [0], [0, 0, 1, 0], [], []>} : vector<8x1xf32>, vector<8x1xf32>, vector<8x8xf32> -> vector<8x8xf32>
    %92 = arith.addf %83, %91 : vector<8x8xf32>
    %93 = vector.broadcast %90 : vector<8x1xf32> to vector<8x8xf32>
    %94 = arith.addf %92, %93 : vector<8x8xf32>
    %95 = arith.mulf %94, %88 : vector<8x8xf32>
    %cst_48 = arith.constant 1.000000e+00 : f32
    %96 = vector.broadcast %cst_48 : f32 to vector<8x8xf32>
    %97 = arith.subf %96, %88 : vector<8x8xf32>
    %cst_49 = arith.constant 9.99999995E+11 : f32
    %98 = vector.broadcast %cst_49 : f32 to vector<8x8xf32>
    %99 = arith.mulf %97, %98 : vector<8x8xf32>
    %100 = arith.subf %95, %99 : vector<8x8xf32>
    %cst_50 = arith.constant 9.99999995E+11 : f32
    %101 = vector.broadcast %cst_50 : f32 to vector<8x8xf32>
    %102 = arith.mulf %77, %101 : vector<8x8xf32>
    %103 = arith.subf %100, %102 : vector<8x8xf32>
    %c0_51 = arith.constant 0 : index
    %c0_52 = arith.constant 0 : index
    %c0_53 = arith.constant 0 : index
    %c0_54 = arith.constant 0 : index
    %104 = vector.load %arg18[%c0_51, %c0_52, %c0_53, %c0_54] : memref<2x5x8x8xf32, #tpu.memory_space<vmem>>, vector<1x1x8x8xf32>
    %105 = vector.shape_cast %104 : vector<1x1x8x8xf32> to vector<8x8xf32>
    %106 = vector.shape_cast %103 : vector<8x8xf32> to vector<1x1x8x8xf32>
    tpu.vector_store %arg18[%c0_51, %c0_52, %c0_53, %c0_54], %106 {strides = array<i32>} : memref<2x5x8x8xf32, #tpu.memory_space<vmem>>, vector<1x1x8x8xf32>,
    %107 = vector.extract_strided_slice %52 {offsets = [0, 2], sizes = [8, 1], strides = [1, 1]} : vector<16x10xf32> to vector<8x1xf32>
    %108 = vector.extract_strided_slice %52 {offsets = [0, 3], sizes = [8, 1], strides = [1, 1]} : vector<16x10xf32> to vector<8x1xf32>
    %cst_55 = arith.constant dense<0.000000e+00> : vector<8x8xf32>
    %109 = tpu.matmul %78, %107, %cst_55 {dimension_numbers = #tpu.dot_dimension_numbers<[1], [1], [0], [0], [0, 0, 1, 0], [], []>} : vector<8x1xf32>, vector<8x1xf32>, vector<8x8xf32> -> vector<8x8xf32>
    %110 = arith.addf %83, %109 : vector<8x8xf32>
    %111 = vector.broadcast %108 : vector<8x1xf32> to vector<8x8xf32>
    %112 = arith.addf %110, %111 : vector<8x8xf32>
    %113 = arith.mulf %112, %88 : vector<8x8xf32>
    %cst_56 = arith.constant 1.000000e+00 : f32
    %114 = vector.broadcast %cst_56 : f32 to vector<8x8xf32>
    %115 = arith.subf %114, %88 : vector<8x8xf32>
    %cst_57 = arith.constant 9.99999995E+11 : f32
    %116 = vector.broadcast %cst_57 : f32 to vector<8x8xf32>
    %117 = arith.mulf %115, %116 : vector<8x8xf32>
    %118 = arith.subf %113, %117 : vector<8x8xf32>
    %cst_58 = arith.constant 9.99999995E+11 : f32
    %119 = vector.broadcast %cst_58 : f32 to vector<8x8xf32>
    %120 = arith.mulf %77, %119 : vector<8x8xf32>
    %121 = arith.subf %118, %120 : vector<8x8xf32>
    %c0_59 = arith.constant 0 : index
    %c1 = arith.constant 1 : index
    %c0_60 = arith.constant 0 : index
    %c0_61 = arith.constant 0 : index
    %122 = vector.load %arg18[%c0_59, %c1, %c0_60, %c0_61] : memref<2x5x8x8xf32, #tpu.memory_space<vmem>>, vector<1x1x8x8xf32>
    %123 = vector.shape_cast %122 : vector<1x1x8x8xf32> to vector<8x8xf32>
    %124 = vector.shape_cast %121 : vector<8x8xf32> to vector<1x1x8x8xf32>
    tpu.vector_store %arg18[%c0_59, %c1, %c0_60, %c0_61], %124 {strides = array<i32>} : memref<2x5x8x8xf32, #tpu.memory_space<vmem>>, vector<1x1x8x8xf32>,
    %125 = vector.extract_strided_slice %52 {offsets = [0, 4], sizes = [8, 1], strides = [1, 1]} : vector<16x10xf32> to vector<8x1xf32>
    %126 = vector.extract_strided_slice %52 {offsets = [0, 5], sizes = [8, 1], strides = [1, 1]} : vector<16x10xf32> to vector<8x1xf32>
    %cst_62 = arith.constant dense<0.000000e+00> : vector<8x8xf32>
    %127 = tpu.matmul %78, %125, %cst_62 {dimension_numbers = #tpu.dot_dimension_numbers<[1], [1], [0], [0], [0, 0, 1, 0], [], []>} : vector<8x1xf32>, vector<8x1xf32>, vector<8x8xf32> -> vector<8x8xf32>
    %128 = arith.addf %83, %127 : vector<8x8xf32>
    %129 = vector.broadcast %126 : vector<8x1xf32> to vector<8x8xf32>
    %130 = arith.addf %128, %129 : vector<8x8xf32>
    %131 = arith.mulf %130, %88 : vector<8x8xf32>
    %cst_63 = arith.constant 1.000000e+00 : f32
    %132 = vector.broadcast %cst_63 : f32 to vector<8x8xf32>
    %133 = arith.subf %132, %88 : vector<8x8xf32>
    %cst_64 = arith.constant 9.99999995E+11 : f32
    %134 = vector.broadcast %cst_64 : f32 to vector<8x8xf32>
    %135 = arith.mulf %133, %134 : vector<8x8xf32>
    %136 = arith.subf %131, %135 : vector<8x8xf32>
    %cst_65 = arith.constant 9.99999995E+11 : f32
    %137 = vector.broadcast %cst_65 : f32 to vector<8x8xf32>
    %138 = arith.mulf %77, %137 : vector<8x8xf32>
    %139 = arith.subf %136, %138 : vector<8x8xf32>
    %c0_66 = arith.constant 0 : index
    %c2 = arith.constant 2 : index
    %c0_67 = arith.constant 0 : index
    %c0_68 = arith.constant 0 : index
    %140 = vector.load %arg18[%c0_66, %c2, %c0_67, %c0_68] : memref<2x5x8x8xf32, #tpu.memory_space<vmem>>, vector<1x1x8x8xf32>
    %141 = vector.shape_cast %140 : vector<1x1x8x8xf32> to vector<8x8xf32>
    %142 = vector.shape_cast %139 : vector<8x8xf32> to vector<1x1x8x8xf32>
    tpu.vector_store %arg18[%c0_66, %c2, %c0_67, %c0_68], %142 {strides = array<i32>} : memref<2x5x8x8xf32, #tpu.memory_space<vmem>>, vector<1x1x8x8xf32>,
    %143 = vector.extract_strided_slice %52 {offsets = [0, 6], sizes = [8, 1], strides = [1, 1]} : vector<16x10xf32> to vector<8x1xf32>
    %144 = vector.extract_strided_slice %52 {offsets = [0, 7], sizes = [8, 1], strides = [1, 1]} : vector<16x10xf32> to vector<8x1xf32>
    %cst_69 = arith.constant dense<0.000000e+00> : vector<8x8xf32>
    %145 = tpu.matmul %78, %143, %cst_69 {dimension_numbers = #tpu.dot_dimension_numbers<[1], [1], [0], [0], [0, 0, 1, 0], [], []>} : vector<8x1xf32>, vector<8x1xf32>, vector<8x8xf32> -> vector<8x8xf32>
    %146 = arith.addf %83, %145 : vector<8x8xf32>
    %147 = vector.broadcast %144 : vector<8x1xf32> to vector<8x8xf32>
    %148 = arith.addf %146, %147 : vector<8x8xf32>
    %149 = arith.mulf %148, %88 : vector<8x8xf32>
    %cst_70 = arith.constant 1.000000e+00 : f32
    %150 = vector.broadcast %cst_70 : f32 to vector<8x8xf32>
    %151 = arith.subf %150, %88 : vector<8x8xf32>
    %cst_71 = arith.constant 9.99999995E+11 : f32
    %152 = vector.broadcast %cst_71 : f32 to vector<8x8xf32>
    %153 = arith.mulf %151, %152 : vector<8x8xf32>
    %154 = arith.subf %149, %153 : vector<8x8xf32>
    %cst_72 = arith.constant 9.99999995E+11 : f32
    %155 = vector.broadcast %cst_72 : f32 to vector<8x8xf32>
    %156 = arith.mulf %77, %155 : vector<8x8xf32>
    %157 = arith.subf %154, %156 : vector<8x8xf32>
    %c0_73 = arith.constant 0 : index
    %c3 = arith.constant 3 : index
    %c0_74 = arith.constant 0 : index
    %c0_75 = arith.constant 0 : index
    %158 = vector.load %arg18[%c0_73, %c3, %c0_74, %c0_75] : memref<2x5x8x8xf32, #tpu.memory_space<vmem>>, vector<1x1x8x8xf32>
    %159 = vector.shape_cast %158 : vector<1x1x8x8xf32> to vector<8x8xf32>
    %160 = vector.shape_cast %157 : vector<8x8xf32> to vector<1x1x8x8xf32>
    tpu.vector_store %arg18[%c0_73, %c3, %c0_74, %c0_75], %160 {strides = array<i32>} : memref<2x5x8x8xf32, #tpu.memory_space<vmem>>, vector<1x1x8x8xf32>,
    %161 = vector.extract_strided_slice %52 {offsets = [0, 8], sizes = [8, 1], strides = [1, 1]} : vector<16x10xf32> to vector<8x1xf32>
    %162 = vector.extract_strided_slice %52 {offsets = [0, 9], sizes = [8, 1], strides = [1, 1]} : vector<16x10xf32> to vector<8x1xf32>
    %cst_76 = arith.constant dense<0.000000e+00> : vector<8x8xf32>
    %163 = tpu.matmul %78, %161, %cst_76 {dimension_numbers = #tpu.dot_dimension_numbers<[1], [1], [0], [0], [0, 0, 1, 0], [], []>} : vector<8x1xf32>, vector<8x1xf32>, vector<8x8xf32> -> vector<8x8xf32>
    %164 = arith.addf %83, %163 : vector<8x8xf32>
    %165 = vector.broadcast %162 : vector<8x1xf32> to vector<8x8xf32>
    %166 = arith.addf %164, %165 : vector<8x8xf32>
    %167 = arith.mulf %166, %88 : vector<8x8xf32>
    %cst_77 = arith.constant 1.000000e+00 : f32
    %168 = vector.broadcast %cst_77 : f32 to vector<8x8xf32>
    %169 = arith.subf %168, %88 : vector<8x8xf32>
    %cst_78 = arith.constant 9.99999995E+11 : f32
    %170 = vector.broadcast %cst_78 : f32 to vector<8x8xf32>
    %171 = arith.mulf %169, %170 : vector<8x8xf32>
    %172 = arith.subf %167, %171 : vector<8x8xf32>
    %cst_79 = arith.constant 9.99999995E+11 : f32
    %173 = vector.broadcast %cst_79 : f32 to vector<8x8xf32>
    %174 = arith.mulf %77, %173 : vector<8x8xf32>
    %175 = arith.subf %172, %174 : vector<8x8xf32>
    %c0_80 = arith.constant 0 : index
    %c4 = arith.constant 4 : index
    %c0_81 = arith.constant 0 : index
    %c0_82 = arith.constant 0 : index
    %176 = vector.load %arg18[%c0_80, %c4, %c0_81, %c0_82] : memref<2x5x8x8xf32, #tpu.memory_space<vmem>>, vector<1x1x8x8xf32>
    %177 = vector.shape_cast %176 : vector<1x1x8x8xf32> to vector<8x8xf32>
    %178 = vector.shape_cast %175 : vector<8x8xf32> to vector<1x1x8x8xf32>
    tpu.vector_store %arg18[%c0_80, %c4, %c0_81, %c0_82], %178 {strides = array<i32>} : memref<2x5x8x8xf32, #tpu.memory_space<vmem>>, vector<1x1x8x8xf32>,
    %179 = vector.extract_strided_slice %65 {offsets = [8, 0], sizes = [8, 16], strides = [1, 1]} : vector<16x16xf32> to vector<8x16xf32>
    %180 = vector.extract_strided_slice %72 {offsets = [8, 0], sizes = [8, 16], strides = [1, 1]} : vector<16x16xf32> to vector<8x16xf32>
    %181 = arith.truncf %179 : vector<8x16xf32> to vector<8x16xbf16>
    %182 = arith.truncf %180 : vector<8x16xf32> to vector<8x16xbf16>
    %cst_83 = arith.constant dense<0.000000e+00> : vector<8x8xf32>
    %183 = tpu.matmul %181, %182, %cst_83 {dimension_numbers = #tpu.dot_dimension_numbers<[1], [1], [0], [0], [0, 0, 1, 0], [], []>} : vector<8x16xbf16>, vector<8x16xbf16>, vector<8x8xf32> -> vector<8x8xf32>
    %c8 = arith.constant 8 : index
    %c0_84 = arith.constant 0 : index
    %184 = vector.load %arg2[%c8, %c0_84] : memref<16x1xf32, #tpu.memory_space<vmem>>, vector<8x1xf32>
    %c1_85 = arith.constant 1 : index
    %c0_86 = arith.constant 0 : index
    %185 = vector.load %arg1[%c1_85, %c0_86] : memref<2x8xf32, #tpu.memory_space<vmem>>, vector<1x8xf32>
    %186 = vector.broadcast %184 : vector<8x1xf32> to vector<8x8xf32>
    %187 = vector.broadcast %185 : vector<1x8xf32> to vector<8x8xf32>
    %188 = arith.mulf %186, %187 : vector<8x8xf32>
    %189 = vector.extract_strided_slice %52 {offsets = [8, 0], sizes = [8, 1], strides = [1, 1]} : vector<16x10xf32> to vector<8x1xf32>
    %190 = vector.extract_strided_slice %52 {offsets = [8, 1], sizes = [8, 1], strides = [1, 1]} : vector<16x10xf32> to vector<8x1xf32>
    %cst_87 = arith.constant dense<0.000000e+00> : vector<8x8xf32>
    %191 = tpu.matmul %78, %189, %cst_87 {dimension_numbers = #tpu.dot_dimension_numbers<[1], [1], [0], [0], [0, 0, 1, 0], [], []>} : vector<8x1xf32>, vector<8x1xf32>, vector<8x8xf32> -> vector<8x8xf32>
    %192 = arith.addf %183, %191 : vector<8x8xf32>
    %193 = vector.broadcast %190 : vector<8x1xf32> to vector<8x8xf32>
    %194 = arith.addf %192, %193 : vector<8x8xf32>
    %195 = arith.mulf %194, %188 : vector<8x8xf32>
    %cst_88 = arith.constant 1.000000e+00 : f32
    %196 = vector.broadcast %cst_88 : f32 to vector<8x8xf32>
    %197 = arith.subf %196, %188 : vector<8x8xf32>
    %cst_89 = arith.constant 9.99999995E+11 : f32
    %198 = vector.broadcast %cst_89 : f32 to vector<8x8xf32>
    %199 = arith.mulf %197, %198 : vector<8x8xf32>
    %200 = arith.subf %195, %199 : vector<8x8xf32>
    %cst_90 = arith.constant 9.99999995E+11 : f32
    %201 = vector.broadcast %cst_90 : f32 to vector<8x8xf32>
    %202 = arith.mulf %77, %201 : vector<8x8xf32>
    %203 = arith.subf %200, %202 : vector<8x8xf32>
    %c1_91 = arith.constant 1 : index
    %c0_92 = arith.constant 0 : index
    %c0_93 = arith.constant 0 : index
    %c0_94 = arith.constant 0 : index
    %204 = vector.load %arg18[%c1_91, %c0_92, %c0_93, %c0_94] : memref<2x5x8x8xf32, #tpu.memory_space<vmem>>, vector<1x1x8x8xf32>
    %205 = vector.shape_cast %204 : vector<1x1x8x8xf32> to vector<8x8xf32>
    %206 = vector.shape_cast %203 : vector<8x8xf32> to vector<1x1x8x8xf32>
    tpu.vector_store %arg18[%c1_91, %c0_92, %c0_93, %c0_94], %206 {strides = array<i32>} : memref<2x5x8x8xf32, #tpu.memory_space<vmem>>, vector<1x1x8x8xf32>,
    %207 = vector.extract_strided_slice %52 {offsets = [8, 2], sizes = [8, 1], strides = [1, 1]} : vector<16x10xf32> to vector<8x1xf32>
    %208 = vector.extract_strided_slice %52 {offsets = [8, 3], sizes = [8, 1], strides = [1, 1]} : vector<16x10xf32> to vector<8x1xf32>
    %cst_95 = arith.constant dense<0.000000e+00> : vector<8x8xf32>
    %209 = tpu.matmul %78, %207, %cst_95 {dimension_numbers = #tpu.dot_dimension_numbers<[1], [1], [0], [0], [0, 0, 1, 0], [], []>} : vector<8x1xf32>, vector<8x1xf32>, vector<8x8xf32> -> vector<8x8xf32>
    %210 = arith.addf %183, %209 : vector<8x8xf32>
    %211 = vector.broadcast %208 : vector<8x1xf32> to vector<8x8xf32>
    %212 = arith.addf %210, %211 : vector<8x8xf32>
    %213 = arith.mulf %212, %188 : vector<8x8xf32>
    %cst_96 = arith.constant 1.000000e+00 : f32
    %214 = vector.broadcast %cst_96 : f32 to vector<8x8xf32>
    %215 = arith.subf %214, %188 : vector<8x8xf32>
    %cst_97 = arith.constant 9.99999995E+11 : f32
    %216 = vector.broadcast %cst_97 : f32 to vector<8x8xf32>
    %217 = arith.mulf %215, %216 : vector<8x8xf32>
    %218 = arith.subf %213, %217 : vector<8x8xf32>
    %cst_98 = arith.constant 9.99999995E+11 : f32
    %219 = vector.broadcast %cst_98 : f32 to vector<8x8xf32>
    %220 = arith.mulf %77, %219 : vector<8x8xf32>
    %221 = arith.subf %218, %220 : vector<8x8xf32>
    %c1_99 = arith.constant 1 : index
    %c1_100 = arith.constant 1 : index
    %c0_101 = arith.constant 0 : index
    %c0_102 = arith.constant 0 : index
    %222 = vector.load %arg18[%c1_99, %c1_100, %c0_101, %c0_102] : memref<2x5x8x8xf32, #tpu.memory_space<vmem>>, vector<1x1x8x8xf32>
    %223 = vector.shape_cast %222 : vector<1x1x8x8xf32> to vector<8x8xf32>
    %224 = vector.shape_cast %221 : vector<8x8xf32> to vector<1x1x8x8xf32>
    tpu.vector_store %arg18[%c1_99, %c1_100, %c0_101, %c0_102], %224 {strides = array<i32>} : memref<2x5x8x8xf32, #tpu.memory_space<vmem>>, vector<1x1x8x8xf32>,
    %225 = vector.extract_strided_slice %52 {offsets = [8, 4], sizes = [8, 1], strides = [1, 1]} : vector<16x10xf32> to vector<8x1xf32>
    %226 = vector.extract_strided_slice %52 {offsets = [8, 5], sizes = [8, 1], strides = [1, 1]} : vector<16x10xf32> to vector<8x1xf32>
    %cst_103 = arith.constant dense<0.000000e+00> : vector<8x8xf32>
    %227 = tpu.matmul %78, %225, %cst_103 {dimension_numbers = #tpu.dot_dimension_numbers<[1], [1], [0], [0], [0, 0, 1, 0], [], []>} : vector<8x1xf32>, vector<8x1xf32>, vector<8x8xf32> -> vector<8x8xf32>
    %228 = arith.addf %183, %227 : vector<8x8xf32>
    %229 = vector.broadcast %226 : vector<8x1xf32> to vector<8x8xf32>
    %230 = arith.addf %228, %229 : vector<8x8xf32>
    %231 = arith.mulf %230, %188 : vector<8x8xf32>
    %cst_104 = arith.constant 1.000000e+00 : f32
    %232 = vector.broadcast %cst_104 : f32 to vector<8x8xf32>
    %233 = arith.subf %232, %188 : vector<8x8xf32>
    %cst_105 = arith.constant 9.99999995E+11 : f32
    %234 = vector.broadcast %cst_105 : f32 to vector<8x8xf32>
    %235 = arith.mulf %233, %234 : vector<8x8xf32>
    %236 = arith.subf %231, %235 : vector<8x8xf32>
    %cst_106 = arith.constant 9.99999995E+11 : f32
    %237 = vector.broadcast %cst_106 : f32 to vector<8x8xf32>
    %238 = arith.mulf %77, %237 : vector<8x8xf32>
    %239 = arith.subf %236, %238 : vector<8x8xf32>
    %c1_107 = arith.constant 1 : index
    %c2_108 = arith.constant 2 : index
    %c0_109 = arith.constant 0 : index
    %c0_110 = arith.constant 0 : index
    %240 = vector.load %arg18[%c1_107, %c2_108, %c0_109, %c0_110] : memref<2x5x8x8xf32, #tpu.memory_space<vmem>>, vector<1x1x8x8xf32>
    %241 = vector.shape_cast %240 : vector<1x1x8x8xf32> to vector<8x8xf32>
    %242 = vector.shape_cast %239 : vector<8x8xf32> to vector<1x1x8x8xf32>
    tpu.vector_store %arg18[%c1_107, %c2_108, %c0_109, %c0_110], %242 {strides = array<i32>} : memref<2x5x8x8xf32, #tpu.memory_space<vmem>>, vector<1x1x8x8xf32>,
    %243 = vector.extract_strided_slice %52 {offsets = [8, 6], sizes = [8, 1], strides = [1, 1]} : vector<16x10xf32> to vector<8x1xf32>
    %244 = vector.extract_strided_slice %52 {offsets = [8, 7], sizes = [8, 1], strides = [1, 1]} : vector<16x10xf32> to vector<8x1xf32>
    %cst_111 = arith.constant dense<0.000000e+00> : vector<8x8xf32>
    %245 = tpu.matmul %78, %243, %cst_111 {dimension_numbers = #tpu.dot_dimension_numbers<[1], [1], [0], [0], [0, 0, 1, 0], [], []>} : vector<8x1xf32>, vector<8x1xf32>, vector<8x8xf32> -> vector<8x8xf32>
    %246 = arith.addf %183, %245 : vector<8x8xf32>
    %247 = vector.broadcast %244 : vector<8x1xf32> to vector<8x8xf32>
    %248 = arith.addf %246, %247 : vector<8x8xf32>
    %249 = arith.mulf %248, %188 : vector<8x8xf32>
    %cst_112 = arith.constant 1.000000e+00 : f32
    %250 = vector.broadcast %cst_112 : f32 to vector<8x8xf32>
    %251 = arith.subf %250, %188 : vector<8x8xf32>
    %cst_113 = arith.constant 9.99999995E+11 : f32
    %252 = vector.broadcast %cst_113 : f32 to vector<8x8xf32>
    %253 = arith.mulf %251, %252 : vector<8x8xf32>
    %254 = arith.subf %249, %253 : vector<8x8xf32>
    %cst_114 = arith.constant 9.99999995E+11 : f32
    %255 = vector.broadcast %cst_114 : f32 to vector<8x8xf32>
    %256 = arith.mulf %77, %255 : vector<8x8xf32>
    %257 = arith.subf %254, %256 : vector<8x8xf32>
    %c1_115 = arith.constant 1 : index
    %c3_116 = arith.constant 3 : index
    %c0_117 = arith.constant 0 : index
    %c0_118 = arith.constant 0 : index
    %258 = vector.load %arg18[%c1_115, %c3_116, %c0_117, %c0_118] : memref<2x5x8x8xf32, #tpu.memory_space<vmem>>, vector<1x1x8x8xf32>
    %259 = vector.shape_cast %258 : vector<1x1x8x8xf32> to vector<8x8xf32>
    %260 = vector.shape_cast %257 : vector<8x8xf32> to vector<1x1x8x8xf32>
    tpu.vector_store %arg18[%c1_115, %c3_116, %c0_117, %c0_118], %260 {strides = array<i32>} : memref<2x5x8x8xf32, #tpu.memory_space<vmem>>, vector<1x1x8x8xf32>,
    %261 = vector.extract_strided_slice %52 {offsets = [8, 8], sizes = [8, 1], strides = [1, 1]} : vector<16x10xf32> to vector<8x1xf32>
    %262 = vector.extract_strided_slice %52 {offsets = [8, 9], sizes = [8, 1], strides = [1, 1]} : vector<16x10xf32> to vector<8x1xf32>
    %cst_119 = arith.constant dense<0.000000e+00> : vector<8x8xf32>
    %263 = tpu.matmul %78, %261, %cst_119 {dimension_numbers = #tpu.dot_dimension_numbers<[1], [1], [0], [0], [0, 0, 1, 0], [], []>} : vector<8x1xf32>, vector<8x1xf32>, vector<8x8xf32> -> vector<8x8xf32>
    %264 = arith.addf %183, %263 : vector<8x8xf32>
    %265 = vector.broadcast %262 : vector<8x1xf32> to vector<8x8xf32>
    %266 = arith.addf %264, %265 : vector<8x8xf32>
    %267 = arith.mulf %266, %188 : vector<8x8xf32>
    %cst_120 = arith.constant 1.000000e+00 : f32
    %268 = vector.broadcast %cst_120 : f32 to vector<8x8xf32>
    %269 = arith.subf %268, %188 : vector<8x8xf32>
    %cst_121 = arith.constant 9.99999995E+11 : f32
    %270 = vector.broadcast %cst_121 : f32 to vector<8x8xf32>
    %271 = arith.mulf %269, %270 : vector<8x8xf32>
    %272 = arith.subf %267, %271 : vector<8x8xf32>
    %cst_122 = arith.constant 9.99999995E+11 : f32
    %273 = vector.broadcast %cst_122 : f32 to vector<8x8xf32>
    %274 = arith.mulf %77, %273 : vector<8x8xf32>
    %275 = arith.subf %272, %274 : vector<8x8xf32>
    %c1_123 = arith.constant 1 : index
    %c4_124 = arith.constant 4 : index
    %c0_125 = arith.constant 0 : index
    %c0_126 = arith.constant 0 : index
    %276 = vector.load %arg18[%c1_123, %c4_124, %c0_125, %c0_126] : memref<2x5x8x8xf32, #tpu.memory_space<vmem>>, vector<1x1x8x8xf32>
    %277 = vector.shape_cast %276 : vector<1x1x8x8xf32> to vector<8x8xf32>
    %278 = vector.shape_cast %275 : vector<8x8xf32> to vector<1x1x8x8xf32>
    tpu.vector_store %arg18[%c1_123, %c4_124, %c0_125, %c0_126], %278 {strides = array<i32>} : memref<2x5x8x8xf32, #tpu.memory_space<vmem>>, vector<1x1x8x8xf32>,
    return
  }
}

</mosaic_0001>

<bundles_post_ra>
// kernel: tener_forward.4
= control target key start
LH: loop header
LB: loop body
LE: loop exit
PB: predicated region body
PF: predicated region fallthrough
CT: control target
= control target key end

     0   :  { %vm25_vm0 = vcmask 261120   ;;  %v132_v4 = vmov 32.0   ;;  %s203_s0 = inlined_call_operand.vmem [shape: f32[16,32], index: 0, kind: input, shape index: {}]   ;;  %s204_s1 = inlined_call_operand.vmem [shape: f32[1,32], index: 1, kind: input, shape index: {}]   ;;  %s205_s2 = inlined_call_operand.vmem [shape: f32[1,32], index: 2, kind: input, shape index: {}]   ;;  %s206_s4 = inlined_call_operand.vmem [shape: f32[1,32], index: 4, kind: input, shape index: {}]   ;;  %s207_s3 = inlined_call_operand.vmem [shape: f32[32,32], index: 3, kind: input, shape index: {}]   ;;  %s208_s5 = inlined_call_operand.vmem [shape: f32[16,32], index: 5, kind: output, shape index: {}]  }
   0x1   :  { %v21_v0 = vld [vmem:[%s203_s0] sm:$0xff]  ;;  %v22_v2 = vld [vmem:[%s203_s0 + $0x8] sm:$0xff]  ;;  %126 = vrcp.f32 %v132_v4  ;;  %v89_v21 = vld [vmem:[%s207_s3 + $0x10] sm:$0xff] }
   0x2   :  { %v26_v1 = vsel %vm25_vm0, %v21_v0, 0.0  ;;  %v29_v3 = vsel %vm25_vm0, %v22_v2, 0.0  ;;  %v90_v22 = vld [vmem:[%s207_s3 + $0x18] sm:$0xff]  ;;  %v87_v24 = vld [vmem:[%s207_s3] sm:$0xff]  ;;  %v88_v25 = vld [vmem:[%s207_s3 + $0x8] sm:$0xff] }
   0x3   :  { %27 = vadd.xlane.f32.xlu0 %v26_v1  ;;  %v93_v23 = vpack.c.bf16 %v90_v22, %v89_v21  ;;  %v92_v27 = vpack.c.bf16 %v88_v25, %v87_v24  ;;  %v123_v46 = vld [vmem:[%s204_s1] ss:$0 sm:$0xff] }
   0x4   :  { %v124_v51 = vld [vmem:[%s205_s2] ss:$0 sm:$0xff] }
   0x5   :  { %107 = vmatpush.bf16.msra.mxu0 %v93_v23  ;;  %v125_v56 = vld [vmem:[%s206_s4] ss:$0 sm:$0xff] }
   0x7   :  { %v127_v5 = vpop.eup %126 }
   0x8   :  { %v33_v6 = vmul.f32 32.0, %v127_v5  ;;  %vm37_vm1 = vweird.f32 %v127_v5 }
   0x9   :  { %108 = vmatpush.bf16.msra.mxu0 %v92_v27 }
   0xa   :  { %v34_v7 = vsub.f32 1.0, %v33_v6 }
   0xb   :  { %30 = vadd.xlane.f32.xlu0 %v29_v3 }
   0xc   :  { %v35_v8 = vmul.f32 %v127_v5, %v34_v7 }
   0xe   :  { %v36_v9 = vadd.f32 %v127_v5, %v35_v8 }
  0x10   :  { %v38_v10 = vsel %vm37_vm1, %v127_v5, %v36_v9 }
  0x76   :  { %v28_v11 = vpop.xlane.xlu0 %27 }
  0x77   :  { %v39_v12 = vmul.f32 %v38_v10, %v28_v11 }
  0x79   :  { %v41_v13 = vsub.f32 %v21_v0, %v39_v12 }
  0x7b   :  { %v43_v14 = vmul.f32 %v41_v13, %v41_v13 }
  0x7d   :  { %v45_v15 = vsel %vm25_vm0, %v43_v14, 0.0 }
  0x7e   :  { %46 = vadd.xlane.f32.xlu1 %v45_v15  ;;  %v31_v16 = vpop.xlane.xlu0 %30 }
  0x7f   :  { %v40_v17 = vmul.f32 %v38_v10, %v31_v16 }
  0x81   :  { %v42_v18 = vsub.f32 %v22_v2, %v40_v17 }
  0x83   :  { %v44_v19 = vmul.f32 %v42_v18, %v42_v18 }
  0x85   :  { %v48_v20 = vsel %vm25_vm0, %v44_v19, 0.0 }
  0x86   :  { %49 = vadd.xlane.f32.xlu1 %v48_v20 }
  0xf1   :  { %v47_v26 = vpop.xlane.xlu1 %46 }
  0xf2   :  { %v51_v28 = vmul.f32 %v47_v26, %v38_v10 }
  0xf4   :  { %v53_v29 = vadd.f32 1e-05, %v51_v28 }
  0xf6   :  { %128 = vrsqrt.f32 %v53_v29  ;;  %vm61_vm3 = vweird.f32 %v53_v29 }
  0xf9   :  { %v50_v30 = vpop.xlane.xlu1 %49 }
  0xfa   :  { %v52_v31 = vmul.f32 %v50_v30, %v38_v10 }
  0xfc   :  { %v129_v32 = vpop.eup %128  ;;  %v54_v33 = vadd.f32 1e-05, %v52_v31 }
  0xfd   :  { %v56_v34 = vmul.f32 %v129_v32, %v53_v29  ;;  %vm62_vm2 = vweird.f32 %v129_v32 }
  0xfe   :  { %130 = vrsqrt.f32 %v54_v33  ;;  %vm63_vm4 = vmor %vm61_vm3, %vm62_vm2  ;;  %vm71_vm6 = vweird.f32 %v54_v33 }
  0xff   :  { %v57_v35 = vmul.f32 %v129_v32, %v56_v34 }
 0x101   :  { %v58_v36 = vmul.f32 0.5, %v57_v35 }
 0x103   :  { %v59_v37 = vsub.f32 1.5, %v58_v36 }
 0x104   :  { %v131_v38 = vpop.eup %130 }
 0x105   :  { %v60_v39 = vmul.f32 %v129_v32, %v59_v37  ;;  %v66_v40 = vmul.f32 %v131_v38, %v54_v33  ;;  %vm72_vm5 = vweird.f32 %v131_v38 }
 0x106   :  { %vm73_vm7 = vmor %vm71_vm6, %vm72_vm5 }
 0x107   :  { %v67_v41 = vmul.f32 %v131_v38, %v66_v40  ;;  %v64_v42 = vsel %vm63_vm4, %v129_v32, %v60_v39 }
 0x108   :  { %v75_v45 = vmul.f32 %v64_v42, %v41_v13 }
 0x109   :  { %v68_v43 = vmul.f32 0.5, %v67_v41 }
 0x10a   :  { %v80_v50 = vmul.f32 %v123_v46, %v75_v45 }
 0x10b   :  { %v69_v44 = vsub.f32 1.5, %v68_v43 }
 0x10c   :  { %v85_v53 = vadd.f32 %v124_v51, %v80_v50 }
 0x10d   :  { %v70_v47 = vmul.f32 %v131_v38, %v69_v44 }
 0x10f   :  { %v74_v48 = vsel %vm73_vm7, %v131_v38, %v70_v47 }
 0x110   :  { %v76_v49 = vmul.f32 %v74_v48, %v42_v18 }
 0x112   :  { %v81_v52 = vmul.f32 %v123_v46, %v76_v49 }
 0x114   :  { %v86_v54 = vadd.f32 %v124_v51, %v81_v52 }
 0x116   :  { %v91_v55 = vpack.c.bf16 %v86_v54, %v85_v53 }
 0x118   :  { %121 = vmatmul.msk.bf16.vlgmr.msra.gmra.mxu0 %vm25_vm0, %v91_v55 }
 0x195   :  { %v110_v57 = vpop.f32.mrf.mxu0 }
 0x196   :  { %v111_v58 = vadd.f32 %v125_v56, %v110_v57 }
 0x198   :  { %115 = vst.msk [vmem:[%s208_s5] sm:$0xff] %vm25_vm0, %v111_v58 }
 0x19d   :  { %v112_v59 = vpop.f32.mrf.mxu0 }
 0x19e   :  { %v113_v60 = vadd.f32 %v125_v56, %v112_v59 }
 0x1a0   :  { %116 = vst.msk [vmem:[%s208_s5 + $0x8] sm:$0xff] %vm25_vm0, %v113_v60 }

// kernel: tener_forward.5
= control target key start
LH: loop header
LB: loop body
LE: loop exit
PB: predicated region body
PF: predicated region fallthrough
CT: control target
= control target key end

     0   :  { %s1686_s26 = smov 12   ;;  %s1687_s29 = smov 8   ;;  %vm63_vm0 = vcmask 261120   ;;  %vm124_vm1 = vcmask 64512   ;;  %vm81_vm2 = vcmask 523264   ;;  %vm120_vm3 = vcmask 31744   ;;  %s2468_s2 = inlined_call_operand.vmem [shape: f32[8,4], index: 2, kind: input, shape index: {}]   ;;  %s2469_s7 = inlined_call_operand.vmem [shape: f32[4,8], index: 7, kind: input, shape index: {}]   ;;  %s2470_s5 = inlined_call_operand.vmem [shape: f32[32,64], index: 5, kind: input, shape index: {}]   ;;  %s2471_s0 = inlined_call_operand.vmem [shape: f32[16,32], index: 0, kind: input, shape index: {}]   ;;  %s2472_s6 = inlined_call_operand.vmem [shape: f32[4,8], index: 6, kind: input, shape index: {}]   ;;  %s2473_s3 = inlined_call_operand.vmem [shape: f32[8,4], index: 3, kind: input, shape index: {}]   ;;  %s2474_s4 = inlined_call_operand.vmem [shape: f32[8,8], index: 4, kind: input, shape index: {}]   ;;  %s2475_s1 = inlined_call_operand.vmem [shape: f32[2,8], index: 1, kind: input, shape index: {}]   ;;  %s2476_s8 = inlined_call_operand.vmem [shape: f32[1,32], index: 8, kind: input, shape index: {}]   ;;  %s2477_s9 = inlined_call_operand.vmem [shape: f32[1,32], index: 9, kind: input, shape index: {}]   ;;  %s2478_s11 = inlined_call_operand.vmem [shape: f32[1,64], index: 11, kind: input, shape index: {}]   ;;  %s2479_s10 = inlined_call_operand.vmem [shape: f32[32,64], index: 10, kind: input, shape index: {}]   ;;  %s2480_s12 = inlined_call_operand.vmem [shape: f32[64,32], index: 12, kind: input, shape index: {}]   ;;  %s2481_s13 = inlined_call_operand.vmem [shape: f32[1,32], index: 13, kind: input, shape index: {}]   ;;  %s2482_s14 = inlined_call_operand.vmem [shape: f32[1,32], index: 14, kind: input, shape index: {}]   ;;  %s2483_s15 = inlined_call_operand.vmem [shape: f32[1,32], index: 15, kind: input, shape index: {}]   ;;  %s2484_s16 = inlined_call_operand.vmem [shape: f32[16,32], index: 16, kind: output, shape index: {}]  }
   0x1   :  { %2485 = sst [smem:[#allocation3_spill]] %s2468_s2  ;;  %v1626_v1 = vld [vmem:[%s2469_s7 + $0x1] ss:$0 sm:$0xff]  ;;  %v58_v2 = vld [vmem:[%s2470_s5 + $0x10] sm:$0xff]  ;;  %v59_v3 = vld [vmem:[%s2470_s5 + $0x18] sm:$0xff]  ;;  %s1688_s21 = smov 16  }
   0x2   :  { %s2486_s23 = sld [smem:[#allocation3_spill]]  ;;  %245 = vrot.lane.b32.xlu1 %v1626_v1, %s1687_s29  ;;  %v56_v4 = vld [vmem:[%s2470_s5] sm:$0xff]  ;;  %v57_v5 = vld [vmem:[%s2470_s5 + $0x8] sm:$0xff]  ;;  %v62_v6 = vpack.c.bf16 %v59_v3, %v58_v2  ;;  %s1689_s5 = smov 20   ;;  %vm217_vm4 = vcmask 1043456   ;;  %vm746_vm5 = vcmask 130048  }
   0x3   :  { %v1815_v7 = vld [vmem:[%s2471_s0] sm:$0xff]  ;;  %v61_v8 = vpack.c.bf16 %v57_v5, %v56_v4  ;;  %v1820_v9 = vld [vmem:[%s2471_s0 + $0x8] sm:$0xff]  ;;  %s1690_s27 = smov 4   ;;  %s1691_s2 = smov 28   ;;  %vm748_vm6 = vcmask 195584  }
   0x4   :  { %73 = vmatpush.bf16.msra.mxu0 %v62_v6  ;;  %v60_v10 = vpack.c.bf16 %v1820_v9, %v1815_v7  ;;  %v1628_v11 = vld [vmem:[%s2469_s7 + $0x2] ss:$0 sm:$0xff]  ;;  %s1692_s17 = smov 24   ;;  %v1631_v13 = vld [vmem:[%s2472_s6 + $0x1] ss:$0 sm:$0xff]  ;;  %v1875_v21 = vpack.c.bf16 %v1815_v7, %v1815_v7  ;;  %s1693_s25 = smov 124  }
   0x5   :  { %v1840_v12 = vld [vmem:[%s2473_s3] sm:$0xff]  ;;  %s1694_s30 = smov 120   ;;  %s1695_s20 = smov 112  }
   0x6   :  { %v1629_v14 = vld [vmem:[%s2469_s7 + $0x3] ss:$0 sm:$0xff]  ;;  %v1630_v16 = vld [vmem:[%s2472_s6 + $0x2] ss:$0 sm:$0xff]  ;;  %v180_v22 = vsel %vm124_vm1, %v1875_v21, 0  ;;  %s1697_s24 = smov 96  }
   0x7   :  { %189 = vmatpush.bf16.xpose.msra.mxu3 %v180_v22  ;;  %v1915_v37 = vld [vmem:[%s2472_s6] ss:$0 sm:$0xff] }
   0x8   :  { %v1790_v0 = vld [vmem:[%s2486_s23] sm:$0xff]  ;;  %74 = vmatpush.bf16.msra.mxu0 %v61_v8 }
   0x9   :  { %253 = vrot.lane.b32.xlu0 %v1790_v0, %s1686_s26  ;;  %433 = vrot.lane.b32.xlu2 %v1790_v0, %s1688_s21  ;;  %v152_v15 = vmul.f32 %v1790_v0, %v1815_v7  ;;  %v1627_v43 = vld [vmem:[%s2469_s7] ss:$0 sm:$0xff] }
   0xa   :  { %420 = vrot.lane.b32.xlu1 %v1790_v0, %s1689_s5 }
   0xb   :  { %1515 = vmatmul.msk.bf16.vlgmr.msra.gmra.mxu0 %vm63_vm0, %v60_v10 }
  0x11   :  { %266 = vrot.lane.b32.xlu0 %v1790_v0, %s1687_s29  ;;  %100 = vrot.lane.b32.xlu2 %v1790_v0, %s1690_s27 }
  0x12   :  { %586 = vrot.lane.b32.xlu1 %v1790_v0, %s1691_s2 }
  0x19   :  { %412 = vrot.lane.b32.xlu0 %v1628_v11, %s1688_s21  ;;  %599 = vrot.lane.b32.xlu2 %v1790_v0, %s1692_s17 }
  0x1a   :  { %262 = vrot.lane.b32.xlu1 %v1840_v12, %s1686_s26 }
  0x21   :  { %249 = vrot.lane.b32.xlu0 %v1840_v12, %s1687_s29  ;;  %238 = vrot.lane.b32.xlu2 %v1631_v13, %s1687_s29 }
  0x22   :  { %578 = vrot.lane.b32.xlu1 %v1629_v14, %s1692_s17  ;;  %v1633_v14 = vld [vmem:[%s2472_s6 + $0x3] ss:$0 sm:$0xff]  ;;  %s1696_s6 = smov 104  }
  0x29   :  { %429 = vrot.lane.b32.xlu0 %v1840_v12, %s1689_s5  ;;  %416 = vrot.lane.b32.xlu2 %v1840_v12, %s1688_s21  ;;  %s1700_s5 = smov 72  }
  0x2a   :  { %595 = vrot.lane.b32.xlu1 %v1840_v12, %s1691_s2 }
  0x31   :  { %110 = vrot.lane.b32.xlu0 %v1840_v12, %s1690_s27  ;;  %154 = vrot.lane.b32.xlu2 %v152_v15, %s1690_s27 }
  0x39   :  { %405 = vrot.lane.b32.xlu0 %v1630_v16, %s1688_s21 }
  0x63   :  { %v1867_v17 = vpop.permute.xlu2 %433 }
  0x64   :  { %v476_v23 = vmul.f32 %v1867_v17, %v1815_v7 }
  0x6b   :  { %v1884_v25 = vpop.permute.xlu2 %100 }
  0x6c   :  { %v145_v30 = vmul.f32 %v1884_v25, %v1815_v7 }
  0x73   :  { %v1897_v31 = vpop.permute.xlu2 %599 }
  0x74   :  { %v246_v19 = vpop.permute.xlu1 %245  ;;  %v642_v58 = vmul.f32 %v1897_v31, %v1815_v7 }
  0x7b   :  { %v1869_v18 = vpop.permute.xlu0 %253  ;;  %v1910_v36 = vpop.permute.xlu2 %238 }
  0x7c   :  { %v302_v20 = vmul.f32 %v1869_v18, %v1815_v7  ;;  %v1886_v26 = vpop.permute.xlu1 %420 }
  0x7d   :  { %v469_v28 = vmul.f32 %v1886_v26, %v1815_v7 }
  0x7e   :  { %304 = vrot.lane.b32.xlu2 %v302_v20, %s1693_s25 }
  0x7f   :  { %471 = vrot.lane.b32.xlu1 %v469_v28, %s1693_s25 }
  0x83   :  { %v1882_v24 = vpop.permute.xlu0 %266  ;;  %v1936_v50 = vpop.permute.xlu2 %416 }
  0x84   :  { %v309_v27 = vmul.f32 %v1882_v24, %v1815_v7  ;;  %v1899_v32 = vpop.permute.xlu1 %586 }
  0x85   :  { %v635_v33 = vmul.f32 %v1899_v32, %v1815_v7 }
  0x86   :  { %311 = vrot.lane.b32.xlu0 %v309_v27, %s1690_s27  ;;  %478 = vrot.lane.b32.xlu2 %v476_v23, %s1690_s27  ;;  %v922_v27 = vmul.f32 %v1869_v18, %v1820_v9 }
  0x87   :  { %147 = vrot.lane.b32.xlu1 %v145_v30, %s1693_s25 }
  0x88   :  { %v76_v34 = vpop.f32.mrf.mxu0 }
  0x89   :  { %82 = vst.msk [vmem:[#allocation2] sm:$0xff] %vm81_vm2, %v76_v34 }
  0x8b   :  { %v413_v29 = vpop.permute.xlu0 %412  ;;  %v155_v34 = vpop.permute.xlu2 %154 }
  0x8c   :  { %v1934_v48 = vpop.permute.xlu1 %262 }
  0x8e   :  { %582 = vrot.lane.b32.xlu0 %v1840_v12, %s1692_s17  ;;  %637 = vrot.lane.b32.xlu2 %v635_v33, %s1693_s25 }
  0x90   :  { %v78_v38 = vpop.f32.mrf.mxu0  ;;  %v1919_v39 = vld [vmem:[#allocation2] sm:$0xff] }
  0x91   :  { %83 = vst.msk [vmem:[#allocation2 + $0x8] sm:$0xff] %vm81_vm2, %v78_v38  ;;  %v248_v40 = vadd.f32 %v246_v19, %v1919_v39  ;;  %v415_v41 = vadd.f32 %v413_v29, %v1919_v39  ;;  %v93_v42 = vadd.f32 %v1915_v37, %v1919_v39  ;;  %v1949_v53 = vadd.f32 %v1627_v43, %v1919_v39 }
  0x92   :  { %v241_v20 = vadd.f32 %v1910_v36, %v1919_v39 }
  0x93   :  { %v1908_v35 = vpop.permute.xlu0 %249  ;;  %v269_v45 = vmul.f32 %v1882_v24, %v248_v40  ;;  %v256_v46 = vmul.f32 %v1869_v18, %v248_v40  ;;  %v436_v47 = vmul.f32 %v1867_v17, %v415_v41  ;;  %v94_v49 = vpack.c.bf16 %v93_v42, %v93_v42 }
  0x94   :  { %v1944_v52 = vmul.f32 %v1934_v48, %v248_v40  ;;  %v1952_v54 = vmul.f32 %v1908_v35, %v248_v40  ;;  %v1955_v55 = vmul.f32 %v1936_v50, %v415_v41  ;;  %v423_v57 = vmul.f32 %v1886_v26, %v415_v41  ;;  %v2012_v16 = vpop.permute.xlu1 %578 }
  0x95   :  { %271 = vrot.lane.b32.xlu1 %v269_v45, %s1690_s27  ;;  %1518 = vmatmul.msk.bf16.vlgmr.msra.gmra.mxu3 %vm124_vm1, %v94_v49  ;;  %v114_v61 = vmul.f32 %v1949_v53, %v1790_v0  ;;  %v103_v15 = vmul.f32 %v1884_v25, %v1949_v53  ;;  %v242_v23 = vpack.c.bf16 %v241_v20, %v241_v20 }
  0x96   :  { %345 = vrot.lane.b32.xlu2 %v1875_v21, %s1694_s30  ;;  %258 = vrot.lane.b32.xlu0 %v256_v46, %s1693_s25  ;;  %v144_v20 = vmul.f32 %v1840_v12, %v1815_v7 }
  0x98   :  { %v1957_v56 = vld [vmem:[#allocation2 + $0x8] sm:$0xff] }
  0x99   :  { %v1023_v59 = vadd.f32 %v1957_v56, %v413_v29  ;;  %v880_v62 = vadd.f32 %v1957_v56, %v246_v19  ;;  %v1969_v63 = vadd.f32 %v1627_v43, %v1957_v56  ;;  %v2016_v19 = vadd.f32 %v2012_v16, %v1919_v39 }
  0x9b   :  { %v1929_v44 = vpop.permute.xlu0 %429  ;;  %v1976_v2 = vmul.f32 %v880_v62, %v1869_v18  ;;  %v1979_v3 = vmul.f32 %v880_v62, %v1882_v24  ;;  %v1982_v4 = vmul.f32 %v1023_v59, %v1936_v50  ;;  %v1987_v5 = vmul.f32 %v1023_v59, %v1867_v17 }
  0x9c   :  { %v1941_v51 = vmul.f32 %v1929_v44, %v415_v41  ;;  %v1992_v6 = vmul.f32 %v1969_v63, %v1884_v25  ;;  %v1995_v8 = vmul.f32 %v880_v62, %v1908_v35  ;;  %v1998_v10 = vmul.f32 %v880_v62, %v1934_v48  ;;  %v2046_v43 = vpop.permute.xlu1 %595  ;;  %v86_v62 = vld [vmem:[%s2474_s4] sm:$0xff] }
  0x9d   :  { %425 = vrot.lane.b32.xlu1 %v423_v57, %s1693_s25  ;;  %v2001_v11 = vmul.f32 %v1023_v59, %v1929_v44  ;;  %v602_v22 = vmul.f32 %v1897_v31, %v2016_v19  ;;  %v589_v30 = vmul.f32 %v1899_v32, %v2016_v19  ;;  %v1065_v18 = vmul.f32 %v1886_v26, %v1820_v9 }
  0x9e   :  { %438 = vrot.lane.b32.xlu2 %v436_v47, %s1690_s27  ;;  %644 = vrot.lane.b32.xlu0 %v642_v58, %s1690_s27  ;;  %v1025_v38 = vmul.f32 %v1023_v59, %v1886_v26  ;;  %v308_v47 = vmul.f32 %v1934_v48, %v1815_v7 }
  0xa3   :  { %v1963_v60 = vpop.permute.xlu0 %110 }
  0xa4   :  { %v1973_v1 = vmul.f32 %v1963_v60, %v1949_v53  ;;  %v2005_v13 = vmul.f32 %v1969_v63, %v1963_v60 }
  0xa5   :  { %105 = vrot.lane.b32.xlu1 %v103_v15, %s1693_s25  ;;  %v151_v15 = vmul.f32 %v1963_v60, %v1815_v7 }
  0xa6   :  { %116 = vrot.lane.b32.xlu2 %v114_v61, %s1690_s27  ;;  %571 = vrot.lane.b32.xlu0 %v1633_v14, %s1692_s17  ;;  %v2057_v14 = vpack.c.bf16 %v86_v62, %v86_v62 }
  0xab   :  { %v2028_v28 = vpop.permute.xlu0 %405 }
  0xac   :  { %v408_v29 = vadd.f32 %v2028_v28, %v1919_v39 }
  0xad   :  { %604 = vrot.lane.b32.xlu1 %v602_v22, %s1690_s27  ;;  %v2065_v22 = vsel %vm124_vm1, %v2057_v14, 0 }
  0xae   :  { %511 = vrot.lane.b32.xlu2 %v1875_v21, %s1695_s20  ;;  %924 = vrot.lane.b32.xlu0 %v922_v27, %s1693_s25  ;;  %v409_v33 = vpack.c.bf16 %v408_v29, %v408_v29  ;;  %v157_v29 = vsub.f32 %v151_v15, %v155_v34 }
  0xaf   :  { %138 = vmatpush.bf16.xpose.msra.mxu1 %v2065_v22 }
  0xb6   :  { %342 = vrot.lane.b32.xlu2 %v242_v23, %s1694_s30  ;;  %591 = vrot.lane.b32.xlu0 %v589_v30, %s1693_s25 }
  0xb7   :  { %295 = vmatpush.bf16.xpose.msrb.mxu1 %v2065_v22 }
  0xbe   :  { %509 = vrot.lane.b32.xlu2 %v409_v33, %s1695_s20  ;;  %v929_v33 = vmul.f32 %v1882_v24, %v1820_v9 }
  0xc6   :  { %677 = vrot.lane.b32.xlu2 %v1875_v21, %s1696_s6  ;;  %v301_v21 = vmul.f32 %v1908_v35, %v1815_v7 }
  0xce   :  { %1067 = vrot.lane.b32.xlu2 %v1065_v18, %s1693_s25 }
  0xd6   :  { %1027 = vrot.lane.b32.xlu2 %v1025_v38, %s1693_s25  ;;  %v475_v38 = vmul.f32 %v1929_v44, %v1815_v7 }
  0xd8   :  { %v305_v40 = vpop.permute.xlu2 %304 }
  0xd9   :  { %v307_v57 = vadd.f32 %v305_v40, %v301_v21  ;;  %v468_v40 = vmul.f32 %v1936_v50, %v1815_v7 }
  0xe0   :  { %v479_v41 = vpop.permute.xlu2 %478 }
  0xe1   :  { %v481_v34 = vsub.f32 %v475_v38, %v479_v41 }
  0xe8   :  { %v638_v42 = vpop.permute.xlu2 %637 }
  0xf0   :  { %v346_v45 = vpop.permute.xlu2 %345 }
  0xf1   :  { %v351_v46 = vsel %vm124_vm1, %v346_v45, 0  ;;  %v472_v58 = vpop.permute.xlu1 %471 }
  0xf2   :  { %360 = vmatpush.bf16.xpose.msrb.mxu3 %v351_v46  ;;  %v474_v46 = vadd.f32 %v472_v58, %v468_v40 }
  0xf8   :  { %v312_v49 = vpop.permute.xlu0 %311  ;;  %v439_v59 = vpop.permute.xlu2 %438 }
  0xf9   :  { %v314_v26 = vsub.f32 %v308_v47, %v312_v49  ;;  %v148_v23 = vpop.permute.xlu1 %147 }
  0xfa   :  { %v150_v30 = vadd.f32 %v148_v23, %v144_v20  ;;  %v641_v23 = vmul.f32 %v2046_v43, %v1815_v7 }
  0xfb   :  { %v1566_v61 = vpack.i.bf16 %v314_v26, %v307_v57  ;;  %v1571_v57 = vpack.i.bf16 %v481_v34, %v474_v46  ;;  %v98_v46 = vmul.f32 %v1949_v53, %v1840_v12 }
  0xfc   :  { %v158_v18 = vsel %vm120_vm3, %v150_v30, %v157_v29 }
  0xfd   :  { %1567 = vrot.lane.b32.xlu1 %v1566_v61, %s1694_s30  ;;  %v159_v45 = vpack.c.bf16 %v158_v18, %v158_v18  ;;  %v441_v18 = vsub.f32 %v1941_v51, %v439_v59 }
  0xff   :  { %v161_v21 = vsel %vm124_vm1, %v159_v45, 0 }
 0x100   :  { %v117_v27 = vpop.permute.xlu2 %116  ;;  %v2078_v47 = vpop.permute.xlu0 %582  ;;  %170 = vmatpush.bf16.xpose.msra.mxu2 %v161_v21 }
 0x101   :  { %v634_v41 = vmul.f32 %v2078_v47, %v1815_v7  ;;  %v119_v21 = vsub.f32 %v1973_v1, %v117_v27  ;;  %v921_v1 = vmul.f32 %v1908_v35, %v1820_v9  ;;  %v585_v35 = vmul.f32 %v2078_v47, %v2016_v19 }
 0x103   :  { %v640_v29 = vadd.f32 %v638_v42, %v634_v41 }
 0x105   :  { %931 = vrot.lane.b32.xlu1 %v929_v33, %s1690_s27 }
 0x107   :  { %1517 = vmatmul.msk.bf16.vlgmr.msra.gmra.mxu2 %vm124_vm1, %v2057_v14  ;;  %v272_v26 = vpop.permute.xlu1 %271 }
 0x108   :  { %v512_v49 = vpop.permute.xlu2 %511  ;;  %v259_v61 = vpop.permute.xlu0 %258  ;;  %v274_v58 = vsub.f32 %v1944_v52, %v272_v26 }
 0x109   :  { %v517_v24 = vsel %vm124_vm1, %v512_v49, 0  ;;  %v261_v62 = vadd.f32 %v259_v61, %v1952_v54  ;;  %v1072_v61 = vmul.f32 %v1867_v17, %v1820_v9  ;;  %v790_v17 = vmul.f32 %v1884_v25, %v1820_v9 }
 0x10a   :  { %526 = vmatpush.bf16.xpose.msra.mxu3 %v517_v24  ;;  %v765_v25 = vmul.f32 %v1969_v63, %v1790_v0 }
 0x10b   :  { %v1581_v20 = vpack.i.bf16 %v274_v58, %v261_v62  ;;  %v598_v58 = vmul.f32 %v2046_v43, %v2016_v19  ;;  %v1207_v19 = vmul.f32 %v1899_v32, %v1820_v9 }
 0x10d   :  { %1572 = vrot.lane.b32.xlu1 %v1571_v57, %s1695_s20  ;;  %1582 = vrot.lane.b32.xlu0 %v1581_v20, %s1694_s30  ;;  %v797_v20 = vmul.f32 %v1790_v0, %v1820_v9  ;;  %v878_v0 = vadd.f32 %v1957_v56, %v1910_v36 }
 0x10f   :  { %v426_v30 = vpop.permute.xlu1 %425 }
 0x110   :  { %v343_v15 = vpop.permute.xlu2 %342  ;;  %v645_v33 = vpop.permute.xlu0 %644  ;;  %v428_v52 = vadd.f32 %v426_v30, %v1955_v55  ;;  %v2146_v30 = vadd.f32 %v1957_v56, %v2012_v16 }
 0x111   :  { %1522 = vmatmul.msk.bf16.vlgmr.msrb.gmra.mxu3 %vm124_vm1, %v343_v15  ;;  %v647_v54 = vsub.f32 %v641_v23, %v645_v33  ;;  %v2150_v33 = vpack.c.bf16 %v1820_v9, %v1820_v9 }
 0x112   :  { %v1586_v40 = vpack.i.bf16 %v441_v18, %v428_v52  ;;  %v1167_v18 = vmul.f32 %v2146_v30, %v1899_v32 }
 0x113   :  { %v1576_v45 = vpack.i.bf16 %v647_v54, %v640_v29  ;;  %v1214_v29 = vmul.f32 %v1897_v31, %v1820_v9 }
 0x115   :  { %1577 = vrot.lane.b32.xlu1 %v1576_v45, %s1696_s6  ;;  %884 = vrot.lane.b32.xlu0 %v1976_v2, %s1693_s25 }
 0x117   :  { %v106_v42 = vpop.permute.xlu1 %105 }
 0x118   :  { %v510_v38 = vpop.permute.xlu2 %509  ;;  %v2099_v7 = vpop.permute.xlu0 %571  ;;  %v108_v51 = vadd.f32 %v106_v42, %v98_v46 }
 0x119   :  { %v2104_v34 = vpop.f32.mrf.mxu3  ;;  %v574_v53 = vadd.f32 %v2099_v7, %v1919_v39 }
 0x11a   :  { %v121_v49 = vsel %vm120_vm3, %v108_v51, %v119_v21 }
 0x11b   :  { %v122_v2 = vpack.c.bf16 %v121_v49, %v121_v49  ;;  %v575_v26 = vpack.c.bf16 %v574_v53, %v574_v53 }
 0x11d   :  { %891 = vrot.lane.b32.xlu1 %v1979_v3, %s1690_s27  ;;  %1587 = vrot.lane.b32.xlu0 %v1586_v40, %s1695_s20  ;;  %v928_v40 = vmul.f32 %v1934_v48, %v1820_v9 }
 0x11e   :  { %1516 = vmatmul.msk.bf16.vlgmr.msra.gmra.mxu1 %vm124_vm1, %v122_v2 }
 0x11f   :  { %462 = vmatpush.bf16.xpose.msra.mxu1 %v2065_v22  ;;  %v605_v3 = vpop.permute.xlu1 %604 }
 0x120   :  { %v678_v59 = vpop.permute.xlu2 %677  ;;  %v925_v27 = vpop.permute.xlu0 %924  ;;  %v607_v15 = vsub.f32 %v598_v58, %v605_v3 }
 0x121   :  { %v683_v55 = vsel %vm124_vm1, %v678_v59, 0  ;;  %1526 = vmatmul.msk.bf16.vlgmr.msra.gmra.mxu3 %vm124_vm1, %v510_v38  ;;  %v927_v24 = vadd.f32 %v925_v27, %v921_v1  ;;  %v193_v57 = vpop.f32.mrf.mxu3  ;;  %v1174_v59 = vmul.f32 %v2146_v30, %v1897_v31  ;;  %v825_v27 = vsel %vm124_vm1, %v2150_v33, 0 }
 0x122   :  { %692 = vmatpush.bf16.xpose.msrb.mxu3 %v683_v55 }
 0x125   :  { %675 = vrot.lane.b32.xlu1 %v575_v26, %s1696_s6  ;;  %1074 = vrot.lane.b32.xlu0 %v1072_v61, %s1690_s27 }
 0x128   :  { %v592_v62 = vpop.permute.xlu0 %591  ;;  %v1068_v26 = vpop.permute.xlu2 %1067 }
 0x129   :  { %v594_v41 = vadd.f32 %v592_v62, %v585_v35 }
 0x12a   :  { %834 = vmatpush.bf16.xpose.msra.mxu3 %v825_v27  ;;  %v753_v27 = vadd.f32 %v1915_v37, %v1957_v56  ;;  %v1206_v37 = vmul.f32 %v2078_v47, %v1820_v9 }
 0x12b   :  { %v1591_v23 = vpack.i.bf16 %v607_v15, %v594_v41 }
 0x12d   :  { %1592 = vrot.lane.b32.xlu2 %v1591_v23, %s1696_s6  ;;  %799 = vrot.lane.b32.xlu1 %v797_v20, %s1690_s27 }
 0x12e   :  { %792 = vrot.lane.b32.xlu0 %v790_v17, %s1693_s25 }
 0x135   :  { %1216 = vrot.lane.b32.xlu2 %v1214_v29, %s1690_s27  ;;  %1209 = vrot.lane.b32.xlu1 %v1207_v19, %s1693_s25 }
 0x136   :  { %1034 = vrot.lane.b32.xlu0 %v1987_v5, %s1690_s27  ;;  %v879_v5 = vpack.c.bf16 %v878_v0, %v878_v0  ;;  %v1028_v0 = vpop.permute.xlu2 %1027 }
 0x13d   :  { %767 = vrot.lane.b32.xlu1 %v765_v25, %s1690_s27 }
 0x13e   :  { %760 = vrot.lane.b32.xlu0 %v1992_v6, %s1693_s25 }
 0x145   :  { %1169 = vrot.lane.b32.xlu1 %v1167_v18, %s1693_s25  ;;  %s1699_s25 = smov 80  }
 0x146   :  { %965 = vrot.lane.b32.xlu0 %v2150_v33, %s1694_s30 }
 0x14e   :  { %962 = vrot.lane.b32.xlu0 %v879_v5, %s1694_s30 }
 0x156   :  { %1107 = vrot.lane.b32.xlu0 %v2150_v33, %s1695_s20 }
 0x16f   :  { %v1568_v6 = vpop.permute.xlu1 %1567 }
 0x170   :  { %v1570_v16 = vunpack.i.h.bf16 %v1568_v6  ;;  %v1569_v52 = vunpack.i.l.bf16 %v1568_v6 }
 0x172   :  { %v323_v54 = vsel %vm120_vm3, %v1569_v52, %v1570_v16 }
 0x173   :  { %v324_v32 = vpack.c.bf16 %v323_v54, %v323_v54 }
 0x175   :  { %v326_v38 = vsel %vm124_vm1, %v324_v32, 0 }
 0x176   :  { %335 = vmatpush.bf16.xpose.msrb.mxu2 %v326_v38  ;;  %v1071_v38 = vmul.f32 %v1929_v44, %v1820_v9  ;;  %v789_v44 = vmul.f32 %v1840_v12, %v1820_v9 }
 0x177   :  { %v932_v45 = vpop.permute.xlu1 %931 }
 0x178   :  { %v934_v36 = vsub.f32 %v928_v40, %v932_v45 }
 0x17a   :  { %v1596_v46 = vpack.i.bf16 %v934_v36, %v927_v24 }
 0x17c   :  { %1597 = vrot.lane.b32.xlu2 %v1596_v46, %s1694_s30 }
 0x17d   :  { %1521 = vmatmul.msk.bf16.vlgmr.msrb.gmra.mxu2 %vm124_vm1, %v2057_v14 }
 0x17f   :  { %v1573_v42 = vpop.permute.xlu1 %1572  ;;  %v1583_v2 = vpop.permute.xlu0 %1582 }
 0x180   :  { %v1575_v21 = vunpack.i.h.bf16 %v1573_v42  ;;  %v1574_v51 = vunpack.i.l.bf16 %v1573_v42  ;;  %v1585_v53 = vunpack.i.h.bf16 %v1583_v2  ;;  %v1584_v1 = vunpack.i.l.bf16 %v1583_v2 }
 0x182   :  { %v490_v55 = vsel %vm120_vm3, %v1574_v51, %v1575_v21  ;;  %v283_v24 = vsel %vm120_vm3, %v1584_v1, %v1585_v53 }
 0x183   :  { %v491_v49 = vpack.c.bf16 %v490_v55, %v490_v55  ;;  %v284_v57 = vpack.c.bf16 %v283_v24, %v283_v24  ;;  %v796_v55 = vmul.f32 %v1963_v60, %v1820_v9  ;;  %v754_v60 = vpack.c.bf16 %v753_v27, %v753_v27 }
 0x184   :  { %1176 = vrot.lane.b32.xlu2 %v1174_v59, %s1690_s27 }
 0x185   :  { %v493_v48 = vsel %vm124_vm1, %v491_v49, 0  ;;  %1520 = vmatmul.msk.bf16.vlgmr.msrb.gmra.mxu1 %vm124_vm1, %v284_v57 }
 0x186   :  { %502 = vmatpush.bf16.xpose.msra.mxu2 %v493_v48  ;;  %628 = vmatpush.bf16.xpose.msrb.mxu1 %v2065_v22 }
 0x187   :  { %v1578_v31 = vpop.permute.xlu1 %1577  ;;  %v885_v58 = vpop.permute.xlu0 %884 }
 0x188   :  { %v1580_v61 = vunpack.i.h.bf16 %v1578_v31  ;;  %v1579_v3 = vunpack.i.l.bf16 %v1578_v31  ;;  %v887_v17 = vadd.f32 %v885_v58, %v1995_v8  ;;  %v1021_v8 = vadd.f32 %v1957_v56, %v2028_v28  ;;  %v1593_v42 = vpop.permute.xlu2 %1592 }
 0x189   :  { %v1595_v51 = vunpack.i.h.bf16 %v1593_v42  ;;  %v1594_v59 = vunpack.i.l.bf16 %v1593_v42  ;;  %v1213_v58 = vmul.f32 %v2046_v43, %v1820_v9  ;;  %v1166_v42 = vmul.f32 %v2146_v30, %v2078_v47 }
 0x18a   :  { %v656_v35 = vsel %vm120_vm3, %v1579_v3, %v1580_v61  ;;  %v2182_v62 = vpop.f32.mrf.mxu2  ;;  %v1022_v46 = vpack.c.bf16 %v1021_v8, %v1021_v8 }
 0x18b   :  { %v657_v15 = vpack.c.bf16 %v656_v35, %v656_v35  ;;  %v616_v53 = vsel %vm120_vm3, %v1594_v59, %v1595_v51 }
 0x18c   :  { %v617_v31 = vpack.c.bf16 %v616_v53, %v616_v53 }
 0x18d   :  { %1525 = vmatmul.msk.bf16.vlgmr.msra.gmra.mxu2 %vm124_vm1, %v2057_v14  ;;  %v659_v41 = vsel %vm124_vm1, %v657_v15, 0 }
 0x18e   :  { %668 = vmatpush.bf16.xpose.msrb.mxu2 %v659_v41 }
 0x18f   :  { %v892_v23 = vpop.permute.xlu1 %891  ;;  %v1588_v19 = vpop.permute.xlu0 %1587 }
 0x190   :  { %v894_v29 = vsub.f32 %v1998_v10, %v892_v23  ;;  %v1590_v25 = vunpack.i.h.bf16 %v1588_v19  ;;  %v1589_v18 = vunpack.i.l.bf16 %v1588_v19  ;;  %v1064_v10 = vmul.f32 %v1936_v50, %v1820_v9  ;;  %v1217_v61 = vpop.permute.xlu2 %1216 }
 0x191   :  { %v1219_v41 = vsub.f32 %v1213_v58, %v1217_v61  ;;  %v1163_v9 = vadd.f32 %v1957_v56, %v2099_v7 }
 0x192   :  { %v1601_v5 = vpack.i.bf16 %v894_v29, %v887_v17  ;;  %v174_v6 = vpop.f32.mrf.mxu2  ;;  %v450_v16 = vsel %vm120_vm3, %v1589_v18, %v1590_v25  ;;  %v1070_v45 = vadd.f32 %v1068_v26, %v1064_v10  ;;  %v1030_v17 = vadd.f32 %v1028_v0, %v1982_v4 }
 0x193   :  { %v451_v52 = vpack.c.bf16 %v450_v16, %v450_v16  ;;  %v1164_v6 = vpack.c.bf16 %v1163_v9, %v1163_v9 }
 0x194   :  { %v2185_v20 = vpop.f32.mrf.mxu3  ;;  %1602 = vrot.lane.b32.xlu1 %v1601_v5, %s1694_s30  ;;  %v757_v5 = vmul.f32 %v1969_v63, %v1840_v12 }
 0x195   :  { %1524 = vmatmul.msk.bf16.vlgmr.msra.gmra.mxu1 %vm124_vm1, %v451_v52 }
 0x196   :  { %783 = vmatpush.bf16.xpose.msra.mxu1 %v2065_v22 }
 0x197   :  { %v676_v32 = vpop.permute.xlu1 %675  ;;  %v1075_v40 = vpop.permute.xlu0 %1074 }
 0x198   :  { %1530 = vmatmul.msk.bf16.vlgmr.msrb.gmra.mxu3 %vm124_vm1, %v676_v32  ;;  %v1077_v36 = vsub.f32 %v1071_v38, %v1075_v40 }
 0x19a   :  { %v1606_v21 = vpack.i.bf16 %v1077_v36, %v1070_v45 }
 0x19b   :  { %v140_v28 = vpop.f32.mrf.mxu1 }
 0x19c   :  { %v364_v54 = vpop.f32.mrf.mxu3  ;;  %1105 = vrot.lane.b32.xlu1 %v1022_v46, %s1695_s20  ;;  %1607 = vrot.lane.b32.xlu2 %v1606_v21, %s1695_s20  ;;  %v192_v12 = vadd.f32 %v2104_v34, %v140_v28  ;;  %v1173_v21 = vmul.f32 %v2146_v30, %v2046_v43 }
 0x19d   :  { %1529 = vmatmul.msk.bf16.vlgmr.msrb.gmra.mxu2 %vm124_vm1, %v2057_v14 }
 0x19e   :  { %v195_v63 = vadd.f32 %v192_v12, %v2182_v62  ;;  %v210_v12 = vpack.c.bf16 %v1919_v39, %v1919_v39 }
 0x19f   :  { %v800_v49 = vpop.permute.xlu1 %799 }
 0x1a0   :  { %v802_v48 = vsub.f32 %v796_v55, %v800_v49  ;;  %v793_v2 = vpop.permute.xlu0 %792 }
 0x1a1   :  { %v795_v1 = vadd.f32 %v793_v2, %v789_v44 }
 0x1a3   :  { %v803_v24 = vsel %vm120_vm3, %v795_v1, %v802_v48  ;;  %v142_v57 = vpop.f32.mrf.mxu1 }
 0x1a4   :  { %v2206_v50 = vpop.f32.mrf.mxu3  ;;  %v804_v26 = vpack.c.bf16 %v803_v24, %v803_v24  ;;  %1249 = vrot.lane.b32.xlu1 %v2150_v33, %s1696_s6 }
 0x1a5   :  { %1528 = vmatmul.msk.bf16.vlgmr.msrb.gmra.mxu1 %vm124_vm1, %v617_v31 }
 0x1a6   :  { %v806_v35 = vsel %vm124_vm1, %v804_v26, 0  ;;  %915 = vmatpush.bf16.xpose.msrb.mxu1 %v2065_v22 }
 0x1a7   :  { %815 = vmatpush.bf16.xpose.msra.mxu2 %v806_v35  ;;  %v1210_v15 = vpop.permute.xlu1 %1209 }
 0x1a8   :  { %v1212_v23 = vadd.f32 %v1210_v15, %v1206_v37  ;;  %v1035_v33 = vpop.permute.xlu0 %1034  ;;  %1534 = vmatmul.msk.bf16.vlgmr.msra.gmra.mxu3 %vm124_vm1, %v754_v60 }
 0x1a9   :  { %v1037_v29 = vsub.f32 %v2001_v11, %v1035_v33 }
 0x1aa   :  { %v1616_v19 = vpack.i.bf16 %v1219_v41, %v1212_v23 }
 0x1ab   :  { %v1611_v25 = vpack.i.bf16 %v1037_v29, %v1030_v17 }
 0x1ac   :  { %v530_v3 = vpop.f32.mrf.mxu3  ;;  %1617 = vrot.lane.b32.xlu0 %v1616_v19, %s1696_s6 }
 0x1ad   :  { %1612 = vrot.lane.b32.xlu2 %v1611_v25, %s1695_s20 }
 0x1ae   :  { %1533 = vmatmul.msk.bf16.vlgmr.msra.gmra.mxu2 %vm124_vm1, %v2057_v14 }
 0x1af   :  { %v768_v18 = vpop.permute.xlu1 %767 }
 0x1b0   :  { %v770_v4 = vsub.f32 %v2005_v13, %v768_v18  ;;  %v761_v0 = vpop.permute.xlu0 %760  ;;  %v2246_v13 = vld [vmem:[%s2475_s1] ss:$0 sm:$0xff] }
 0x1b1   :  { %v763_v11 = vadd.f32 %v761_v0, %v757_v5  ;;  %v2249_v10 = vadd.f32 %v2246_v13, %v195_v63 }
 0x1b3   :  { %v771_v16 = vsel %vm120_vm3, %v763_v11, %v770_v4  ;;  %v198_v32 = vsel %vm124_vm1, %v2249_v10, -inf }
 0x1b4   :  { %v772_v52 = vpack.c.bf16 %v771_v16, %v771_v16 }
 0x1b5   :  { %1247 = vrot.lane.b32.xlu2 %v1164_v6, %s1696_s6 }
 0x1b6   :  { %1532 = vmatmul.msk.bf16.vlgmr.msra.gmra.mxu1 %vm124_vm1, %v772_v52 }
 0x1b7   :  { %1058 = vmatpush.bf16.xpose.msra.mxu1 %v2065_v22  ;;  %v1170_v46 = vpop.permute.xlu1 %1169 }
 0x1b8   :  { %v966_v54 = vpop.permute.xlu0 %965  ;;  %v1172_v51 = vadd.f32 %v1170_v46, %v1166_v42 }
 0x1b9   :  { %v971_v7 = vsel %vm124_vm1, %v966_v54, 0 }
 0x1ba   :  { %980 = vmatpush.bf16.xpose.msrb.mxu3 %v971_v7 }
 0x1c0   :  { %v963_v8 = vpop.permute.xlu0 %962 }
 0x1c1   :  { %1538 = vmatmul.msk.bf16.vlgmr.msrb.gmra.mxu3 %vm124_vm1, %v963_v8 }
 0x1c8   :  { %v1108_v55 = vpop.permute.xlu0 %1107 }
 0x1c9   :  { %v1113_v49 = vsel %vm124_vm1, %v1108_v55, 0 }
 0x1ca   :  { %1122 = vmatpush.bf16.xpose.msra.mxu3 %v1113_v49 }
 0x1ce   :  { %199 = vmax.xlane.f32.xlu1 %v198_v32 }
 0x1d6   :  { %v1598_v38 = vpop.permute.xlu2 %1597 }
 0x1d7   :  { %v1600_v40 = vunpack.i.h.bf16 %v1598_v38  ;;  %v1599_v45 = vunpack.i.l.bf16 %v1598_v38 }
 0x1d9   :  { %v943_v34 = vsel %vm120_vm3, %v1599_v45, %v1600_v40 }
 0x1da   :  { %v944_v36 = vpack.c.bf16 %v943_v34, %v943_v34 }
 0x1dc   :  { %v946_v62 = vsel %vm124_vm1, %v944_v36, 0 }
 0x1dd   :  { %955 = vmatpush.bf16.xpose.msrb.mxu2 %v946_v62 }
 0x1de   :  { %v1177_v28 = vpop.permute.xlu2 %1176 }
 0x1df   :  { %v1179_v59 = vsub.f32 %v1173_v21, %v1177_v28  ;;  %v2297_v28 = vld [vmem:[%s2475_s1 + $0x1] ss:$0 sm:$0xff]  ;;  %s1698_s1 = smov 88  }
 0x1e1   :  { %v1621_v44 = vpack.i.bf16 %v1179_v59, %v1172_v51 }
 0x1e3   :  { %1622 = vrot.lane.b32.xlu0 %v1621_v44, %s1696_s6 }
 0x1e4   :  { %1537 = vmatmul.msk.bf16.vlgmr.msrb.gmra.mxu2 %vm124_vm1, %v2057_v14 }
 0x1f6   :  { %v1608_v48 = vpop.permute.xlu2 %1607 }
 0x1f7   :  { %v1610_v2 = vunpack.i.h.bf16 %v1608_v48  ;;  %v1609_v47 = vunpack.i.l.bf16 %v1608_v48 }
 0x1f9   :  { %v1086_v1 = vsel %vm120_vm3, %v1609_v47, %v1610_v2 }
 0x1fa   :  { %v1087_v43 = vpack.c.bf16 %v1086_v1, %v1086_v1 }
 0x1fc   :  { %v1089_v30 = vsel %vm124_vm1, %v1087_v43, 0 }
 0x1fd   :  { %1098 = vmatpush.bf16.xpose.msra.mxu2 %v1089_v30 }
 0x200   :  { %v337_v53 = vpop.f32.mrf.mxu2 }
 0x202   :  { %v297_v24 = vpop.f32.mrf.mxu1 }
 0x203   :  { %v363_v57 = vadd.f32 %v2185_v20, %v297_v24 }
 0x204   :  { %1541 = vmatmul.msk.bf16.vlgmr.msra.gmra.mxu2 %vm124_vm1, %v2057_v14 }
 0x205   :  { %v366_v31 = vadd.f32 %v363_v57, %v337_v53 }
 0x206   :  { %v1603_v26 = vpop.permute.xlu1 %1602 }
 0x207   :  { %v1605_v61 = vunpack.i.h.bf16 %v1603_v26  ;;  %v1604_v3 = vunpack.i.l.bf16 %v1603_v26  ;;  %v2269_v60 = vadd.f32 %v2246_v13, %v366_v31  ;;  %v1613_v23 = vpop.permute.xlu2 %1612 }
 0x208   :  { %v339_v27 = vpop.f32.mrf.mxu2  ;;  %v1615_v17 = vunpack.i.h.bf16 %v1613_v23  ;;  %v1614_v29 = vunpack.i.l.bf16 %v1613_v23 }
 0x209   :  { %v903_v35 = vsel %vm120_vm3, %v1604_v3, %v1605_v61  ;;  %v368_v37 = vsel %vm124_vm1, %v2269_v60, -inf }
 0x20a   :  { %v904_v15 = vpack.c.bf16 %v903_v35, %v903_v35  ;;  %v299_v41 = vpop.f32.mrf.mxu1  ;;  %369 = vmax.xlane.f32.xlu2 %v368_v37  ;;  %v1046_v5 = vsel %vm120_vm3, %v1614_v29, %v1615_v17 }
 0x20b   :  { %v1047_v11 = vpack.c.bf16 %v1046_v5, %v1046_v5 }
 0x20c   :  { %1536 = vmatmul.msk.bf16.vlgmr.msrb.gmra.mxu1 %vm124_vm1, %v904_v15 }
 0x20d   :  { %1200 = vmatpush.bf16.xpose.msrb.mxu1 %v2065_v22 }
 0x20e   :  { %v1106_v20 = vpop.permute.xlu1 %1105 }
 0x20f   :  { %1542 = vmatmul.msk.bf16.vlgmr.msra.gmra.mxu3 %vm124_vm1, %v1106_v20 }
 0x210   :  { %v504_v58 = vpop.f32.mrf.mxu2 }
 0x212   :  { %v464_v19 = vpop.f32.mrf.mxu1 }
 0x213   :  { %v529_v25 = vadd.f32 %v2206_v50, %v464_v19  ;;  %v1248_v50 = vpop.permute.xlu2 %1247 }
 0x215   :  { %v532_v9 = vadd.f32 %v529_v25, %v504_v58 }
 0x216   :  { %v1250_v18 = vpop.permute.xlu1 %1249 }
 0x217   :  { %v1255_v4 = vsel %vm124_vm1, %v1250_v18, 0  ;;  %v2281_v0 = vadd.f32 %v2246_v13, %v532_v9 }
 0x218   :  { %v506_v33 = vpop.f32.mrf.mxu2  ;;  %1264 = vmatpush.bf16.xpose.msrb.mxu3 %v1255_v4 }
 0x219   :  { %v534_v6 = vsel %vm124_vm1, %v2281_v0, -inf }
 0x21a   :  { %v466_v16 = vpop.f32.mrf.mxu1  ;;  %535 = vmax.xlane.f32.xlu0 %v534_v6 }
 0x21b   :  { %v694_v52 = vpop.f32.mrf.mxu3 }
 0x21c   :  { %1540 = vmatmul.msk.bf16.vlgmr.msra.gmra.mxu1 %vm124_vm1, %v1047_v11 }
 0x21e   :  { %v1618_v54 = vpop.permute.xlu0 %1617 }
 0x21f   :  { %v1620_v7 = vunpack.i.h.bf16 %v1618_v54  ;;  %v1619_v8 = vunpack.i.l.bf16 %v1618_v54  ;;  %1546 = vmatmul.msk.bf16.vlgmr.msrb.gmra.mxu3 %vm124_vm1, %v1248_v50 }
 0x220   :  { %v670_v22 = vpop.f32.mrf.mxu2 }
 0x221   :  { %v1228_v32 = vsel %vm120_vm3, %v1619_v8, %v1620_v7 }
 0x222   :  { %212 = vrot.lane.b32.xlu2 %v210_v12, %s1697_s24  ;;  %v1229_v38 = vpack.c.bf16 %v1228_v32, %v1228_v32  ;;  %v630_v40 = vpop.f32.mrf.mxu1 }
 0x223   :  { %v696_v45 = vpop.f32.mrf.mxu3  ;;  %v695_v48 = vadd.f32 %v694_v52, %v630_v40 }
 0x224   :  { %v1231_v34 = vsel %vm124_vm1, %v1229_v38, 0 }
 0x225   :  { %1240 = vmatpush.bf16.xpose.msrb.mxu2 %v1231_v34 }
 0x228   :  { %v672_v63 = vpop.f32.mrf.mxu2 }
 0x22a   :  { %v632_v36 = vpop.f32.mrf.mxu1 }
 0x22b   :  { %v836_v46 = vpop.f32.mrf.mxu3 }
 0x22c   :  { %1545 = vmatmul.msk.bf16.vlgmr.msrb.gmra.mxu2 %vm124_vm1, %v2057_v14  ;;  %v698_v14 = vadd.f32 %v695_v48, %v670_v22 }
 0x22e   :  { %v699_v43 = vadd.f32 %v2246_v13, %v698_v14 }
 0x230   :  { %v700_v30 = vsel %vm124_vm1, %v699_v43, -inf }
 0x231   :  { %v817_v62 = vpop.f32.mrf.mxu2 }
 0x233   :  { %v785_v42 = vpop.f32.mrf.mxu1  ;;  %v838_v39 = vpop.f32.mrf.mxu3 }
 0x234   :  { %v837_v21 = vadd.f32 %v836_v46, %v785_v42 }
 0x236   :  { %v840_v51 = vadd.f32 %v837_v21, %v817_v62 }
 0x238   :  { %v842_v59 = vadd.f32 %v2297_v28, %v840_v51 }
 0x239   :  { %v819_v44 = vpop.f32.mrf.mxu2 }
 0x23a   :  { %v843_v55 = vsel %vm124_vm1, %v842_v59, -inf }
 0x23b   :  { %v787_v49 = vpop.f32.mrf.mxu1  ;;  %844 = vmax.xlane.f32.xlu0 %v843_v55 }
 0x241   :  { %v200_v2 = vpop.xlane.xlu1 %199 }
 0x242   :  { %v201_v47 = vsub.f32 %v2249_v10, %v200_v2 }
 0x244   :  { %v202_v53 = vmul.f32 1.442695, %v201_v47  ;;  %v982_v1 = vpop.f32.mrf.mxu3 }
 0x246   :  { %1642 = vpow2.f32 %v202_v53 }
 0x24b   :  { %701 = vmax.xlane.f32.xlu2 %v700_v30 }
 0x24c   :  { %v2304_v27 = vpop.eup %1642  ;;  %v984_v24 = vpop.f32.mrf.mxu3 }
 0x24d   :  { %v204_v57 = vsel %vm124_vm1, %v2304_v27, 0.0 }
 0x24e   :  { %205 = vadd.xlane.f32.xlu1 %v204_v57 }
 0x24f   :  { %380 = vrot.lane.b32.xlu0 %v210_v12, %s1698_s1 }
 0x255   :  { %v1623_v31 = vpop.permute.xlu0 %1622 }
 0x256   :  { %v1625_v26 = vunpack.i.h.bf16 %v1623_v31  ;;  %v1624_v61 = vunpack.i.l.bf16 %v1623_v31  ;;  %v855_v31 = vpack.c.bf16 %v1957_v56, %v1957_v56 }
 0x258   :  { %v1188_v10 = vsel %vm120_vm3, %v1624_v61, %v1625_v26 }
 0x259   :  { %v1189_v3 = vpack.c.bf16 %v1188_v10, %v1188_v10 }
 0x25b   :  { %1544 = vmatmul.msk.bf16.vlgmr.msrb.gmra.mxu1 %vm124_vm1, %v1189_v3 }
 0x263   :  { %546 = vrot.lane.b32.xlu2 %v210_v12, %s1699_s25 }
 0x267   :  { %v957_v13 = vpop.f32.mrf.mxu2 }
 0x26b   :  { %712 = vrot.lane.b32.xlu2 %v210_v12, %s1700_s5 }
 0x26f   :  { %v959_v58 = vpop.f32.mrf.mxu2 }
 0x27d   :  { %v370_v35 = vpop.xlane.xlu2 %369 }
 0x27e   :  { %v371_v48 = vsub.f32 %v2269_v60, %v370_v35 }
 0x280   :  { %v372_v47 = vmul.f32 1.442695, %v371_v48 }
 0x285   :  { %v213_v37 = vpop.permute.xlu2 %212 }
 0x286   :  { %v219_v15 = vsel %vm217_vm4, %v213_v37, 0 }
 0x287   :  { %228 = vmatpush.bf16.msrb.mxu0 %v219_v15  ;;  %v1100_v41 = vpop.f32.mrf.mxu2 }
 0x289   :  { %v917_v20 = vpop.f32.mrf.mxu1 }
 0x28a   :  { %v983_v23 = vadd.f32 %v982_v1, %v917_v20 }
 0x28c   :  { %v986_v33 = vadd.f32 %v983_v23, %v957_v13 }
 0x28d   :  { %v536_v50 = vpop.xlane.xlu0 %535 }
 0x28e   :  { %v2315_v17 = vadd.f32 %v2297_v28, %v986_v33 }
 0x28f   :  { %v1102_v19 = vpop.f32.mrf.mxu2 }
 0x290   :  { %v988_v29 = vsel %vm124_vm1, %v2315_v17, -inf }
 0x291   :  { %v919_v25 = vpop.f32.mrf.mxu1  ;;  %989 = vmax.xlane.f32.xlu1 %v988_v29 }
 0x292   :  { %v1124_v9 = vpop.f32.mrf.mxu3 }
 0x299   :  { %v1060_v18 = vpop.f32.mrf.mxu1 }
 0x29a   :  { %v1125_v5 = vadd.f32 %v1124_v9, %v1060_v18  ;;  %v1126_v4 = vpop.f32.mrf.mxu3 }
 0x29c   :  { %v1128_v22 = vadd.f32 %v1125_v5, %v1100_v41 }
 0x29e   :  { %v1129_v11 = vadd.f32 %v2297_v28, %v1128_v22 }
 0x2a0   :  { %v1130_v6 = vsel %vm124_vm1, %v1129_v11, -inf }
 0x2a1   :  { %v1062_v16 = vpop.f32.mrf.mxu1  ;;  %1131 = vmax.xlane.f32.xlu1 %v1130_v6 }
 0x2a2   :  { %v1266_v52 = vpop.f32.mrf.mxu3 }
 0x2aa   :  { %v1268_v54 = vpop.f32.mrf.mxu3 }
 0x2ae   :  { %v845_v7 = vpop.xlane.xlu0 %844 }
 0x2af   :  { %v846_v8 = vsub.f32 %v842_v59, %v845_v7  ;;  %v1242_v12 = vpop.f32.mrf.mxu2 }
 0x2b1   :  { %v847_v63 = vmul.f32 1.442695, %v846_v8 }
 0x2b3   :  { %1644 = vpow2.f32 %v847_v63 }
 0x2b7   :  { %v1244_v32 = vpop.f32.mrf.mxu2 }
 0x2b9   :  { %v2321_v38 = vpop.eup %1644 }
 0x2ba   :  { %v849_v40 = vsel %vm124_vm1, %v2321_v38, 0.0 }
 0x2bb   :  { %850 = vadd.xlane.f32.xlu2 %v849_v40 }
 0x2be   :  { %v702_v45 = vpop.xlane.xlu2 %701 }
 0x2bf   :  { %v703_v34 = vsub.f32 %v699_v43, %v702_v45  ;;  %v537_v43 = vsub.f32 %v2281_v0, %v536_v50 }
 0x2c1   :  { %v704_v36 = vmul.f32 1.442695, %v703_v34  ;;  %v381_v46 = vpop.permute.xlu0 %380  ;;  %v206_v62 = vpop.xlane.xlu1 %205  ;;  %v538_v24 = vmul.f32 1.442695, %v537_v43 }
 0x2c2   :  { %v386_v42 = vsel %vm217_vm4, %v381_v46, 0  ;;  %1646 = vrcp.f32 %v206_v62 }
 0x2c3   :  { %1648 = vpow2.f32 %v704_v36  ;;  %395 = vmatpush.bf16.msra.mxu0 %v386_v42 }
 0x2c4   :  { %1650 = vpow2.f32 %v372_v47 }
 0x2c5   :  { %1652 = vpow2.f32 %v538_v24 }
 0x2c6   :  { %v547_v59 = vpop.permute.xlu2 %546 }
 0x2c7   :  { %v552_v49 = vsel %vm217_vm4, %v547_v59, 0 }
 0x2c8   :  { %v1647_v39 = vpop.eup %1646 }
 0x2c9   :  { %v2326_v21 = vpop.eup %1648  ;;  %v208_v51 = vmul.f32 %v1647_v39, %v2304_v27 }
 0x2ca   :  { %v706_v44 = vsel %vm124_vm1, %v2326_v21, 0.0  ;;  %v1651_v57 = vpop.eup %1650 }
 0x2cb   :  { %707 = vadd.xlane.f32.xlu0 %v706_v44  ;;  %v209_v55 = vpack.c.bf16 %v208_v51, %v208_v51  ;;  %v374_v60 = vsel %vm124_vm1, %v1651_v57, 0.0  ;;  %v1653_v26 = vpop.eup %1652 }
 0x2cd   :  { %1519 = vmatmul.msk.bf16.vlgmr.msrb.gmra.mxu0 %vm124_vm1, %v209_v55 }
 0x2ce   :  { %561 = vmatpush.bf16.msrb.mxu0 %v552_v49  ;;  %v713_v5 = vpop.permute.xlu2 %712 }
 0x2d8   :  { %v1202_v2 = vpop.f32.mrf.mxu1 }
 0x2d9   :  { %v1267_v14 = vadd.f32 %v1266_v52, %v1202_v2 }
 0x2db   :  { %v1270_v53 = vadd.f32 %v1267_v14, %v1242_v12 }
 0x2dd   :  { %v1271_v1 = vadd.f32 %v2297_v28, %v1270_v53  ;;  %v540_v28 = vsel %vm124_vm1, %v1653_v26, 0.0 }
 0x2df   :  { %v1272_v30 = vsel %vm124_vm1, %v1271_v1, -inf  ;;  %1000 = vrot.lane.b32.xlu0 %v855_v31, %s1698_s1 }
 0x2e0   :  { %v1204_v27 = vpop.f32.mrf.mxu1  ;;  %1273 = vmax.xlane.f32.xlu1 %v1272_v30 }
 0x2e8   :  { %375 = vadd.xlane.f32.xlu1 %v374_v60 }
 0x2f0   :  { %541 = vadd.xlane.f32.xlu1 %v540_v28 }
 0x304   :  { %v990_v0 = vpop.xlane.xlu1 %989 }
 0x305   :  { %v991_v13 = vsub.f32 %v2315_v17, %v990_v0 }
 0x307   :  { %v992_v56 = vmul.f32 1.442695, %v991_v13 }
 0x309   :  { %857 = vrot.lane.b32.xlu1 %v855_v31, %s1697_s24 }
 0x314   :  { %v1132_v61 = vpop.xlane.xlu1 %1131 }
 0x315   :  { %v1133_v10 = vsub.f32 %v1129_v11, %v1132_v61  ;;  %v718_v11 = vsel %vm217_vm4, %v713_v5, 0  ;;  %v1685_v5 = vld [vmem:[%s2471_s0 + $0x8] sm:$0xff] }
 0x317   :  { %v1134_v3 = vmul.f32 1.442695, %v1133_v10 }
 0x319   :  { %1654 = vpow2.f32 %v1134_v3 }
 0x31a   :  { %1656 = vpow2.f32 %v992_v56 }
 0x31f   :  { %v2344_v58 = vpop.eup %1654 }
 0x320   :  { %v1136_v35 = vsel %vm124_vm1, %v2344_v58, 0.0  ;;  %v1657_v37 = vpop.eup %1656 }
 0x321   :  { %1137 = vadd.xlane.f32.xlu2 %v1136_v35  ;;  %v994_v15 = vsel %vm124_vm1, %v1657_v37, 0.0 }
 0x32e   :  { %v851_v32 = vpop.xlane.xlu2 %850 }
 0x333   :  { %995 = vadd.xlane.f32.xlu1 %v994_v15 }
 0x339   :  { %1142 = vrot.lane.b32.xlu2 %v855_v31, %s1699_s25 }
 0x33e   :  { %v708_v52 = vpop.xlane.xlu0 %707 }
 0x34a   :  { %v2351_v41 = vpop.f32.mrf.mxu0 }
 0x34c   :  { %1284 = vrot.lane.b32.xlu1 %v855_v31, %s1700_s5 }
 0x351   :  { %v1001_v63 = vpop.permute.xlu0 %1000 }
 0x352   :  { %v232_v17 = vpop.f32.mrf.mxu0  ;;  %v1006_v45 = vsel %vm217_vm4, %v1001_v63, 0 }
 0x353   :  { %v1274_v20 = vpop.xlane.xlu1 %1273 }
 0x354   :  { %v1275_v23 = vsub.f32 %v1271_v1, %v1274_v20 }
 0x356   :  { %v1276_v33 = vmul.f32 1.442695, %v1275_v23  ;;  %v1684_v23 = vld [vmem:[%s2471_s0] sm:$0xff] }
 0x358   :  { %1658 = vpow2.f32 %v1276_v33 }
 0x35b   :  { %v376_v29 = vpop.xlane.xlu1 %375 }
 0x35c   :  { %1660 = vrcp.f32 %v376_v29 }
 0x35e   :  { %v1659_v19 = vpop.eup %1658 }
 0x35f   :  { %v1278_v25 = vsel %vm124_vm1, %v1659_v19, 0.0 }
 0x360   :  { %1279 = vadd.xlane.f32.xlu0 %v1278_v25 }
 0x362   :  { %v1661_v9 = vpop.eup %1660 }
 0x363   :  { %v378_v18 = vmul.f32 %v1661_v9, %v1651_v57  ;;  %v542_v22 = vpop.xlane.xlu1 %541 }
 0x364   :  { %1662 = vrcp.f32 %v542_v22 }
 0x365   :  { %v379_v4 = vpack.c.bf16 %v378_v18, %v378_v18  ;;  %1664 = vrcp.f32 %v708_v52 }
 0x366   :  { %1666 = vrcp.f32 %v851_v32 }
 0x367   :  { %1523 = vmatmul.msk.bf16.vlgmr.msra.gmra.mxu0 %vm124_vm1, %v379_v4 }
 0x368   :  { %727 = vmatpush.bf16.msra.mxu0 %v718_v11  ;;  %v1701_v11 = vmov 32.0  }
 0x36a   :  { %v1663_v6 = vpop.eup %1662 }
 0x36b   :  { %v544_v16 = vmul.f32 %v1663_v6, %v1653_v26  ;;  %v1665_v8 = vpop.eup %1664 }
 0x36c   :  { %v710_v12 = vmul.f32 %v1665_v8, %v2326_v21  ;;  %v1667_v34 = vpop.eup %1666 }
 0x36d   :  { %v545_v50 = vpack.c.bf16 %v544_v16, %v544_v16  ;;  %v853_v36 = vmul.f32 %v1667_v34, %v2321_v38 }
 0x36e   :  { %v711_v40 = vpack.c.bf16 %v710_v12, %v710_v12 }
 0x36f   :  { %v854_v46 = vpack.c.bf16 %v853_v36, %v853_v36 }
 0x377   :  { %1527 = vmatmul.msk.bf16.vlgmr.msrb.gmra.mxu0 %vm124_vm1, %v545_v50 }
 0x37b   :  { %v858_v54 = vpop.permute.xlu1 %857 }
 0x37c   :  { %v863_v7 = vsel %vm217_vm4, %v858_v54, 0 }
 0x37d   :  { %872 = vmatpush.bf16.msrb.mxu0 %v863_v7 }
 0x387   :  { %1531 = vmatmul.msk.bf16.vlgmr.msra.gmra.mxu0 %vm124_vm1, %v711_v40 }
 0x388   :  { %1015 = vmatpush.bf16.msra.mxu0 %v1006_v45 }
 0x394   :  { %v1138_v62 = vpop.xlane.xlu2 %1137 }
 0x397   :  { %1535 = vmatmul.msk.bf16.vlgmr.msrb.gmra.mxu0 %vm124_vm1, %v854_v46 }
 0x39c   :  { %v1143_v42 = vpop.permute.xlu2 %1142 }
 0x39d   :  { %v1148_v39 = vsel %vm217_vm4, %v1143_v42, 0 }
 0x39e   :  { %1157 = vmatpush.bf16.msrb.mxu0 %v1148_v39 }
 0x3a6   :  { %v996_v21 = vpop.xlane.xlu1 %995 }
 0x3a7   :  { %1668 = vrcp.f32 %v996_v21 }
 0x3a8   :  { %1670 = vrcp.f32 %v1138_v62 }
 0x3ad   :  { %v1669_v51 = vpop.eup %1668 }
 0x3ae   :  { %v998_v59 = vmul.f32 %v1669_v51, %v1657_v37  ;;  %v1671_v55 = vpop.eup %1670  ;;  %v1387_v51 = vld [vmem:[%s2479_s10 + $0x10] sm:$0xff] }
 0x3af   :  { %v1140_v49 = vmul.f32 %v1671_v55, %v2344_v58 }
 0x3b0   :  { %v999_v44 = vpack.c.bf16 %v998_v59, %v998_v59  ;;  %v1388_v59 = vld [vmem:[%s2479_s10 + $0x18] sm:$0xff] }
 0x3b1   :  { %v1141_v2 = vpack.c.bf16 %v1140_v49, %v1140_v49  ;;  %v1391_v55 = vpack.c.bf16 %v1388_v59, %v1387_v51  ;;  %v1385_v49 = vld [vmem:[%s2479_s10] sm:$0xff] }
 0x3b2   :  { %1539 = vmatmul.msk.bf16.vlgmr.msra.gmra.mxu0 %vm124_vm1, %v999_v44 }
 0x3b3   :  { %1405 = vmatpush.bf16.msra.mxu1 %v1391_v55 }
 0x3be   :  { %v1285_v38 = vpop.permute.xlu1 %1284 }
 0x3bf   :  { %v1290_v48 = vsel %vm217_vm4, %v1285_v38, 0  ;;  %v1386_v38 = vld [vmem:[%s2479_s10 + $0x8] sm:$0xff] }
 0x3c0   :  { %1299 = vmatpush.bf16.msra.mxu0 %v1290_v48 }
 0x3c2   :  { %1543 = vmatmul.msk.bf16.vlgmr.msrb.gmra.mxu0 %vm124_vm1, %v1141_v2  ;;  %v1390_v2 = vpack.c.bf16 %v1386_v38, %v1385_v49 }
 0x3c4   :  { %1406 = vmatpush.bf16.msra.mxu1 %v1390_v2 }
 0x3d3   :  { %v1280_v14 = vpop.xlane.xlu0 %1279 }
 0x3d4   :  { %1672 = vrcp.f32 %v1280_v14  ;;  %v1421_v14 = vld [vmem:[%s2480_s12 + $0x30] sm:$0xff] }
 0x3d5   :  { %1674 = vrcp.f32 %v1701_v11 }
 0x3da   :  { %v1673_v47 = vpop.eup %1672 }
 0x3db   :  { %v1282_v53 = vmul.f32 %v1673_v47, %v1659_v19  ;;  %v1675_v6 = vpop.eup %1674  ;;  %v1422_v47 = vld [vmem:[%s2480_s12 + $0x38] sm:$0xff] }
 0x3dc   :  { %v1331_v16 = vmul.f32 32.0, %v1675_v6  ;;  %vm1335_vm7 = vweird.f32 %v1675_v6 }
 0x3dd   :  { %v1283_v1 = vpack.c.bf16 %v1282_v53, %v1282_v53 }
 0x3de   :  { %v1332_v52 = vsub.f32 1.0, %v1331_v16 }
 0x3df   :  { %1547 = vmatmul.msk.bf16.vlgmr.msra.gmra.mxu0 %vm124_vm1, %v1283_v1 }
 0x3e0   :  { %v1333_v50 = vmul.f32 %v1675_v6, %v1332_v52 }
 0x3e2   :  { %v1334_v54 = vadd.f32 %v1675_v6, %v1333_v50 }
 0x3e4   :  { %v397_v43 = vpop.f32.mrf.mxu0  ;;  %v2388_v7 = vsel %vm1335_vm7, %v1675_v6, %v1334_v54  ;;  %v1638_v6 = vld [vmem:[%s2478_s11] ss:$0 sm:$0xff] }
 0x3e5   :  { %734 = vrot.lane.b32.xlu2 %v397_v43, %s1687_s29  ;;  %v1427_v43 = vpack.c.bf16 %v1422_v47, %v1421_v14 }
 0x3e7   :  { %1435 = vmatpush.bf16.msra.mxu2 %v1427_v43 }
 0x3ec   :  { %v399_v30 = vpop.f32.mrf.mxu0 }
 0x3f4   :  { %v563_v27 = vpop.f32.mrf.mxu0 }
 0x3f5   :  { %738 = vrot.lane.b32.xlu2 %v563_v27, %s1688_s21 }
 0x3fc   :  { %v565_v24 = vpop.f32.mrf.mxu0 }
 0x404   :  { %v729_v57 = vpop.f32.mrf.mxu0 }
 0x405   :  { %742 = vrot.lane.b32.xlu1 %v729_v57, %s1692_s17 }
 0x40c   :  { %v731_v31 = vpop.f32.mrf.mxu0 }
 0x414   :  { %v874_v60 = vpop.f32.mrf.mxu0 }
 0x41c   :  { %v876_v26 = vpop.f32.mrf.mxu0 }
 0x42f   :  { %v1017_v28 = vpop.f32.mrf.mxu0 }
 0x430   :  { %1306 = vrot.lane.b32.xlu2 %v1017_v28, %s1687_s29 }
 0x437   :  { %v1019_v0 = vpop.f32.mrf.mxu0 }
 0x43f   :  { %v1159_v61 = vpop.f32.mrf.mxu0  ;;  %v735_v56 = vpop.permute.xlu2 %734 }
 0x440   :  { %1310 = vrot.lane.b32.xlu0 %v1159_v61, %s1688_s21  ;;  %v745_v35 = vsel %vm124_vm1, %v2351_v41, %v735_v56 }
 0x447   :  { %v1161_v10 = vpop.f32.mrf.mxu0 }
 0x44f   :  { %v739_v58 = vpop.permute.xlu2 %738 }
 0x450   :  { %v747_v37 = vsel %vm746_vm5, %v745_v35, %v739_v58  ;;  %v1637_v35 = vld [vmem:[%s2477_s9] ss:$0 sm:$0xff] }
 0x45c   :  { %v1301_v3 = vpop.f32.mrf.mxu0 }
 0x45d   :  { %1314 = vrot.lane.b32.xlu2 %v1301_v3, %s1692_s17  ;;  %v1636_v3 = vld [vmem:[%s2476_s8] ss:$0 sm:$0xff] }
 0x464   :  { %v1303_v13 = vpop.f32.mrf.mxu0 }
 0x477   :  { %v743_v15 = vpop.permute.xlu1 %742 }
 0x478   :  { %v749_v20 = vsel %vm748_vm6, %v747_v37, %v743_v15 }
 0x479   :  { %v1320_v33 = vadd.f32 %v1684_v23, %v749_v20 }
 0x47b   :  { %v1324_v17 = vsel %vm63_vm0, %v1320_v33, 0.0 }
 0x47c   :  { %1325 = vadd.xlane.f32.xlu1 %v1324_v17 }
 0x48a   :  { %v1307_v29 = vpop.permute.xlu2 %1306 }
 0x48b   :  { %v1317_v25 = vsel %vm124_vm1, %v874_v60, %v1307_v29  ;;  %v1419_v29 = vld [vmem:[%s2480_s12 + $0x20] sm:$0xff] }
 0x4b2   :  { %v1311_v19 = vpop.permute.xlu0 %1310 }
 0x4b3   :  { %v1318_v9 = vsel %vm746_vm5, %v1317_v25, %v1311_v19  ;;  %v1420_v19 = vld [vmem:[%s2480_s12 + $0x28] sm:$0xff]  ;;  %v1417_v25 = vld [vmem:[%s2480_s12 + $0x10] sm:$0xff] }
 0x4b7   :  { %v1315_v18 = vpop.permute.xlu2 %1314 }
 0x4b8   :  { %v1319_v41 = vsel %vm748_vm6, %v1318_v9, %v1315_v18  ;;  %v1426_v9 = vpack.c.bf16 %v1420_v19, %v1419_v29  ;;  %v1418_v18 = vld [vmem:[%s2480_s12 + $0x18] sm:$0xff] }
 0x4b9   :  { %v1321_v4 = vadd.f32 %v1685_v5, %v1319_v41  ;;  %v1425_v41 = vpack.c.bf16 %v1418_v18, %v1417_v25  ;;  %v1415_v5 = vld [vmem:[%s2480_s12] sm:$0xff] }
 0x4ba   :  { %1436 = vmatpush.bf16.msra.mxu2 %v1426_v9 }
 0x4bb   :  { %v1327_v22 = vsel %vm63_vm0, %v1321_v4, 0.0 }
 0x4bc   :  { %1328 = vadd.xlane.f32.xlu2 %v1327_v22 }
 0x4be   :  { %1437 = vmatpush.bf16.msra.mxu2 %v1425_v41 }
 0x4ef   :  { %v1326_v8 = vpop.xlane.xlu1 %1325 }
 0x4f0   :  { %v1337_v12 = vmul.f32 %v2388_v7, %v1326_v8 }
 0x4f2   :  { %v1339_v63 = vsub.f32 %v1320_v33, %v1337_v12 }
 0x4f4   :  { %v1341_v32 = vmul.f32 %v1339_v63, %v1339_v63 }
 0x4f6   :  { %v1343_v40 = vsel %vm63_vm0, %v1341_v32, 0.0 }
 0x4f7   :  { %1344 = vadd.xlane.f32.xlu0 %v1343_v40 }
 0x52f   :  { %v1329_v45 = vpop.xlane.xlu2 %1328 }
 0x530   :  { %v1338_v34 = vmul.f32 %v2388_v7, %v1329_v45 }
 0x532   :  { %v1340_v36 = vsub.f32 %v1321_v4, %v1338_v34  ;;  %v1416_v4 = vld [vmem:[%s2480_s12 + $0x8] sm:$0xff] }
 0x533   :  { %v1424_v22 = vpack.c.bf16 %v1416_v4, %v1415_v5 }
 0x534   :  { %v1342_v46 = vmul.f32 %v1340_v36, %v1340_v36 }
 0x535   :  { %1438 = vmatpush.bf16.msra.mxu2 %v1424_v22 }
 0x536   :  { %v1346_v62 = vsel %vm63_vm0, %v1342_v46, 0.0 }
 0x537   :  { %1347 = vadd.xlane.f32.xlu1 %v1346_v62 }
 0x56a   :  { %v1345_v42 = vpop.xlane.xlu0 %1344 }
 0x56b   :  { %v1349_v39 = vmul.f32 %v1345_v42, %v2388_v7 }
 0x56d   :  { %v1351_v21 = vadd.f32 1e-05, %v1349_v39 }
 0x56f   :  { %1676 = vrsqrt.f32 %v1351_v21  ;;  %vm1359_vm9 = vweird.f32 %v1351_v21 }
 0x575   :  { %v1677_v44 = vpop.eup %1676 }
 0x576   :  { %v1354_v48 = vmul.f32 %v1677_v44, %v1351_v21  ;;  %vm1360_vm8 = vweird.f32 %v1677_v44 }
 0x577   :  { %vm1361_vm10 = vmor %vm1359_vm9, %vm1360_vm8 }
 0x578   :  { %v1355_v53 = vmul.f32 %v1677_v44, %v1354_v48 }
 0x57a   :  { %v1356_v24 = vmul.f32 0.5, %v1355_v53 }
 0x57c   :  { %v1357_v57 = vsub.f32 1.5, %v1356_v24 }
 0x57e   :  { %v1358_v60 = vmul.f32 %v1677_v44, %v1357_v57 }
 0x580   :  { %v1362_v0 = vsel %vm1361_vm10, %v1677_v44, %v1358_v60 }
 0x581   :  { %v1373_v13 = vmul.f32 %v1362_v0, %v1339_v63  ;;  %v1639_v63 = vld [vmem:[%s2481_s13] ss:$0 sm:$0xff] }
 0x583   :  { %v1378_v37 = vmul.f32 %v1636_v3, %v1373_v13 }
 0x585   :  { %v1383_v23 = vadd.f32 %v1637_v35, %v1378_v37 }
 0x5aa   :  { %v1348_v1 = vpop.xlane.xlu1 %1347 }
 0x5ab   :  { %v1350_v30 = vmul.f32 %v1348_v1, %v2388_v7 }
 0x5ad   :  { %v1352_v27 = vadd.f32 1e-05, %v1350_v30 }
 0x5af   :  { %1678 = vrsqrt.f32 %v1352_v27  ;;  %vm1369_vm12 = vweird.f32 %v1352_v27 }
 0x5b5   :  { %v1679_v31 = vpop.eup %1678 }
 0x5b6   :  { %v1364_v26 = vmul.f32 %v1679_v31, %v1352_v27  ;;  %vm1370_vm11 = vweird.f32 %v1679_v31 }
 0x5b7   :  { %vm1371_vm13 = vmor %vm1369_vm12, %vm1370_vm11 }
 0x5b8   :  { %v1365_v28 = vmul.f32 %v1679_v31, %v1364_v26 }
 0x5ba   :  { %v1366_v61 = vmul.f32 0.5, %v1365_v28 }
 0x5bc   :  { %v1367_v10 = vsub.f32 1.5, %v1366_v61  ;;  %v1640_v61 = vld [vmem:[%s2482_s14] ss:$0 sm:$0xff] }
 0x5be   :  { %v1368_v56 = vmul.f32 %v1679_v31, %v1367_v10 }
 0x5c0   :  { %v1372_v58 = vsel %vm1371_vm13, %v1679_v31, %v1368_v56 }
 0x5c1   :  { %v1374_v15 = vmul.f32 %v1372_v58, %v1340_v36 }
 0x5c3   :  { %v1379_v20 = vmul.f32 %v1636_v3, %v1374_v15 }
 0x5c5   :  { %v1384_v33 = vadd.f32 %v1637_v35, %v1379_v20 }
 0x5c7   :  { %v1389_v17 = vpack.c.bf16 %v1384_v33, %v1383_v23 }
 0x5c9   :  { %1548 = vmatmul.msk.bf16.vlgmr.msra.gmra.mxu1 %vm63_vm0, %v1389_v17 }
 0x646   :  { %v1408_v11 = vpop.f32.mrf.mxu1 }
 0x647   :  { %v1409_v16 = vadd.f32 %v1638_v6, %v1408_v11 }
 0x649   :  { %v1413_v54 = vmax.f32 %v1409_v16, 0.0 }
 0x64e   :  { %v1410_v52 = vpop.f32.mrf.mxu1 }
 0x64f   :  { %v1411_v50 = vadd.f32 %v1638_v6, %v1410_v52 }
 0x651   :  { %v1414_v8 = vmax.f32 %v1411_v50, 0.0 }
 0x653   :  { %v1423_v12 = vpack.c.bf16 %v1414_v8, %v1413_v54 }
 0x655   :  { %1549 = vmatmul.msk.bf16.vlgmr.msra.gmra.mxu2 %vm81_vm2, %v1423_v12 }
 0x6d8   :  { %v1440_v32 = vpop.f32.mrf.mxu2 }
 0x6d9   :  { %v1445_v40 = vadd.f32 %v1440_v32, %v1383_v23 }
 0x6db   :  { %v1451_v45 = vadd.f32 %v1639_v63, %v1445_v40 }
 0x6dd   :  { %v1455_v34 = vsel %vm63_vm0, %v1451_v45, 0.0 }
 0x6de   :  { %1456 = vadd.xlane.f32.xlu2 %v1455_v34 }
 0x6e0   :  { %v1442_v36 = vpop.f32.mrf.mxu2 }
 0x6e1   :  { %v1446_v46 = vadd.f32 %v1442_v36, %v1384_v33 }
 0x6e3   :  { %v1452_v62 = vadd.f32 %v1639_v63, %v1446_v46 }
 0x6e5   :  { %v1458_v42 = vsel %vm63_vm0, %v1452_v62, 0.0 }
 0x6e6   :  { %1459 = vadd.xlane.f32.xlu1 %v1458_v42 }
 0x751   :  { %v1457_v39 = vpop.xlane.xlu2 %1456 }
 0x752   :  { %v1461_v21 = vmul.f32 %v1457_v39, %v2388_v7 }
 0x754   :  { %v1463_v51 = vsub.f32 %v1451_v45, %v1461_v21 }
 0x756   :  { %v1465_v59 = vmul.f32 %v1463_v51, %v1463_v51 }
 0x758   :  { %v1467_v44 = vsel %vm63_vm0, %v1465_v59, 0.0 }
 0x759   :  { %1468 = vadd.xlane.f32.xlu2 %v1467_v44  ;;  %v1460_v55 = vpop.xlane.xlu1 %1459 }
 0x75a   :  { %v1462_v49 = vmul.f32 %v1460_v55, %v2388_v7 }
 0x75c   :  { %v1464_v38 = vsub.f32 %v1452_v62, %v1462_v49 }
 0x75e   :  { %v1466_v48 = vmul.f32 %v1464_v38, %v1464_v38 }
 0x760   :  { %v1470_v2 = vsel %vm63_vm0, %v1466_v48, 0.0 }
 0x761   :  { %1471 = vadd.xlane.f32.xlu0 %v1470_v2 }
 0x7cc   :  { %v1469_v14 = vpop.xlane.xlu2 %1468 }
 0x7cd   :  { %v1473_v47 = vmul.f32 %v1469_v14, %v2388_v7 }
 0x7cf   :  { %v1475_v53 = vadd.f32 1e-05, %v1473_v47 }
 0x7d1   :  { %1680 = vrsqrt.f32 %v1475_v53  ;;  %vm1483_vm15 = vweird.f32 %v1475_v53 }
 0x7d4   :  { %v1472_v1 = vpop.xlane.xlu0 %1471 }
 0x7d5   :  { %v1474_v43 = vmul.f32 %v1472_v1, %v2388_v7  ;;  %v1641_v7 = vld [vmem:[%s2483_s15] ss:$0 sm:$0xff] }
 0x7d7   :  { %v1681_v30 = vpop.eup %1680  ;;  %v1476_v27 = vadd.f32 1e-05, %v1474_v43 }
 0x7d8   :  { %v1478_v24 = vmul.f32 %v1681_v30, %v1475_v53  ;;  %vm1484_vm14 = vweird.f32 %v1681_v30 }
 0x7d9   :  { %1682 = vrsqrt.f32 %v1476_v27  ;;  %vm1485_vm1 = vmor %vm1483_vm15, %vm1484_vm14  ;;  %vm1493_vm3 = vweird.f32 %v1476_v27 }
 0x7da   :  { %v1479_v57 = vmul.f32 %v1681_v30, %v1478_v24 }
 0x7dc   :  { %v1480_v31 = vmul.f32 0.5, %v1479_v57 }
 0x7de   :  { %v1481_v60 = vsub.f32 1.5, %v1480_v31 }
 0x7df   :  { %v1683_v26 = vpop.eup %1682 }
 0x7e0   :  { %v1482_v28 = vmul.f32 %v1681_v30, %v1481_v60  ;;  %v1488_v0 = vmul.f32 %v1683_v26, %v1476_v27  ;;  %vm1494_vm2 = vweird.f32 %v1683_v26 }
 0x7e1   :  { %vm1495_vm4 = vmor %vm1493_vm3, %vm1494_vm2 }
 0x7e2   :  { %v1486_v10 = vsel %vm1485_vm1, %v1681_v30, %v1482_v28  ;;  %v1489_v3 = vmul.f32 %v1683_v26, %v1488_v0 }
 0x7e3   :  { %v1497_v13 = vmul.f32 %v1486_v10, %v1463_v51 }
 0x7e4   :  { %v1490_v56 = vmul.f32 0.5, %v1489_v3 }
 0x7e5   :  { %v1502_v58 = vmul.f32 %v1640_v61, %v1497_v13 }
 0x7e6   :  { %v1491_v35 = vsub.f32 1.5, %v1490_v56 }
 0x7e7   :  { %v1507_v37 = vadd.f32 %v1641_v7, %v1502_v58 }
 0x7e8   :  { %v1492_v15 = vmul.f32 %v1683_v26, %v1491_v35 }
 0x7e9   :  { %1509 = vst.msk [vmem:[%s2484_s16] sm:$0xff] %vm63_vm0, %v1507_v37 }
 0x7ea   :  { %v1496_v20 = vsel %vm1495_vm4, %v1683_v26, %v1492_v15 }
 0x7eb   :  { %v1498_v23 = vmul.f32 %v1496_v20, %v1464_v38 }
 0x7ed   :  { %v1503_v33 = vmul.f32 %v1640_v61, %v1498_v23 }
 0x7ef   :  { %v1508_v17 = vadd.f32 %v1641_v7, %v1503_v33 }
 0x7f1   :  { %1510 = vst.msk [vmem:[%s2484_s16 + $0x8] sm:$0xff] %vm63_vm0, %v1508_v17 }

// kernel: tener_forward.7
= control target key start
LH: loop header
LB: loop body
LE: loop exit
PB: predicated region body
PF: predicated region fallthrough
CT: control target
= control target key end

     0   :  { %s1188_s0 = inlined_call_operand.vmem [shape: f32[16,32], index: 0, kind: input, shape index: {}]   ;;  %s1189_s1 = inlined_call_operand.vmem [shape: f32[2,8], index: 1, kind: input, shape index: {}]   ;;  %s1190_s2 = inlined_call_operand.vmem [shape: f32[16,1], index: 2, kind: input, shape index: {}]   ;;  %s1191_s3 = inlined_call_operand.vmem [shape: f32[16,8], index: 3, kind: input, shape index: {}]   ;;  %s1192_s4 = inlined_call_operand.vmem [shape: f32[16,8], index: 4, kind: input, shape index: {}]   ;;  %s1193_s5 = inlined_call_operand.vmem [shape: f32[32,8], index: 5, kind: input, shape index: {}]   ;;  %s1194_s6 = inlined_call_operand.vmem [shape: f32[32,8], index: 6, kind: input, shape index: {}]   ;;  %s1195_s7 = inlined_call_operand.vmem [shape: f32[32,8], index: 7, kind: input, shape index: {}]   ;;  %s1196_s8 = inlined_call_operand.vmem [shape: f32[32,8], index: 8, kind: input, shape index: {}]   ;;  %s1197_s9 = inlined_call_operand.vmem [shape: f32[1,8], index: 9, kind: input, shape index: {}]   ;;  %s1198_s10 = inlined_call_operand.vmem [shape: f32[1,8], index: 10, kind: input, shape index: {}]   ;;  %s1199_s11 = inlined_call_operand.vmem [shape: f32[1,8], index: 11, kind: input, shape index: {}]   ;;  %s1200_s12 = inlined_call_operand.vmem [shape: f32[1,8], index: 12, kind: input, shape index: {}]   ;;  %s1201_s13 = inlined_call_operand.vmem [shape: f32[8,10], index: 13, kind: input, shape index: {}]   ;;  %s1202_s14 = inlined_call_operand.vmem [shape: f32[8,10], index: 14, kind: input, shape index: {}]   ;;  %s1203_s15 = inlined_call_operand.vmem [shape: f32[8,10], index: 15, kind: input, shape index: {}]   ;;  %s1204_s16 = inlined_call_operand.vmem [shape: f32[8,10], index: 16, kind: input, shape index: {}]   ;;  %s1205_s17 = inlined_call_operand.vmem [shape: f32[1,10], index: 17, kind: input, shape index: {}]   ;;  %s1206_s18 = inlined_call_operand.hbm [shape: f32[2,5,8,8], index: 18, kind: output, shape index: {}]  }
   0x1   :  { %1210 = sst [smem:[#allocation5_spill]] %s1188_s0 }
   0x2   :  { %1211 = sst [smem:[#allocation6_spill]] %s1189_s1 }
   0x3   :  { %1212 = sst [smem:[#allocation7_spill]] %s1190_s2 }
   0x4   :  { %v65_v0 = vld [vmem:[%s1193_s5 + $0x10] sm:$0xff]  ;;  %v66_v1 = vld [vmem:[%s1193_s5 + $0x18] sm:$0xff]  ;;  %v63_v11 = vld [vmem:[%s1193_s5] sm:$0xff]  ;;  %s1213_s29 = sld [smem:[#allocation5_spill]]  ;;  %vm74_vm0 = vcmask 261120  }
   0x5   :  { %v94_v2 = vld [vmem:[%s1194_s6 + $0x10] sm:$0xff]  ;;  %v69_v3 = vpack.c.bf16 %v66_v1, %v65_v0  ;;  %v95_v4 = vld [vmem:[%s1194_s6 + $0x18] sm:$0xff]  ;;  %v64_v13 = vld [vmem:[%s1193_s5 + $0x8] sm:$0xff] }
   0x6   :  { %v118_v5 = vld [vmem:[%s1195_s7 + $0x10] sm:$0xff]  ;;  %v119_v6 = vld [vmem:[%s1195_s7 + $0x18] sm:$0xff]  ;;  %v97_v7 = vpack.c.bf16 %v95_v4, %v94_v2  ;;  %v92_v14 = vld [vmem:[%s1194_s6] sm:$0xff]  ;;  %v68_v16 = vpack.c.bf16 %v64_v13, %v63_v11 }
   0x7   :  { %v121_v8 = vpack.c.bf16 %v119_v6, %v118_v5  ;;  %v142_v9 = vld [vmem:[%s1196_s8 + $0x10] sm:$0xff]  ;;  %v143_v10 = vld [vmem:[%s1196_s8 + $0x18] sm:$0xff]  ;;  %84 = vmatpush.bf16.msra.mxu0 %v69_v3  ;;  %v93_v15 = vld [vmem:[%s1194_s6 + $0x8] sm:$0xff] }
   0x8   :  { %v145_v12 = vpack.c.bf16 %v143_v10, %v142_v9  ;;  %108 = vmatpush.bf16.msra.mxu1 %v97_v7  ;;  %v96_v17 = vpack.c.bf16 %v93_v15, %v92_v14  ;;  %v116_v18 = vld [vmem:[%s1195_s7] sm:$0xff]  ;;  %v117_v19 = vld [vmem:[%s1195_s7 + $0x8] sm:$0xff] }
   0x9   :  { %132 = vmatpush.bf16.msra.mxu2 %v121_v8  ;;  %v140_v20 = vld [vmem:[%s1196_s8] sm:$0xff]  ;;  %v120_v21 = vpack.c.bf16 %v117_v19, %v116_v18  ;;  %v141_v22 = vld [vmem:[%s1196_s8 + $0x8] sm:$0xff] }
   0xa   :  { %156 = vmatpush.bf16.msra.mxu3 %v145_v12  ;;  %v61_v23 = vld [vmem:[%s1213_s29] sm:$0xff]  ;;  %v62_v24 = vld [vmem:[%s1213_s29 + $0x8] sm:$0xff]  ;;  %v144_v25 = vpack.c.bf16 %v141_v22, %v140_v20 }
   0xb   :  { %v67_v26 = vpack.c.bf16 %v62_v24, %v61_v23  ;;  %85 = vmatpush.bf16.msra.mxu0 %v68_v16 }
   0xc   :  { %109 = vmatpush.bf16.msra.mxu1 %v96_v17 }
   0xd   :  { %133 = vmatpush.bf16.msra.mxu2 %v120_v21 }
   0xe   :  { %23 = vsyncpa [#allocation3], 0  ;;  %157 = vmatpush.bf16.msra.mxu3 %v144_v25  ;;  %764 = vmatmul.msk.bf16.vlgmr.msra.gmra.mxu0 %vm74_vm0, %v67_v26  ;;  %v167_v27 = vld [vmem:[%s1202_s14] sm:$0xff]  ;;  %vm174_vm1 = vcmask 1043456   ;;  %v273_v59 = vld [vmem:[%s1192_s4 + $0x8] sm:$0xff]  ;;  %vm170_vm2 = vcmask 64512  }
   0xf   :  { %765 = vmatmul.msk.bf16.vlgmr.msra.gmra.mxu1 %vm74_vm0, %v67_v26  ;;  %v164_v28 = vld [vmem:[%s1201_s13] sm:$0xff]  ;;  %v169_v29 = vpack.c.bf16 %v167_v27, %v167_v27  ;;  %v271_v62 = vld [vmem:[%s1191_s3 + $0x8] sm:$0xff]  ;;  %vm331_vm3 = vcmask 130048   ;;  %vm360_vm4 = vcmask 7168   ;;  %s864_s0 = smov 122   ;;  %s865_s7 = smov 126  }
  0x10   :  { %766 = vmatmul.msk.bf16.vlgmr.msra.gmra.mxu2 %vm74_vm0, %v67_v26  ;;  %v166_v30 = vpack.c.bf16 %v164_v28, %v164_v28  ;;  %v212_v33 = vld [vmem:[%s1203_s15] sm:$0xff]  ;;  %s1214_s1 = sld [smem:[#allocation7_spill]]  ;;  %s872_s24 = smov [#allocation2]  }
  0x11   :  { %767 = vmatmul.msk.bf16.vlgmr.msra.gmra.mxu3 %vm74_vm0, %v67_v26  ;;  %v176_v31 = vsel %vm174_vm1, %v169_v29, 0  ;;  %v237_v34 = vld [vmem:[%s1204_s16] sm:$0xff]  ;;  %v214_v35 = vpack.c.bf16 %v212_v33, %v212_v33  ;;  %s1215_s13 = sld [smem:[#allocation6_spill]]  ;;  %s750_s15 = sshll.u32 %s872_s24, 4  ;;  %s751_s15 = int_to_ptr.vmem [resolvable:$true] %s750_s15 }
  0x12   :  { %v196_v32 = vsel %vm174_vm1, %v166_v30, 0  ;;  %185 = vmatpush.bf16.msrb.mxu0 %v176_v31  ;;  %v239_v36 = vpack.c.bf16 %v237_v34, %v237_v34  ;;  %v826_v39 = vld [vmem:[%s1197_s9] ss:$0 sm:$0xff]  ;;  %s752_s25 = sshll.u32 %s1206_s18, 4  ;;  %s873_s9 = smov 128   ;;  %s753_s25 = int_to_ptr.hbm [resolvable:$true] %s752_s25 }
  0x13   :  { %205 = vmatpush.bf16.msrb.mxu1 %v196_v32  ;;  %v219_v37 = vsel %vm174_vm1, %v214_v35, 0  ;;  %v827_v40 = vld [vmem:[%s1198_s10] ss:$0 sm:$0xff] }
  0x14   :  { %v244_v38 = vsel %vm174_vm1, %v239_v36, 0  ;;  %228 = vmatpush.bf16.msrb.mxu2 %v219_v37  ;;  %v270_v42 = vld [vmem:[%s1191_s3] sm:$0xff]  ;;  %s859_s3 = smov 8  }
  0x15   :  { %253 = vmatpush.bf16.msrb.mxu3 %v244_v38  ;;  %v272_v44 = vld [vmem:[%s1192_s4] sm:$0xff] }
  0x16   :  { %v828_v51 = vld [vmem:[%s1199_s11] ss:$0 sm:$0xff] }
  0x17   :  { %v829_v52 = vld [vmem:[%s1200_s12] ss:$0 sm:$0xff]  ;;  %s863_s12 = smov 124  }
  0x8b   :  { %v87_v41 = vpop.f32.mrf.mxu0 }
  0x8c   :  { %v88_v43 = vadd.f32 %v826_v39, %v87_v41  ;;  %v111_v45 = vpop.f32.mrf.mxu1  ;;  %v861_v41 = vmov 1  }
  0x8d   :  { %v112_v46 = vadd.f32 %v827_v40, %v111_v45  ;;  %816 = vset.pattern.permute.xlu0 %v861_v41 }
  0x8e   :  { %v274_v47 = vmul.f32 %v272_v44, %v88_v43  ;;  %v284_v48 = vmul.f32 %v270_v42, %v88_v43 }
  0x8f   :  { %v276_v49 = vmul.f32 %v270_v42, %v112_v46  ;;  %v282_v50 = vmul.f32 %v272_v44, %v112_v46 }
  0x91   :  { %v278_v53 = vsub.f32 %v274_v47, %v276_v49  ;;  %v286_v54 = vadd.f32 %v284_v48, %v282_v50  ;;  %v830_v47 = vld [vmem:[%s1205_s17] ss:$0 sm:$0xff]  ;;  %s867_s17 = smov 120  }
  0x93   :  { %v135_v55 = vpop.f32.mrf.mxu2  ;;  %v89_v58 = vpop.f32.mrf.mxu0  ;;  %v288_v3 = vmul.f32 0.25, %v286_v54  ;;  %v280_v35 = vmul.f32 0.25, %v278_v53 }
  0x94   :  { %v136_v56 = vadd.f32 %v828_v51, %v135_v55  ;;  %v159_v57 = vpop.f32.mrf.mxu3  ;;  %v90_v61 = vadd.f32 %v826_v39, %v89_v58  ;;  %v113_v63 = vpop.f32.mrf.mxu1 }
  0x95   :  { %v160_v60 = vadd.f32 %v829_v52, %v159_v57  ;;  %v114_v2 = vadd.f32 %v827_v40, %v113_v63  ;;  %v860_v40 = vmov 3   ;;  %v561_v63 = vld [vmem:[%s1214_s1 + $0x8] sm:$0xff] }
  0x96   :  { %v300_v0 = vmul.f32 %v272_v44, %v136_v56  ;;  %v308_v1 = vmul.f32 %v270_v42, %v136_v56  ;;  %v165_v6 = vpack.c.bf16 %v90_v61, %v88_v43  ;;  %v1059_v7 = vmul.f32 %v273_v59, %v90_v61  ;;  %817 = vset.pattern.permute.xlu1 %v860_v40 }
  0x97   :  { %v302_v4 = vmul.f32 %v270_v42, %v160_v60  ;;  %v306_v5 = vmul.f32 %v272_v44, %v160_v60  ;;  %v285_v8 = vmul.f32 %v271_v62, %v90_v61  ;;  %v168_v9 = vpack.c.bf16 %v114_v2, %v112_v46 }
  0x98   :  { %v1061_v10 = vmul.f32 %v271_v62, %v114_v2  ;;  %v283_v11 = vmul.f32 %v273_v59, %v114_v2  ;;  %769 = vmatmul.msk.bf16.vlgmr.msrb.gmra.mxu1 %vm170_vm2, %v165_v6  ;;  %v862_v42 = vmov 0   ;;  %v870_v2 = vmov 7  }
  0x99   :  { %v304_v12 = vsub.f32 %v300_v0, %v302_v4  ;;  %v310_v13 = vadd.f32 %v308_v1, %v306_v5  ;;  %768 = vmatmul.msk.bf16.vlgmr.msrb.gmra.mxu0 %vm170_vm2, %v168_v9  ;;  %815 = vset.pattern.permute.xlu2 %v862_v42  ;;  %v868_v0 = vmov 5   ;;  %v869_v1 = vmov 9  }
  0x9a   :  { %v1065_v14 = vadd.f32 %v285_v8, %v283_v11  ;;  %v279_v15 = vsub.f32 %v1059_v7, %v1061_v10  ;;  %v322_v7 = vlaneseq }
  0x9b   :  { %v137_v16 = vpop.f32.mrf.mxu2  ;;  %v810_v17 = vpack.i.bf16 %v288_v3, %v310_v13 }
  0x9c   :  { %v138_v18 = vadd.f32 %v828_v51, %v137_v16  ;;  %v161_v19 = vpop.f32.mrf.mxu3  ;;  %v289_v61 = vmul.f32 0.25, %v1065_v14 }
  0x9d   :  { %v162_v20 = vadd.f32 %v829_v52, %v161_v19  ;;  %811 = vrot.lane.b32.xlu0 %v810_v17, %s859_s3  ;;  %v281_v17 = vmul.f32 0.25, %v279_v15 }
  0x9e   :  { %v213_v21 = vpack.c.bf16 %v138_v18, %v136_v56  ;;  %v1070_v22 = vmul.f32 %v273_v59, %v138_v18  ;;  %v309_v23 = vmul.f32 %v271_v62, %v138_v18 }
  0x9f   :  { %v238_v24 = vpack.c.bf16 %v162_v20, %v160_v60  ;;  %v1072_v25 = vmul.f32 %v271_v62, %v162_v20  ;;  %v307_v26 = vmul.f32 %v273_v59, %v162_v20  ;;  %v866_v59 = vmov 1.0   ;;  %v351_v62 = vld [vmem:[%s1214_s1] sm:$0xff] }
  0xa0   :  { %770 = vmatmul.msk.bf16.vlgmr.msrb.gmra.mxu2 %vm170_vm2, %v213_v21 }
  0xa1   :  { %771 = vmatmul.msk.bf16.vlgmr.msrb.gmra.mxu3 %vm170_vm2, %v238_v24  ;;  %v311_v27 = vadd.f32 %v309_v23, %v307_v26  ;;  %v305_v28 = vsub.f32 %v1070_v22, %v1072_v25  ;;  %v831_v22 = vld [vmem:[%s1215_s13] ss:$0 sm:$0xff]  ;;  %v323_v25 = vshrl.u32 %v322_v7, 7  ;;  %v325_v26 = vand.u32 127, %v322_v7 }
  0xa3   :  { %316 = vrot.lane.b32.xlu1 %v311_v27, %s859_s3  ;;  %vm326_vm5 = vcmp.gt.s32.totalorder %v323_v25, %v325_v26 }
 0x10f   :  { %v812_v29 = vpop.permute.xlu0 %811 }
 0x110   :  { %v813_v30 = vunpack.i.l.bf16 %v812_v29  ;;  %v814_v33 = vunpack.i.h.bf16 %v812_v29 }
 0x112   :  { %v320_v31 = vsel %vm170_vm2, %v304_v12, %v813_v30  ;;  %v298_v36 = vsel %vm170_vm2, %v280_v35, %v814_v33  ;;  %v871_v30 = vmov 0.0  }
 0x113   :  { %v330_v32 = vpack.c.bf16 %v320_v31, %v320_v31  ;;  %v329_v37 = vpack.c.bf16 %v298_v36, %v298_v36  ;;  %v772_v31 = vsel %vm326_vm5, 1.0, %v871_v30 }
 0x114   :  { %v1145_v35 = vmul.f32 1e+12, %v772_v31 }
 0x115   :  { %v336_v34 = vsel %vm331_vm3, %v330_v32, 0  ;;  %v207_v39 = vpop.f32.mrf.mxu1  ;;  %v317_v3 = vpop.permute.xlu1 %316 }
 0x116   :  { %345 = vmatpush.bf16.xpose.msra.mxu0 %v336_v34  ;;  %v187_v38 = vpop.f32.mrf.mxu0  ;;  %v321_v4 = vsel %vm170_vm2, %v305_v28, %v317_v3 }
 0x117   :  { %v208_v43 = vadd.f32 %v207_v39, %v187_v38  ;;  %v541_v5 = vpack.c.bf16 %v321_v4, %v321_v4 }
 0x119   :  { %v546_v8 = vsel %vm331_vm3, %v541_v5, 0 }
 0x11d   :  { %773 = vmatmul.msk.bf16.vlgmr.msra.gmra.mxu0 %vm331_vm3, %v329_v37  ;;  %v209_v50 = vpop.f32.mrf.mxu1 }
 0x11e   :  { %v189_v49 = vpop.f32.mrf.mxu0 }
 0x11f   :  { %v210_v52 = vadd.f32 %v209_v50, %v189_v49 }
 0x123   :  { %v230_v44 = vpop.f32.mrf.mxu2 }
 0x124   :  { %v235_v45 = vadd.f32 %v230_v44, %v208_v43  ;;  %v255_v46 = vpop.f32.mrf.mxu3 }
 0x126   :  { %v260_v48 = vadd.f32 %v255_v46, %v235_v45 }
 0x128   :  { %v266_v51 = vadd.f32 %v830_v47, %v260_v48 }
 0x12a   :  { %v268_v53 = vmul.f32 0.5, %v266_v51 }
 0x12b   :  { %v232_v54 = vpop.f32.mrf.mxu2 }
 0x12c   :  { %v236_v55 = vadd.f32 %v232_v54, %v210_v52  ;;  %435 = vrot.lane.b32.xlu2 %v268_v53, %s863_s12  ;;  %470 = vrot.lane.b32.xlu1 %v268_v53, %s864_s0  ;;  %v257_v56 = vpop.f32.mrf.mxu3 }
 0x12d   :  { %400 = vrot.lane.b32.xlu0 %v268_v53, %s865_s7  ;;  %774 = vmatpush.xpose.msk.msra.mxu1 %vm360_vm4, %v268_v53 }
 0x12e   :  { %v261_v57 = vadd.f32 %v257_v56, %v236_v55 }
 0x130   :  { %v267_v58 = vadd.f32 %v830_v47, %v261_v57  ;;  %775 = vmatmul.msk.f32.vlgmr.msra.gmra.mxu1 %vm360_vm4, %v866_v59 }
 0x132   :  { %v269_v60 = vmul.f32 0.5, %v267_v58 }
 0x134   :  { %785 = vmatpush.xpose.msk.msrb.mxu0 %vm360_vm4, %v269_v60  ;;  %505 = vrot.lane.b32.xlu2 %v268_v53, %s867_s17 }
 0x135   :  { %294 = vrot.lane.b32.xlu1 %v289_v61, %s859_s3  ;;  %606 = vrot.lane.b32.xlu0 %v269_v60, %s865_s7 }
 0x137   :  { %786 = vmatmul.msk.f32.vlgmr.msrb.gmra.mxu0 %vm360_vm4, %v866_v59 }
 0x13c   :  { %641 = vrot.lane.b32.xlu2 %v269_v60, %s863_s12 }
 0x13d   :  { %711 = vrot.lane.b32.xlu1 %v269_v60, %s867_s17  ;;  %676 = vrot.lane.b32.xlu0 %v269_v60, %s864_s0 }
 0x144   :  { %355 = vperm.xlu2 %815, %v351_v62  }
 0x145   :  { %426 = vperm.xlu1 %817, %v268_v53   ;;  %389 = vperm.xlu0 %816, %v268_v53  }
 0x14c   :  { %818 = vset.pattern.permute.xlu2 %v868_v0 }
 0x14d   :  { %819 = vset.pattern.permute.xlu1 %v862_v42  ;;  %821 = vset.pattern.permute.xlu0 %v869_v1 }
 0x14e   :  { %461 = vperm.xlu2 %818, %v268_v53   ;;  %565 = vperm.xlu1 %819, %v561_v63  }
 0x14f   :  { %531 = vperm.xlu0 %821, %v268_v53  }
 0x156   :  { %820 = vset.pattern.permute.xlu2 %v870_v2  ;;  %822 = vset.pattern.permute.xlu1 %v861_v41 }
 0x157   :  { %737 = vperm.xlu0 %821, %v269_v60   ;;  %496 = vperm.xlu2 %820, %v268_v53   ;;  %v832_v53 = vld [vmem:[%s1215_s13 + $0x1] ss:$0 sm:$0xff] }
 0x158   :  { %595 = vperm.xlu1 %822, %v269_v60  }
 0x15f   :  { %823 = vset.pattern.permute.xlu2 %v860_v40 }
 0x160   :  { %824 = vset.pattern.permute.xlu1 %v868_v0  ;;  %632 = vperm.xlu2 %823, %v269_v60  }
 0x161   :  { %667 = vperm.xlu1 %824, %v269_v60  }
 0x168   :  { %825 = vset.pattern.permute.xlu2 %v870_v2 }
 0x169   :  { %702 = vperm.xlu2 %825, %v269_v60  }
 0x186   :  { %v436_v6 = vpop.permute.xlu2 %435 }
 0x187   :  { %778 = vmatpush.xpose.msk.msra.mxu3 %vm360_vm4, %v436_v6 }
 0x18a   :  { %779 = vmatmul.msk.f32.vlgmr.msra.gmra.mxu3 %vm360_vm4, %v866_v59 }
 0x18b   :  { %555 = vmatpush.bf16.xpose.msrb.mxu3 %v546_v8 }
 0x18e   :  { %v506_v9 = vpop.permute.xlu2 %505 }
 0x196   :  { %v642_v16 = vpop.permute.xlu2 %641 }
 0x19a   :  { %v1108_v11 = vpop.f32.mrf.mxu0 }
 0x19e   :  { %v471_v12 = vpop.permute.xlu1 %470  ;;  %v356_v10 = vpop.permute.xlu2 %355 }
 0x19f   :  { %v401_v13 = vpop.permute.xlu0 %400  ;;  %780 = vmatpush.xpose.msk.msrb.mxu1 %vm360_vm4, %v471_v12  ;;  %v1131_v24 = vmul.f32 %v831_v22, %v356_v10 }
 0x1a0   :  { %776 = vmatpush.xpose.msk.msra.mxu2 %vm360_vm4, %v401_v13 }
 0x1a1   :  { %v394_v28 = vsub.f32 1.0, %v1131_v24 }
 0x1a2   :  { %v349_v14 = vpop.f32.mrf.mxu0  ;;  %781 = vmatmul.msk.f32.vlgmr.msrb.gmra.mxu1 %vm360_vm4, %v866_v59 }
 0x1a3   :  { %777 = vmatmul.msk.f32.vlgmr.msra.gmra.mxu2 %vm360_vm4, %v866_v59  ;;  %v1143_v33 = vmul.f32 1e+12, %v394_v28 }
 0x1a4   :  { %782 = vmatpush.xpose.msk.msrb.mxu2 %vm360_vm4, %v506_v9 }
 0x1a7   :  { %v295_v18 = vpop.permute.xlu1 %294  ;;  %v607_v19 = vpop.permute.xlu0 %606 }
 0x1a8   :  { %789 = vmatpush.xpose.msk.msra.mxu2 %vm360_vm4, %v642_v16  ;;  %v299_v20 = vsel %vm170_vm2, %v281_v17, %v295_v18  ;;  %787 = vmatpush.xpose.msk.msra.mxu1 %vm360_vm4, %v607_v19  ;;  %v462_v41 = vpop.permute.xlu2 %461 }
 0x1a9   :  { %v540_v21 = vpack.c.bf16 %v299_v20, %v299_v20 }
 0x1ab   :  { %783 = vmatmul.msk.f32.vlgmr.msrb.gmra.mxu2 %vm360_vm4, %v866_v59  ;;  %784 = vmatmul.msk.bf16.vlgmr.msrb.gmra.mxu3 %vm331_vm3, %v540_v21 }
 0x1ac   :  { %788 = vmatmul.msk.f32.vlgmr.msra.gmra.mxu1 %vm360_vm4, %v866_v59 }
 0x1ad   :  { %v384_v27 = vpop.f32.mrf.mxu1 }
 0x1ae   :  { %v387_v29 = vadd.f32 %v384_v27, %v1108_v11 }
 0x1af   :  { %v712_v15 = vpop.permute.xlu1 %711  ;;  %v677_v23 = vpop.permute.xlu0 %676 }
 0x1b0   :  { %791 = vmatpush.xpose.msk.msra.mxu0 %vm360_vm4, %v677_v23  ;;  %793 = vmatpush.xpose.msk.msrb.mxu1 %vm360_vm4, %v712_v15 }
 0x1b1   :  { %v497_v47 = vpop.permute.xlu2 %496 }
 0x1b3   :  { %790 = vmatmul.msk.f32.vlgmr.msra.gmra.mxu2 %vm360_vm4, %v866_v59  ;;  %792 = vmatmul.msk.f32.vlgmr.msra.gmra.mxu0 %vm360_vm4, %v866_v59 }
 0x1b4   :  { %794 = vmatmul.msk.f32.vlgmr.msrb.gmra.mxu1 %vm360_vm4, %v866_v59  ;;  %v590_v56 = vpop.f32.mrf.mxu0 }
 0x1b7   :  { %v390_v32 = vpop.permute.xlu0 %389  ;;  %v427_v46 = vpop.permute.xlu1 %426 }
 0x1b8   :  { %v392_v34 = vadd.f32 %v390_v32, %v387_v29 }
 0x1ba   :  { %v393_v36 = vmul.f32 %v392_v34, %v1131_v24  ;;  %v633_v58 = vpop.permute.xlu2 %632 }
 0x1bc   :  { %v396_v37 = vsub.f32 %v393_v36, %v1143_v33 }
 0x1be   :  { %v398_v38 = vsub.f32 %v396_v37, %v1145_v35 }
 0x1c0   :  { %399 = vst.msk [vmem:[#allocation2] sm:$0xff] %vm170_vm2, %v398_v38  ;;  %v566_v52 = vpop.permute.xlu1 %565 }
 0x1c1   :  { %v532_v60 = vpop.permute.xlu0 %531  ;;  %v569_v63 = vmul.f32 %v832_v53, %v566_v52 }
 0x1c3   :  { %v600_v2 = vsub.f32 1.0, %v569_v63  ;;  %v703_v21 = vpop.permute.xlu2 %702 }
 0x1c5   :  { %v601_v20 = vmul.f32 1e+12, %v600_v2 }
 0x1c9   :  { %v738_v7 = vpop.permute.xlu0 %737 }
 0x1ca   :  { %v596_v5 = vpop.permute.xlu1 %595 }
 0x20d   :  { %v456_v39 = vpop.f32.mrf.mxu3 }
 0x20e   :  { %v459_v40 = vadd.f32 %v456_v39, %v1108_v11 }
 0x210   :  { %v464_v42 = vadd.f32 %v462_v41, %v459_v40  ;;  %v668_v40 = vpop.permute.xlu1 %667 }
 0x212   :  { %v465_v43 = vmul.f32 %v464_v42, %v1131_v24 }
 0x214   :  { %v466_v44 = vsub.f32 %v465_v43, %v1143_v33 }
 0x216   :  { %v467_v45 = vsub.f32 %v466_v44, %v1145_v35 }
 0x218   :  { %469 = vst.msk [vmem:[#allocation2 + $0x10] sm:$0xff] %vm170_vm2, %v467_v45 }
 0x21f   :  { %v491_v48 = vpop.f32.mrf.mxu1 }
 0x220   :  { %v494_v49 = vadd.f32 %v491_v48, %v1108_v11 }
 0x222   :  { %v499_v50 = vadd.f32 %v497_v47, %v494_v49 }
 0x224   :  { %v500_v51 = vmul.f32 %v499_v50, %v1131_v24 }
 0x226   :  { %v501_v54 = vsub.f32 %v500_v51, %v1143_v33  ;;  %v421_v55 = vpop.f32.mrf.mxu2 }
 0x227   :  { %v424_v57 = vadd.f32 %v421_v55, %v1108_v11 }
 0x228   :  { %v502_v59 = vsub.f32 %v501_v54, %v1145_v35 }
 0x229   :  { %v429_v61 = vadd.f32 %v427_v46, %v424_v57  ;;  %v627_v62 = vpop.f32.mrf.mxu1 }
 0x22a   :  { %504 = vst.msk [vmem:[#allocation2 + $0x18] sm:$0xff] %vm170_vm2, %v502_v59 }
 0x22b   :  { %v430_v0 = vmul.f32 %v429_v61, %v1131_v24 }
 0x22d   :  { %v431_v1 = vsub.f32 %v430_v0, %v1143_v33 }
 0x22e   :  { %v526_v3 = vpop.f32.mrf.mxu2  ;;  %v557_v4 = vpop.f32.mrf.mxu3 }
 0x22f   :  { %v432_v6 = vsub.f32 %v431_v1, %v1145_v35  ;;  %v529_v8 = vadd.f32 %v526_v3, %v1108_v11  ;;  %v593_v9 = vadd.f32 %v590_v56, %v557_v4  ;;  %v630_v12 = vadd.f32 %v627_v62, %v557_v4 }
 0x230   :  { %v697_v13 = vpop.f32.mrf.mxu0 }
 0x231   :  { %434 = vst.msk [vmem:[#allocation2 + $0x8] sm:$0xff] %vm170_vm2, %v432_v6  ;;  %v534_v14 = vadd.f32 %v532_v60, %v529_v8  ;;  %v598_v16 = vadd.f32 %v596_v5, %v593_v9  ;;  %v635_v17 = vadd.f32 %v633_v58, %v630_v12  ;;  %v700_v18 = vadd.f32 %v697_v13, %v557_v4  ;;  %v732_v19 = vpop.f32.mrf.mxu1 }
 0x232   :  { %v735_v22 = vadd.f32 %v732_v19, %v557_v4 }
 0x233   :  { %v535_v10 = vmul.f32 %v534_v14, %v1131_v24  ;;  %v599_v15 = vmul.f32 %v598_v16, %v569_v63  ;;  %v636_v23 = vmul.f32 %v635_v17, %v569_v63  ;;  %v705_v25 = vadd.f32 %v703_v21, %v700_v18 }
 0x234   :  { %v740_v11 = vadd.f32 %v738_v7, %v735_v22 }
 0x235   :  { %v536_v26 = vsub.f32 %v535_v10, %v1143_v33  ;;  %v602_v27 = vsub.f32 %v599_v15, %v601_v20  ;;  %v637_v28 = vsub.f32 %v636_v23, %v601_v20  ;;  %v706_v29 = vmul.f32 %v705_v25, %v569_v63 }
 0x236   :  { %v741_v30 = vmul.f32 %v740_v11, %v569_v63  ;;  %v559_v31 = vpop.f32.mrf.mxu3  ;;  %v662_v32 = vpop.f32.mrf.mxu2 }
 0x237   :  { %v537_v34 = vsub.f32 %v536_v26, %v1145_v35  ;;  %v603_v36 = vsub.f32 %v602_v27, %v1145_v35  ;;  %v638_v37 = vsub.f32 %v637_v28, %v1145_v35  ;;  %v707_v38 = vsub.f32 %v706_v29, %v601_v20 }
 0x238   :  { %v742_v24 = vsub.f32 %v741_v30, %v601_v20  ;;  %v665_v39 = vadd.f32 %v662_v32, %v557_v4 }
 0x239   :  { %539 = vst.msk [vmem:[#allocation2 + $0x20] sm:$0xff] %vm170_vm2, %v537_v34  ;;  %v708_v33 = vsub.f32 %v707_v38, %v1145_v35 }
 0x23a   :  { %605 = vst.msk [vmem:[#allocation2 + $0x28] sm:$0xff] %vm170_vm2, %v603_v36  ;;  %v743_v41 = vsub.f32 %v742_v24, %v1145_v35  ;;  %v670_v42 = vadd.f32 %v668_v40, %v665_v39 }
 0x23b   :  { %640 = vst.msk [vmem:[#allocation2 + $0x30] sm:$0xff] %vm170_vm2, %v638_v37 }
 0x23c   :  { %710 = vst.msk [vmem:[#allocation2 + $0x40] sm:$0xff] %vm170_vm2, %v708_v33  ;;  %v671_v43 = vmul.f32 %v670_v42, %v569_v63 }
 0x23d   :  { %745 = vst.msk [vmem:[#allocation2 + $0x48] sm:$0xff] %vm170_vm2, %v743_v41 }
 0x23e   :  { %v672_v44 = vsub.f32 %v671_v43, %v601_v20 }
 0x240   :  { %v673_v45 = vsub.f32 %v672_v44, %v1145_v35 }
 0x242   :  { %675 = vst.msk [vmem:[#allocation2 + $0x38] sm:$0xff] %vm170_vm2, %v673_v45 }
 0x243   :  { %758 = dma.vmem_to_hbm [thread:$0]  %s751_s15, 1280, %s753_s25, [#allocation3], %s873_s9, %s873_s9, %s859_s3  }
 0x244   :  { %857 = dma.done.wait [#allocation3], 1280  }
 0x245   :  { %858 = vsyncadd [#allocation3], 4294966016 }
 0x246   :  { %763 = vsyncpa [#allocation3], 1 }

</bundles_post_ra>
